<compile_context>
chip_gen: v6e
topology: v6e:2x2x1
jax: 0.10.0
libtpu: 0.0.40
codegen_flags: <defaults>
</compile_context>

<pallas_src>
import functools

import jax
import jax.numpy as jnp
import numpy as np
from jax.experimental import pallas as pl
from jax.experimental.pallas import tpu as pltpu


# ------------------------------ fused kernel -------------------------------

def _danet_head_kernel(xpf_ref, masks_ref, gam_ref,
                       w5ac_ref, b5ac_ref,
                       wqkv_ref, bqkv_ref,
                       w51_ref, b51_ref, w52_ref, b52_ref,
                       w68_ref, b68_ref, w78_ref, b78_ref,
                       fsum_ref, sasc_ref, sa_ref, sc_ref,
                       pad_ref, *, H, W, Ci, Cout, CQ):
    """One batch element per grid step.  Working layout: (C, HW), HW in lanes."""
    HW = H * W
    f32 = jnp.float32
    bf16 = jnp.bfloat16

    # Re-zero only the (W+1)-wide guard columns of the conv51/52 row-pad
    # scratch (the centre span is fully overwritten below).  Done per grid step
    # so the kernel stays correct when the batch axis is sharded across
    # TensorCores (megacore / v7x).
    pad_ref[:, :, :W + 1] = jnp.zeros((2, Ci, W + 1), pad_ref.dtype)
    pad_ref[:, :, W + 1 + HW:] = jnp.zeros((2, Ci, W + 1), pad_ref.dtype)

    mask_l = masks_ref[0:1, :]          # (1, HW) bf16: 0 where col == 0
    mask_r = masks_ref[1:2, :]          # (1, HW) bf16: 0 where col == W-1

    def build_patches(load):
        # load(s) -> (C, HW) bf16 slice of a row-padded flat image at lane
        # offset s.  Tap (dy, dx) lives at offset dy*W + dx; horizontal
        # wrap-around at the row borders is killed by the column masks.
        # TODO(synk): if the unaligned tap slices show up as the binding slot,
        # build them with pltpu.roll on a resident slab instead.
        taps = []
        for dy in range(3):
            for dx in range(3):
                t = load(dy * W + dx)
                if dx == 0:
                    t = t * mask_l
                elif dx == 2:
                    t = t * mask_r
                taps.append(t)
        # Single (9*C, HW) bf16 slab -> one deep-K MXU matmul (f32 accum).
        return jnp.concatenate(taps, axis=0)

    # ---- conv5a + conv5c fused: one (2*Ci, 9*Cin) x (9*Cin, HW) matmul ------
    patches = build_patches(lambda s: xpf_ref[0, :, s:s + HW])
    feat12 = jnp.dot(w5ac_ref[...], patches,
                     preferred_element_type=f32) + b5ac_ref[...]
    feat12 = jnp.maximum(feat12, 0.0)                      # (2*Ci, HW) f32
    feat1 = feat12[:Ci, :]                                 # -> PAM branch
    feat2 = feat12[Ci:, :]                                 # -> CAM branch

    # ---- PAM: position attention --------------------------------------------
    # q/k/v fused into one matmul (q/k rows are zero-padded to CQ -> exact no-op).
    qkv = jnp.dot(wqkv_ref[...], feat1, preferred_element_type=f32) + bqkv_ref[...]
    q = qkv[:CQ, :]                                        # (CQ, HW)
    k = qkv[CQ:2 * CQ, :]                                  # (CQ, HW)
    v = qkv[2 * CQ:, :]                                    # (Ci, HW)
    # Keys-in-sublanes energy: energy_t[j, i] = k[:, j] . q[:, i].  Softmax runs
    # over sublanes and the output matmul v @ attn_t is then MXU-native
    # [Ci, HW] x [HW, HW] -- no (HW, HW) transpose is ever materialized.
    energy_t = jax.lax.dot_general(k, q, (((0,), (0,)), ((), ())),
                                   preferred_element_type=f32)     # (HW_j, HW_i)
    m = jnp.max(energy_t, axis=0, keepdims=True)
    e = jnp.exp(energy_t - m)
    attn_t = e * pl.reciprocal(jnp.sum(e, axis=0, keepdims=True), approx=True)
    pam_out = jnp.dot(v.astype(bf16), attn_t.astype(bf16),
                      preferred_element_type=f32)                  # (Ci, HW)
    sa_feat = gam_ref[0] * pam_out + feat1

    # ---- CAM: channel attention ----------------------------------------------
    ce = jax.lax.dot_general(feat2, feat2, (((1,), (1,)), ((), ())),
                             preferred_element_type=f32)           # (Ci, Ci)
    ce = jnp.max(ce, axis=-1, keepdims=True) - ce
    cm = jnp.max(ce, axis=-1, keepdims=True)
    cp = jnp.exp(ce - cm)
    cattn = cp * pl.reciprocal(jnp.sum(cp, axis=-1, keepdims=True), approx=True)
    cam_out = jnp.dot(cattn.astype(bf16), feat2.astype(bf16),
                      preferred_element_type=f32)                  # (Ci, HW)
    sc_feat = gam_ref[1] * cam_out + feat2

    # ---- conv51 / conv52: separate bf16 row-pad scratch slots ---------------
    def conv3x3(feat, w_ref_, b_ref_, slot):
        pad_ref[slot, :, W + 1:W + 1 + HW] = feat.astype(bf16)
        pk = build_patches(lambda s: pad_ref[slot, :, s:s + HW])   # (9*Ci, HW) bf16
        y = jnp.dot(w_ref_[...], pk, preferred_element_type=f32) + b_ref_[...]
        return jnp.maximum(y, 0.0)

    sa_conv = conv3x3(sa_feat, w51_ref, b51_ref, 0)
    sc_conv = conv3x3(sc_feat, w52_ref, b52_ref, 1)

    # ---- 1x1 heads (Dropout2d is identity in eval), fused via linearity -----
    # out_a = [w6; w8] @ sa_conv + [b6; b8];  out_c = [w7; w8] @ sc_conv + [b7; 0]
    # => sasc = w8 @ (sa_conv + sc_conv) + b8 = out_a[Cout:] + out_c[Cout:]
    feat_sum = sa_conv + sc_conv
    fsum_ref[0] = feat_sum
    out_a = jnp.dot(w68_ref[...], sa_conv, preferred_element_type=f32) + b68_ref[...]
    out_c = jnp.dot(w78_ref[...], sc_conv, preferred_element_type=f32) + b78_ref[...]
    sa_ref[0] = out_a[:Cout, :]
    sc_ref[0] = out_c[:Cout, :]
    sasc_ref[0] = out_a[Cout:, :] + out_c[Cout:, :]


# ----------------------- parameter prep (host / XLA side) ------------------

def prepare_kernel_params(p):
    """Fold BN scale into conv weights, reshape 3x3 convs to (Cout, 9*Cin) bf16
    matmul form, stack PAM q/k/v into one matmul, stack the 1x1 heads (with b8
    folded), and pack the gammas into one SMEM scalar array."""
    def fold3x3(w_hwio, scale, shift):
        kh, kw, cin, cout = w_hwio.shape
        wm = jnp.transpose(w_hwio, (3, 0, 1, 2)).reshape(cout, kh * kw * cin)
        wm = wm * scale[0][:, None]                 # BN scale folded into W
        return wm.astype(jnp.bfloat16), shift[0][:, None].astype(jnp.float32)

    w5a, b5a = fold3x3(p["conv5a_w"], p["conv5a_scale"], p["conv5a_shift"])
    w5c, b5c = fold3x3(p["conv5c_w"], p["conv5c_scale"], p["conv5c_shift"])
    w51, b51 = fold3x3(p["conv51_w"], p["conv51_scale"], p["conv51_shift"])
    w52, b52 = fold3x3(p["conv52_w"], p["conv52_scale"], p["conv52_shift"])

    ci = p["pam_wv"].shape[0]
    cq = p["pam_wq"].shape[1]
    cq_pad = max(8, ((cq + 7) // 8) * 8)            # round up to full sublanes

    def pad_qk(w, b):
        wp = jnp.zeros((cq_pad, ci), jnp.float32).at[:cq, :].set(w.T)
        bp = jnp.zeros((cq_pad, 1), jnp.float32).at[:cq, 0].set(b[0])
        return wp, bp

    wq, bq = pad_qk(p["pam_wq"], p["pam_bq"])
    wk, bk = pad_qk(p["pam_wk"], p["pam_bk"])
    wv = jnp.transpose(p["pam_wv"])                 # (Ci, Ci)
    bv = jnp.transpose(p["pam_bv"])                 # (Ci, 1)
    wqkv = jnp.concatenate([wq, wk, wv], axis=0)    # (2*cq_pad + Ci, Ci)
    bqkv = jnp.concatenate([bq, bk, bv], axis=0)    # (2*cq_pad + Ci, 1)

    w6 = jnp.transpose(p["conv6_w"]); b6 = jnp.transpose(p["conv6_b"])
    w7 = jnp.transpose(p["conv7_w"]); b7 = jnp.transpose(p["conv7_b"])
    w8 = jnp.transpose(p["conv8_w"]); b8 = jnp.transpose(p["conv8_b"])
    w68 = jnp.concatenate([w6, w8], axis=0)         # (2*Cout, Ci)
    w78 = jnp.concatenate([w7, w8], axis=0)
    b68 = jnp.concatenate([b6, b8], axis=0)         # b8 folded here once
    b78 = jnp.concatenate([b7, jnp.zeros_like(b8)], axis=0)

    gammas = jnp.concatenate([p["pam_gamma"].reshape(1),
                              p["cam_gamma"].reshape(1)]).astype(jnp.float32)

    return dict(
        w5ac=jnp.concatenate([w5a, w5c], axis=0),   # (2*Ci, 9*Cin) bf16
        b5ac=jnp.concatenate([b5a, b5c], axis=0),   # (2*Ci, 1) f32
        wqkv=wqkv, bqkv=bqkv, gammas=gammas,
        w51=w51, b51=b51, w52=w52, b52=b52,
        w68=w68, b68=b68, w78=w78, b78=b78,
    )


# ------------------------------- wrapper ------------------------------------

def danet_head_forward(x_nchw, params):
    B, Cin, H, W = x_nchw.shape
    HW = H * W
    HWp = HW + 2 * W + 2
    kp = prepare_kernel_params(params)
    Ci = kp["w51"].shape[0]
    Cout = kp["w68"].shape[0] // 2
    CQ = (kp["wqkv"].shape[0] - Ci) // 2

    # Row-pad + flatten + bf16 cast: [zeros(W+1) | x.flat | zeros(W+1)] per (b, c).
    # Tap (dy, dx) of the 3x3 conv is then the slice [dy*W+dx : dy*W+dx+HW].
    xf = x_nchw.reshape(B, Cin, HW)
    zpad = jnp.zeros((B, Cin, W + 1), x_nchw.dtype)
    xpf = jnp.concatenate([zpad, xf, zpad], axis=-1).astype(jnp.bfloat16)

    cols = jnp.arange(HW, dtype=jnp.int32) % W
    masks = jnp.stack([(cols != 0), (cols != W - 1)]).astype(jnp.bfloat16)  # (2, HW)

    kernel = functools.partial(_danet_head_kernel, H=H, W=W, Ci=Ci, Cout=Cout, CQ=CQ)

    def full(arr):
        nd = arr.ndim
        return pl.BlockSpec(arr.shape, lambda b, _nd=nd: (0,) * _nd)

    in_specs = [
        pl.BlockSpec((1, Cin, HWp), lambda b: (b, 0, 0)),
        full(masks),
        pl.BlockSpec(memory_space=pltpu.MemorySpace.SMEM),   # gammas (scalars)
        full(kp["w5ac"]), full(kp["b5ac"]),
        full(kp["wqkv"]), full(kp["bqkv"]),
        full(kp["w51"]), full(kp["b51"]),
        full(kp["w52"]), full(kp["b52"]),
        full(kp["w68"]), full(kp["b68"]),
        full(kp["w78"]), full(kp["b78"]),
    ]
    out_specs = (
        pl.BlockSpec((1, Ci, HW), lambda b: (b, 0, 0)),
        pl.BlockSpec((1, Cout, HW), lambda b: (b, 0, 0)),
        pl.BlockSpec((1, Cout, HW), lambda b: (b, 0, 0)),
        pl.BlockSpec((1, Cout, HW), lambda b: (b, 0, 0)),
    )
    out_shapes = (
        jax.ShapeDtypeStruct((B, Ci, HW), jnp.float32),      # feat_sum
        jax.ShapeDtypeStruct((B, Cout, HW), jnp.float32),    # sasc_output
        jax.ShapeDtypeStruct((B, Cout, HW), jnp.float32),    # sa_output
        jax.ShapeDtypeStruct((B, Cout, HW), jnp.float32),    # sc_output
    )

    # Advisory cost estimate so XLA schedules the wrapper pad/reshape around us.
    flops = 2 * B * HW * (
        (2 * Ci) * (9 * Cin)          # conv5a/c
        + (2 * CQ + Ci) * Ci          # PAM q/k/v
        + CQ * HW                     # PAM energy
        + Ci * HW                     # PAM output
        + 2 * Ci * Ci                 # CAM energy + output
        + 2 * Ci * (9 * Ci)           # conv51/52
        + 2 * (2 * Cout) * Ci)        # 1x1 heads
    bytes_accessed = int(
        xpf.size * 2 + masks.size * 2
        + sum(int(np.prod(v.shape)) * v.dtype.itemsize for v in kp.values())
        + 4 * B * HW * (Ci + 3 * Cout))
    cost = pl.CostEstimate(flops=int(flops),
                           transcendentals=int(B * (HW * HW + Ci * Ci)),
                           bytes_accessed=bytes_accessed)

    feat_sum, sasc, sa, sc = pl.pallas_call(
        kernel,
        out_shape=out_shapes,
        grid=(B,),
        in_specs=in_specs,
        out_specs=out_specs,
        scratch_shapes=[pltpu.VMEM((2, Ci, HWp), jnp.bfloat16)],
        compiler_params=pltpu.CompilerParams(
            dimension_semantics=("parallel",)),
        cost_estimate=cost,
    )(xpf, masks, kp["gammas"],
      kp["w5ac"], kp["b5ac"],
      kp["wqkv"], kp["bqkv"],
      kp["w51"], kp["b51"], kp["w52"], kp["b52"],
      kp["w68"], kp["b68"], kp["w78"], kp["b78"])

    def to_nchw(t):
        return t.reshape(B, t.shape[1], H, W)

    return (to_nchw(feat_sum), to_nchw(sasc), to_nchw(sa), to_nchw(sc))


# ----------------------- deterministic parameter init ----------------------

def init_params(key, in_channels, out_channels):
    inter = in_channels // 4
    cq = inter // 8
    keys = iter(jax.random.split(key, 40))

    def nrm(shape, scale=0.05):
        return scale * jax.random.normal(next(keys), shape, jnp.float32)

    def bn(c):
        w = 1.0 + 0.1 * jax.random.normal(next(keys), (c,), jnp.float32)
        b = 0.1 * jax.random.normal(next(keys), (c,), jnp.float32)
        mean = 0.1 * jax.random.normal(next(keys), (c,), jnp.float32)
        var = 0.5 + jax.random.uniform(next(keys), (c,), jnp.float32)
        scale = w / jnp.sqrt(var + 1e-5)
        shift = b - mean * scale
        return scale.reshape(1, c), shift.reshape(1, c)

    p = {}
    p["conv5a_w"] = nrm((3, 3, in_channels, inter))
    p["conv5a_scale"], p["conv5a_shift"] = bn(inter)
    p["conv5c_w"] = nrm((3, 3, in_channels, inter))
    p["conv5c_scale"], p["conv5c_shift"] = bn(inter)
    # PAM 1x1 convs (stored as (Cin, Cout) matmul weights, NHWC-style)
    p["pam_wq"] = nrm((inter, cq)); p["pam_bq"] = nrm((1, cq))
    p["pam_wk"] = nrm((inter, cq)); p["pam_bk"] = nrm((1, cq))
    p["pam_wv"] = nrm((inter, inter)); p["pam_bv"] = nrm((1, inter))
    # PyTorch inits gamma to 0; use nonzero values so the attention path is
    # actually exercised in the comparison.
    p["pam_gamma"] = jnp.full((1, 1), 0.5, jnp.float32)
    p["cam_gamma"] = jnp.full((1, 1), 0.3, jnp.float32)
    p["conv51_w"] = nrm((3, 3, inter, inter))
    p["conv51_scale"], p["conv51_shift"] = bn(inter)
    p["conv52_w"] = nrm((3, 3, inter, inter))
    p["conv52_scale"], p["conv52_shift"] = bn(inter)
    p["conv6_w"] = nrm((inter, out_channels)); p["conv6_b"] = nrm((1, out_channels))
    p["conv7_w"] = nrm((inter, out_channels)); p["conv7_b"] = nrm((1, out_channels))
    p["conv8_w"] = nrm((inter, out_channels)); p["conv8_b"] = nrm((1, out_channels))
    return p


# ----------------------------- pure-JAX reference --------------------------

def reference_forward(x_nchw, p):
    B, Cin, H, W = x_nchw.shape
    x = jnp.transpose(x_nchw, (0, 2, 3, 1))

    def cbr(xi, w, scale, shift):
        y = jax.lax.conv_general_dilated(
            xi, w, (1, 1), "SAME", dimension_numbers=("NHWC", "HWIO", "NHWC"))
        return jnp.maximum(y * scale[0] + shift[0], 0.0)

    feat1 = cbr(x, p["conv5a_w"], p["conv5a_scale"], p["conv5a_shift"])
    feat2 = cbr(x, p["conv5c_w"], p["conv5c_scale"], p["conv5c_shift"])
    Ci = feat1.shape[-1]
    f1 = feat1.reshape(B, H * W, Ci)
    f2 = feat2.reshape(B, H * W, Ci)

    q = f1 @ p["pam_wq"] + p["pam_bq"][0]
    k = f1 @ p["pam_wk"] + p["pam_bk"][0]
    v = f1 @ p["pam_wv"] + p["pam_bv"][0]
    attn = jax.nn.softmax(jnp.einsum("bqc,bkc->bqk", q, k), axis=-1)
    sa = p["pam_gamma"][0, 0] * jnp.einsum("bqk,bkc->bqc", attn, v) + f1

    energy = jnp.einsum("bnc,bnd->bcd", f2, f2)
    energy = jnp.max(energy, axis=-1, keepdims=True) - energy
    cattn = jax.nn.softmax(energy, axis=-1)
    sc = p["cam_gamma"][0, 0] * jnp.einsum("bnc,bdc->bnd", f2, cattn) + f2

    sa_conv = cbr(sa.reshape(B, H, W, Ci), p["conv51_w"],
                  p["conv51_scale"], p["conv51_shift"]).reshape(B, H * W, Ci)
    sc_conv = cbr(sc.reshape(B, H, W, Ci), p["conv52_w"],
                  p["conv52_scale"], p["conv52_shift"]).reshape(B, H * W, Ci)

    sa_out = sa_conv @ p["conv6_w"] + p["conv6_b"][0]
    sc_out = sc_conv @ p["conv7_w"] + p["conv7_b"][0]
    feat_sum = sa_conv + sc_conv
    sasc_out = feat_sum @ p["conv8_w"] + p["conv8_b"][0]

    def to_nchw(t):
        c = t.shape[-1]
        return jnp.transpose(t.reshape(B, H, W, c), (0, 3, 1, 2))

    return (to_nchw(feat_sum), to_nchw(sasc_out), to_nchw(sa_out), to_nchw(sc_out))


# ----------------------------------- main ----------------------------------

if __name__ == "__main__":
    B, Cin, H, W = 2, 64, 16, 16      # inter = 16, PAM q/k dim = 2, HW = 256
    Cout = 8
    key = jax.random.PRNGKey(0)
    kx, kp_ = jax.random.split(key)
    x = jax.random.normal(kx, (B, Cin, H, W), jnp.float32)
    params = init_params(kp_, Cin, Cout)

    fwd = jax.jit(danet_head_forward)
    outs = jax.block_until_ready(fwd(x, params))
    refs = jax.block_until_ready(reference_forward(x, params))

    for o, r in zip(outs, refs):
        assert o.shape == r.shape, (o.shape, r.shape)
        np.testing.assert_allclose(np.asarray(o), np.asarray(r),
                                   rtol=2e-2, atol=2e-2)
    print("KERNEL_OK")
</pallas_src>

<mosaic_0001>
module attributes {stable_mosaic.version = 11 : i64} {
  func.func @_danet_head_kernel(%arg0: i32, %arg1: memref<1x64x290xbf16, #tpu.memory_space<vmem>>, %arg2: memref<2x256xbf16, #tpu.memory_space<vmem>>, %arg3: memref<2xf32, #tpu.memory_space<smem>>, %arg4: memref<32x576xbf16, #tpu.memory_space<vmem>>, %arg5: memref<32x1xf32, #tpu.memory_space<vmem>>, %arg6: memref<32x16xf32, #tpu.memory_space<vmem>>, %arg7: memref<32x1xf32, #tpu.memory_space<vmem>>, %arg8: memref<16x144xbf16, #tpu.memory_space<vmem>>, %arg9: memref<16x1xf32, #tpu.memory_space<vmem>>, %arg10: memref<16x144xbf16, #tpu.memory_space<vmem>>, %arg11: memref<16x1xf32, #tpu.memory_space<vmem>>, %arg12: memref<16x16xf32, #tpu.memory_space<vmem>>, %arg13: memref<16x1xf32, #tpu.memory_space<vmem>>, %arg14: memref<16x16xf32, #tpu.memory_space<vmem>>, %arg15: memref<16x1xf32, #tpu.memory_space<vmem>>, %arg16: memref<1x16x256xf32, #tpu.memory_space<vmem>>, %arg17: memref<1x8x256xf32, #tpu.memory_space<vmem>>, %arg18: memref<1x8x256xf32, #tpu.memory_space<vmem>>, %arg19: memref<1x8x256xf32, #tpu.memory_space<vmem>>, %arg20: memref<2x16x290xbf16, #tpu.memory_space<vmem>>) attributes {dimension_semantics = [#tpu.dimension_semantics<parallel>], iteration_bounds = array<i64: 2>, scalar_prefetch = 0 : i64, scratch_operands = 1 : i64, tpu.core_type = #tpu.core_type<tc>, window_params = [{transform_indices = @transform_0, window_bounds = array<i64: 1, 64, 290>}, {pipeline_mode = #tpu.pipeline_mode<synchronous>, transform_indices = @transform_1, window_bounds = array<i64: 2, 256>}, {transform_indices = @transform_2, window_bounds = array<i64: 2>}, {pipeline_mode = #tpu.pipeline_mode<synchronous>, transform_indices = @transform_3, window_bounds = array<i64: 32, 576>}, {pipeline_mode = #tpu.pipeline_mode<synchronous>, transform_indices = @transform_4, window_bounds = array<i64: 32, 1>}, {pipeline_mode = #tpu.pipeline_mode<synchronous>, transform_indices = @transform_5, window_bounds = array<i64: 32, 16>}, {pipeline_mode = #tpu.pipeline_mode<synchronous>, transform_indices = @transform_6, window_bounds = array<i64: 32, 1>}, {pipeline_mode = #tpu.pipeline_mode<synchronous>, transform_indices = @transform_7, window_bounds = array<i64: 16, 144>}, {pipeline_mode = #tpu.pipeline_mode<synchronous>, transform_indices = @transform_8, window_bounds = array<i64: 16, 1>}, {pipeline_mode = #tpu.pipeline_mode<synchronous>, transform_indices = @transform_9, window_bounds = array<i64: 16, 144>}, {pipeline_mode = #tpu.pipeline_mode<synchronous>, transform_indices = @transform_10, window_bounds = array<i64: 16, 1>}, {pipeline_mode = #tpu.pipeline_mode<synchronous>, transform_indices = @transform_11, window_bounds = array<i64: 16, 16>}, {pipeline_mode = #tpu.pipeline_mode<synchronous>, transform_indices = @transform_12, window_bounds = array<i64: 16, 1>}, {pipeline_mode = #tpu.pipeline_mode<synchronous>, transform_indices = @transform_13, window_bounds = array<i64: 16, 16>}, {pipeline_mode = #tpu.pipeline_mode<synchronous>, transform_indices = @transform_14, window_bounds = array<i64: 16, 1>}, {transform_indices = @transform_15, window_bounds = array<i64: 1, 16, 256>}, {transform_indices = @transform_16, window_bounds = array<i64: 1, 8, 256>}, {transform_indices = @transform_17, window_bounds = array<i64: 1, 8, 256>}, {transform_indices = @transform_18, window_bounds = array<i64: 1, 8, 256>}]} {
    %cst = arith.constant 0.000000e+00 : bf16
    %0 = vector.broadcast %cst : bf16 to vector<2x16x17xbf16>
    %c0 = arith.constant 0 : index
    %c0_0 = arith.constant 0 : index
    %c0_1 = arith.constant 0 : index
    %1 = vector.load %arg20[%c0, %c0_0, %c0_1] : memref<2x16x290xbf16, #tpu.memory_space<vmem>>, vector<2x16x17xbf16>
    tpu.vector_store %arg20[%c0, %c0_0, %c0_1], %0 {strides = array<i32>} : memref<2x16x290xbf16, #tpu.memory_space<vmem>>, vector<2x16x17xbf16>,
    %cst_2 = arith.constant 0.000000e+00 : bf16
    %2 = vector.broadcast %cst_2 : bf16 to vector<2x16x17xbf16>
    %c0_3 = arith.constant 0 : index
    %c0_4 = arith.constant 0 : index
    %c273 = arith.constant 273 : index
    %3 = vector.load %arg20[%c0_3, %c0_4, %c273] : memref<2x16x290xbf16, #tpu.memory_space<vmem>>, vector<2x16x17xbf16>
    tpu.vector_store %arg20[%c0_3, %c0_4, %c273], %2 {strides = array<i32>} : memref<2x16x290xbf16, #tpu.memory_space<vmem>>, vector<2x16x17xbf16>,
    %c0_5 = arith.constant 0 : index
    %c0_6 = arith.constant 0 : index
    %4 = vector.load %arg2[%c0_5, %c0_6] : memref<2x256xbf16, #tpu.memory_space<vmem>>, vector<1x256xbf16>
    %c1 = arith.constant 1 : index
    %c0_7 = arith.constant 0 : index
    %5 = vector.load %arg2[%c1, %c0_7] : memref<2x256xbf16, #tpu.memory_space<vmem>>, vector<1x256xbf16>
    %c0_8 = arith.constant 0 : index
    %c0_9 = arith.constant 0 : index
    %c0_10 = arith.constant 0 : index
    %6 = vector.load %arg1[%c0_8, %c0_9, %c0_10] : memref<1x64x290xbf16, #tpu.memory_space<vmem>>, vector<1x64x256xbf16>
    %7 = vector.shape_cast %6 : vector<1x64x256xbf16> to vector<64x256xbf16>
    %8 = vector.broadcast %4 : vector<1x256xbf16> to vector<64x256xbf16>
    %9 = arith.mulf %7, %8 : vector<64x256xbf16>
    %c0_11 = arith.constant 0 : index
    %c0_12 = arith.constant 0 : index
    %c1_13 = arith.constant 1 : index
    %10 = vector.load %arg1[%c0_11, %c0_12, %c1_13] : memref<1x64x290xbf16, #tpu.memory_space<vmem>>, vector<1x64x256xbf16>
    %11 = vector.shape_cast %10 : vector<1x64x256xbf16> to vector<64x256xbf16>
    %c0_14 = arith.constant 0 : index
    %c0_15 = arith.constant 0 : index
    %c2 = arith.constant 2 : index
    %12 = vector.load %arg1[%c0_14, %c0_15, %c2] : memref<1x64x290xbf16, #tpu.memory_space<vmem>>, vector<1x64x256xbf16>
    %13 = vector.shape_cast %12 : vector<1x64x256xbf16> to vector<64x256xbf16>
    %14 = vector.broadcast %5 : vector<1x256xbf16> to vector<64x256xbf16>
    %15 = arith.mulf %13, %14 : vector<64x256xbf16>
    %c0_16 = arith.constant 0 : index
    %c0_17 = arith.constant 0 : index
    %c16 = arith.constant 16 : index
    %16 = vector.load %arg1[%c0_16, %c0_17, %c16] : memref<1x64x290xbf16, #tpu.memory_space<vmem>>, vector<1x64x256xbf16>
    %17 = vector.shape_cast %16 : vector<1x64x256xbf16> to vector<64x256xbf16>
    %18 = vector.broadcast %4 : vector<1x256xbf16> to vector<64x256xbf16>
    %19 = arith.mulf %17, %18 : vector<64x256xbf16>
    %c0_18 = arith.constant 0 : index
    %c0_19 = arith.constant 0 : index
    %c17 = arith.constant 17 : index
    %20 = vector.load %arg1[%c0_18, %c0_19, %c17] : memref<1x64x290xbf16, #tpu.memory_space<vmem>>, vector<1x64x256xbf16>
    %21 = vector.shape_cast %20 : vector<1x64x256xbf16> to vector<64x256xbf16>
    %c0_20 = arith.constant 0 : index
    %c0_21 = arith.constant 0 : index
    %c18 = arith.constant 18 : index
    %22 = vector.load %arg1[%c0_20, %c0_21, %c18] : memref<1x64x290xbf16, #tpu.memory_space<vmem>>, vector<1x64x256xbf16>
    %23 = vector.shape_cast %22 : vector<1x64x256xbf16> to vector<64x256xbf16>
    %24 = vector.broadcast %5 : vector<1x256xbf16> to vector<64x256xbf16>
    %25 = arith.mulf %23, %24 : vector<64x256xbf16>
    %c0_22 = arith.constant 0 : index
    %c0_23 = arith.constant 0 : index
    %c32 = arith.constant 32 : index
    %26 = vector.load %arg1[%c0_22, %c0_23, %c32] : memref<1x64x290xbf16, #tpu.memory_space<vmem>>, vector<1x64x256xbf16>
    %27 = vector.shape_cast %26 : vector<1x64x256xbf16> to vector<64x256xbf16>
    %28 = vector.broadcast %4 : vector<1x256xbf16> to vector<64x256xbf16>
    %29 = arith.mulf %27, %28 : vector<64x256xbf16>
    %c0_24 = arith.constant 0 : index
    %c0_25 = arith.constant 0 : index
    %c33 = arith.constant 33 : index
    %30 = vector.load %arg1[%c0_24, %c0_25, %c33] : memref<1x64x290xbf16, #tpu.memory_space<vmem>>, vector<1x64x256xbf16>
    %31 = vector.shape_cast %30 : vector<1x64x256xbf16> to vector<64x256xbf16>
    %c0_26 = arith.constant 0 : index
    %c0_27 = arith.constant 0 : index
    %c34 = arith.constant 34 : index
    %32 = vector.load %arg1[%c0_26, %c0_27, %c34] : memref<1x64x290xbf16, #tpu.memory_space<vmem>>, vector<1x64x256xbf16>
    %33 = vector.shape_cast %32 : vector<1x64x256xbf16> to vector<64x256xbf16>
    %34 = vector.broadcast %5 : vector<1x256xbf16> to vector<64x256xbf16>
    %35 = arith.mulf %33, %34 : vector<64x256xbf16>
    %36 = tpu.concatenate %9, %11, %15, %19, %21, %25, %29, %31, %35 in 0 : vector<64x256xbf16>, vector<64x256xbf16>, vector<64x256xbf16>, vector<64x256xbf16>, vector<64x256xbf16>, vector<64x256xbf16>, vector<64x256xbf16>, vector<64x256xbf16>, vector<64x256xbf16> -> vector<576x256xbf16>
    %c0_28 = arith.constant 0 : index
    %c0_29 = arith.constant 0 : index
    %37 = vector.load %arg4[%c0_28, %c0_29] : memref<32x576xbf16, #tpu.memory_space<vmem>>, vector<32x576xbf16>
    %cst_30 = arith.constant dense<0.000000e+00> : vector<32x256xf32>
    %38 = tpu.matmul %37, %36, %cst_30 {dimension_numbers = #tpu.dot_dimension_numbers<[1], [0], [0], [1], [0, 0, 1, 1], [], []>} : vector<32x576xbf16>, vector<576x256xbf16>, vector<32x256xf32> -> vector<32x256xf32>
    %c0_31 = arith.constant 0 : index
    %c0_32 = arith.constant 0 : index
    %39 = vector.load %arg5[%c0_31, %c0_32] : memref<32x1xf32, #tpu.memory_space<vmem>>, vector<32x1xf32>
    %40 = vector.broadcast %39 : vector<32x1xf32> to vector<32x256xf32>
    %41 = arith.addf %38, %40 : vector<32x256xf32>
    %cst_33 = arith.constant 0.000000e+00 : f32
    %42 = vector.broadcast %cst_33 : f32 to vector<32x256xf32>
    %43 = arith.maximumf %41, %42 : vector<32x256xf32>
    %44 = vector.extract_strided_slice %43 {offsets = [0, 0], sizes = [16, 256], strides = [1, 1]} : vector<32x256xf32> to vector<16x256xf32>
    %45 = vector.extract_strided_slice %43 {offsets = [16, 0], sizes = [16, 256], strides = [1, 1]} : vector<32x256xf32> to vector<16x256xf32>
    %c0_34 = arith.constant 0 : index
    %c0_35 = arith.constant 0 : index
    %46 = vector.load %arg6[%c0_34, %c0_35] : memref<32x16xf32, #tpu.memory_space<vmem>>, vector<32x16xf32>
    %cst_36 = arith.constant dense<0.000000e+00> : vector<32x256xf32>
    %47 = tpu.matmul %46, %44, %cst_36 {dimension_numbers = #tpu.dot_dimension_numbers<[1], [0], [0], [1], [0, 0, 1, 1], [], []>} : vector<32x16xf32>, vector<16x256xf32>, vector<32x256xf32> -> vector<32x256xf32>
    %c0_37 = arith.constant 0 : index
    %c0_38 = arith.constant 0 : index
    %48 = vector.load %arg7[%c0_37, %c0_38] : memref<32x1xf32, #tpu.memory_space<vmem>>, vector<32x1xf32>
    %49 = vector.broadcast %48 : vector<32x1xf32> to vector<32x256xf32>
    %50 = arith.addf %47, %49 : vector<32x256xf32>
    %51 = vector.extract_strided_slice %50 {offsets = [0, 0], sizes = [8, 256], strides = [1, 1]} : vector<32x256xf32> to vector<8x256xf32>
    %52 = vector.extract_strided_slice %50 {offsets = [8, 0], sizes = [8, 256], strides = [1, 1]} : vector<32x256xf32> to vector<8x256xf32>
    %53 = vector.extract_strided_slice %50 {offsets = [16, 0], sizes = [16, 256], strides = [1, 1]} : vector<32x256xf32> to vector<16x256xf32>
    %cst_39 = arith.constant dense<0.000000e+00> : vector<256x256xf32>
    %54 = tpu.matmul %52, %51, %cst_39 {dimension_numbers = #tpu.dot_dimension_numbers<[0], [0], [1], [1], [0, 1, 1, 1], [], []>} : vector<8x256xf32>, vector<8x256xf32>, vector<256x256xf32> -> vector<256x256xf32>
    %cst_40 = arith.constant dense<0xFF800000> : vector<256xf32>
    %55 = vector.multi_reduction <maximumf>, %54, %cst_40 [0] : vector<256x256xf32> to vector<256xf32>
    %56 = vector.shape_cast %55 : vector<256xf32> to vector<1x256xf32>
    %57 = vector.broadcast %56 : vector<1x256xf32> to vector<256x256xf32>
    %58 = arith.subf %54, %57 : vector<256x256xf32>
    %59 = math.exp %58 : vector<256x256xf32>
    %cst_41 = arith.constant dense<0.000000e+00> : vector<256xf32>
    %60 = vector.multi_reduction <add>, %59, %cst_41 [0] : vector<256x256xf32> to vector<256xf32>
    %61 = vector.shape_cast %60 : vector<256xf32> to vector<1x256xf32>
    %62 = tpu.reciprocal %61 {approx = true} : vector<1x256xf32> -> vector<1x256xf32>
    %63 = vector.broadcast %62 : vector<1x256xf32> to vector<256x256xf32>
    %64 = arith.mulf %59, %63 : vector<256x256xf32>
    %65 = arith.truncf %53 : vector<16x256xf32> to vector<16x256xbf16>
    %66 = arith.truncf %64 : vector<256x256xf32> to vector<256x256xbf16>
    %cst_42 = arith.constant dense<0.000000e+00> : vector<16x256xf32>
    %67 = tpu.matmul %65, %66, %cst_42 {dimension_numbers = #tpu.dot_dimension_numbers<[1], [0], [0], [1], [0, 0, 1, 1], [], []>} : vector<16x256xbf16>, vector<256x256xbf16>, vector<16x256xf32> -> vector<16x256xf32>
    %c0_43 = arith.constant 0 : index
    %68 = memref.load %arg3[%c0_43] : memref<2xf32, #tpu.memory_space<smem>>
    %69 = vector.broadcast %68 : f32 to vector<16x256xf32>
    %70 = arith.mulf %69, %67 : vector<16x256xf32>
    %71 = arith.addf %70, %44 : vector<16x256xf32>
    %cst_44 = arith.constant dense<0.000000e+00> : vector<16x16xf32>
    %72 = tpu.matmul %45, %45, %cst_44 {dimension_numbers = #tpu.dot_dimension_numbers<[1], [1], [0], [0], [0, 0, 1, 0], [], []>} : vector<16x256xf32>, vector<16x256xf32>, vector<16x16xf32> -> vector<16x16xf32>
    %cst_45 = arith.constant dense<0xFF800000> : vector<16xf32>
    %73 = vector.multi_reduction <maximumf>, %72, %cst_45 [1] : vector<16x16xf32> to vector<16xf32>
    %74 = vector.shape_cast %73 : vector<16xf32> to vector<16x1xf32>
    %75 = vector.broadcast %74 : vector<16x1xf32> to vector<16x16xf32>
    %76 = arith.subf %75, %72 : vector<16x16xf32>
    %cst_46 = arith.constant dense<0xFF800000> : vector<16xf32>
    %77 = vector.multi_reduction <maximumf>, %76, %cst_46 [1] : vector<16x16xf32> to vector<16xf32>
    %78 = vector.shape_cast %77 : vector<16xf32> to vector<16x1xf32>
    %79 = vector.broadcast %78 : vector<16x1xf32> to vector<16x16xf32>
    %80 = arith.subf %76, %79 : vector<16x16xf32>
    %81 = math.exp %80 : vector<16x16xf32>
    %cst_47 = arith.constant dense<0.000000e+00> : vector<16xf32>
    %82 = vector.multi_reduction <add>, %81, %cst_47 [1] : vector<16x16xf32> to vector<16xf32>
    %83 = vector.shape_cast %82 : vector<16xf32> to vector<16x1xf32>
    %84 = tpu.reciprocal %83 {approx = true} : vector<16x1xf32> -> vector<16x1xf32>
    %85 = vector.broadcast %84 : vector<16x1xf32> to vector<16x16xf32>
    %86 = arith.mulf %81, %85 : vector<16x16xf32>
    %87 = arith.truncf %86 : vector<16x16xf32> to vector<16x16xbf16>
    %88 = arith.truncf %45 : vector<16x256xf32> to vector<16x256xbf16>
    %cst_48 = arith.constant dense<0.000000e+00> : vector<16x256xf32>
    %89 = tpu.matmul %87, %88, %cst_48 {dimension_numbers = #tpu.dot_dimension_numbers<[1], [0], [0], [1], [0, 0, 1, 1], [], []>} : vector<16x16xbf16>, vector<16x256xbf16>, vector<16x256xf32> -> vector<16x256xf32>
    %c1_49 = arith.constant 1 : index
    %90 = memref.load %arg3[%c1_49] : memref<2xf32, #tpu.memory_space<smem>>
    %91 = vector.broadcast %90 : f32 to vector<16x256xf32>
    %92 = arith.mulf %91, %89 : vector<16x256xf32>
    %93 = arith.addf %92, %45 : vector<16x256xf32>
    %94 = arith.truncf %71 : vector<16x256xf32> to vector<16x256xbf16>
    %c0_50 = arith.constant 0 : index
    %c0_51 = arith.constant 0 : index
    %c17_52 = arith.constant 17 : index
    %95 = vector.load %arg20[%c0_50, %c0_51, %c17_52] : memref<2x16x290xbf16, #tpu.memory_space<vmem>>, vector<1x16x256xbf16>
    %96 = vector.shape_cast %95 : vector<1x16x256xbf16> to vector<16x256xbf16>
    %97 = vector.shape_cast %94 : vector<16x256xbf16> to vector<1x16x256xbf16>
    tpu.vector_store %arg20[%c0_50, %c0_51, %c17_52], %97 {strides = array<i32>} : memref<2x16x290xbf16, #tpu.memory_space<vmem>>, vector<1x16x256xbf16>,
    %c0_53 = arith.constant 0 : index
    %c0_54 = arith.constant 0 : index
    %c0_55 = arith.constant 0 : index
    %98 = vector.load %arg20[%c0_53, %c0_54, %c0_55] : memref<2x16x290xbf16, #tpu.memory_space<vmem>>, vector<1x16x256xbf16>
    %99 = vector.shape_cast %98 : vector<1x16x256xbf16> to vector<16x256xbf16>
    %100 = vector.broadcast %4 : vector<1x256xbf16> to vector<16x256xbf16>
    %101 = arith.mulf %99, %100 : vector<16x256xbf16>
    %c0_56 = arith.constant 0 : index
    %c0_57 = arith.constant 0 : index
    %c1_58 = arith.constant 1 : index
    %102 = vector.load %arg20[%c0_56, %c0_57, %c1_58] : memref<2x16x290xbf16, #tpu.memory_space<vmem>>, vector<1x16x256xbf16>
    %103 = vector.shape_cast %102 : vector<1x16x256xbf16> to vector<16x256xbf16>
    %c0_59 = arith.constant 0 : index
    %c0_60 = arith.constant 0 : index
    %c2_61 = arith.constant 2 : index
    %104 = vector.load %arg20[%c0_59, %c0_60, %c2_61] : memref<2x16x290xbf16, #tpu.memory_space<vmem>>, vector<1x16x256xbf16>
    %105 = vector.shape_cast %104 : vector<1x16x256xbf16> to vector<16x256xbf16>
    %106 = vector.broadcast %5 : vector<1x256xbf16> to vector<16x256xbf16>
    %107 = arith.mulf %105, %106 : vector<16x256xbf16>
    %c0_62 = arith.constant 0 : index
    %c0_63 = arith.constant 0 : index
    %c16_64 = arith.constant 16 : index
    %108 = vector.load %arg20[%c0_62, %c0_63, %c16_64] : memref<2x16x290xbf16, #tpu.memory_space<vmem>>, vector<1x16x256xbf16>
    %109 = vector.shape_cast %108 : vector<1x16x256xbf16> to vector<16x256xbf16>
    %110 = vector.broadcast %4 : vector<1x256xbf16> to vector<16x256xbf16>
    %111 = arith.mulf %109, %110 : vector<16x256xbf16>
    %c0_65 = arith.constant 0 : index
    %c0_66 = arith.constant 0 : index
    %c17_67 = arith.constant 17 : index
    %112 = vector.load %arg20[%c0_65, %c0_66, %c17_67] : memref<2x16x290xbf16, #tpu.memory_space<vmem>>, vector<1x16x256xbf16>
    %113 = vector.shape_cast %112 : vector<1x16x256xbf16> to vector<16x256xbf16>
    %c0_68 = arith.constant 0 : index
    %c0_69 = arith.constant 0 : index
    %c18_70 = arith.constant 18 : index
    %114 = vector.load %arg20[%c0_68, %c0_69, %c18_70] : memref<2x16x290xbf16, #tpu.memory_space<vmem>>, vector<1x16x256xbf16>
    %115 = vector.shape_cast %114 : vector<1x16x256xbf16> to vector<16x256xbf16>
    %116 = vector.broadcast %5 : vector<1x256xbf16> to vector<16x256xbf16>
    %117 = arith.mulf %115, %116 : vector<16x256xbf16>
    %c0_71 = arith.constant 0 : index
    %c0_72 = arith.constant 0 : index
    %c32_73 = arith.constant 32 : index
    %118 = vector.load %arg20[%c0_71, %c0_72, %c32_73] : memref<2x16x290xbf16, #tpu.memory_space<vmem>>, vector<1x16x256xbf16>
    %119 = vector.shape_cast %118 : vector<1x16x256xbf16> to vector<16x256xbf16>
    %120 = vector.broadcast %4 : vector<1x256xbf16> to vector<16x256xbf16>
    %121 = arith.mulf %119, %120 : vector<16x256xbf16>
    %c0_74 = arith.constant 0 : index
    %c0_75 = arith.constant 0 : index
    %c33_76 = arith.constant 33 : index
    %122 = vector.load %arg20[%c0_74, %c0_75, %c33_76] : memref<2x16x290xbf16, #tpu.memory_space<vmem>>, vector<1x16x256xbf16>
    %123 = vector.shape_cast %122 : vector<1x16x256xbf16> to vector<16x256xbf16>
    %c0_77 = arith.constant 0 : index
    %c0_78 = arith.constant 0 : index
    %c34_79 = arith.constant 34 : index
    %124 = vector.load %arg20[%c0_77, %c0_78, %c34_79] : memref<2x16x290xbf16, #tpu.memory_space<vmem>>, vector<1x16x256xbf16>
    %125 = vector.shape_cast %124 : vector<1x16x256xbf16> to vector<16x256xbf16>
    %126 = vector.broadcast %5 : vector<1x256xbf16> to vector<16x256xbf16>
    %127 = arith.mulf %125, %126 : vector<16x256xbf16>
    %128 = tpu.concatenate %101, %103, %107, %111, %113, %117, %121, %123, %127 in 0 : vector<16x256xbf16>, vector<16x256xbf16>, vector<16x256xbf16>, vector<16x256xbf16>, vector<16x256xbf16>, vector<16x256xbf16>, vector<16x256xbf16>, vector<16x256xbf16>, vector<16x256xbf16> -> vector<144x256xbf16>
    %c0_80 = arith.constant 0 : index
    %c0_81 = arith.constant 0 : index
    %129 = vector.load %arg8[%c0_80, %c0_81] : memref<16x144xbf16, #tpu.memory_space<vmem>>, vector<16x144xbf16>
    %cst_82 = arith.constant dense<0.000000e+00> : vector<16x256xf32>
    %130 = tpu.matmul %129, %128, %cst_82 {dimension_numbers = #tpu.dot_dimension_numbers<[1], [0], [0], [1], [0, 0, 1, 1], [], []>} : vector<16x144xbf16>, vector<144x256xbf16>, vector<16x256xf32> -> vector<16x256xf32>
    %c0_83 = arith.constant 0 : index
    %c0_84 = arith.constant 0 : index
    %131 = vector.load %arg9[%c0_83, %c0_84] : memref<16x1xf32, #tpu.memory_space<vmem>>, vector<16x1xf32>
    %132 = vector.broadcast %131 : vector<16x1xf32> to vector<16x256xf32>
    %133 = arith.addf %130, %132 : vector<16x256xf32>
    %cst_85 = arith.constant 0.000000e+00 : f32
    %134 = vector.broadcast %cst_85 : f32 to vector<16x256xf32>
    %135 = arith.maximumf %133, %134 : vector<16x256xf32>
    %136 = arith.truncf %93 : vector<16x256xf32> to vector<16x256xbf16>
    %c1_86 = arith.constant 1 : index
    %c0_87 = arith.constant 0 : index
    %c17_88 = arith.constant 17 : index
    %137 = vector.load %arg20[%c1_86, %c0_87, %c17_88] : memref<2x16x290xbf16, #tpu.memory_space<vmem>>, vector<1x16x256xbf16>
    %138 = vector.shape_cast %137 : vector<1x16x256xbf16> to vector<16x256xbf16>
    %139 = vector.shape_cast %136 : vector<16x256xbf16> to vector<1x16x256xbf16>
    tpu.vector_store %arg20[%c1_86, %c0_87, %c17_88], %139 {strides = array<i32>} : memref<2x16x290xbf16, #tpu.memory_space<vmem>>, vector<1x16x256xbf16>,
    %c1_89 = arith.constant 1 : index
    %c0_90 = arith.constant 0 : index
    %c0_91 = arith.constant 0 : index
    %140 = vector.load %arg20[%c1_89, %c0_90, %c0_91] : memref<2x16x290xbf16, #tpu.memory_space<vmem>>, vector<1x16x256xbf16>
    %141 = vector.shape_cast %140 : vector<1x16x256xbf16> to vector<16x256xbf16>
    %142 = vector.broadcast %4 : vector<1x256xbf16> to vector<16x256xbf16>
    %143 = arith.mulf %141, %142 : vector<16x256xbf16>
    %c1_92 = arith.constant 1 : index
    %c0_93 = arith.constant 0 : index
    %c1_94 = arith.constant 1 : index
    %144 = vector.load %arg20[%c1_92, %c0_93, %c1_94] : memref<2x16x290xbf16, #tpu.memory_space<vmem>>, vector<1x16x256xbf16>
    %145 = vector.shape_cast %144 : vector<1x16x256xbf16> to vector<16x256xbf16>
    %c1_95 = arith.constant 1 : index
    %c0_96 = arith.constant 0 : index
    %c2_97 = arith.constant 2 : index
    %146 = vector.load %arg20[%c1_95, %c0_96, %c2_97] : memref<2x16x290xbf16, #tpu.memory_space<vmem>>, vector<1x16x256xbf16>
    %147 = vector.shape_cast %146 : vector<1x16x256xbf16> to vector<16x256xbf16>
    %148 = vector.broadcast %5 : vector<1x256xbf16> to vector<16x256xbf16>
    %149 = arith.mulf %147, %148 : vector<16x256xbf16>
    %c1_98 = arith.constant 1 : index
    %c0_99 = arith.constant 0 : index
    %c16_100 = arith.constant 16 : index
    %150 = vector.load %arg20[%c1_98, %c0_99, %c16_100] : memref<2x16x290xbf16, #tpu.memory_space<vmem>>, vector<1x16x256xbf16>
    %151 = vector.shape_cast %150 : vector<1x16x256xbf16> to vector<16x256xbf16>
    %152 = vector.broadcast %4 : vector<1x256xbf16> to vector<16x256xbf16>
    %153 = arith.mulf %151, %152 : vector<16x256xbf16>
    %c1_101 = arith.constant 1 : index
    %c0_102 = arith.constant 0 : index
    %c17_103 = arith.constant 17 : index
    %154 = vector.load %arg20[%c1_101, %c0_102, %c17_103] : memref<2x16x290xbf16, #tpu.memory_space<vmem>>, vector<1x16x256xbf16>
    %155 = vector.shape_cast %154 : vector<1x16x256xbf16> to vector<16x256xbf16>
    %c1_104 = arith.constant 1 : index
    %c0_105 = arith.constant 0 : index
    %c18_106 = arith.constant 18 : index
    %156 = vector.load %arg20[%c1_104, %c0_105, %c18_106] : memref<2x16x290xbf16, #tpu.memory_space<vmem>>, vector<1x16x256xbf16>
    %157 = vector.shape_cast %156 : vector<1x16x256xbf16> to vector<16x256xbf16>
    %158 = vector.broadcast %5 : vector<1x256xbf16> to vector<16x256xbf16>
    %159 = arith.mulf %157, %158 : vector<16x256xbf16>
    %c1_107 = arith.constant 1 : index
    %c0_108 = arith.constant 0 : index
    %c32_109 = arith.constant 32 : index
    %160 = vector.load %arg20[%c1_107, %c0_108, %c32_109] : memref<2x16x290xbf16, #tpu.memory_space<vmem>>, vector<1x16x256xbf16>
    %161 = vector.shape_cast %160 : vector<1x16x256xbf16> to vector<16x256xbf16>
    %162 = vector.broadcast %4 : vector<1x256xbf16> to vector<16x256xbf16>
    %163 = arith.mulf %161, %162 : vector<16x256xbf16>
    %c1_110 = arith.constant 1 : index
    %c0_111 = arith.constant 0 : index
    %c33_112 = arith.constant 33 : index
    %164 = vector.load %arg20[%c1_110, %c0_111, %c33_112] : memref<2x16x290xbf16, #tpu.memory_space<vmem>>, vector<1x16x256xbf16>
    %165 = vector.shape_cast %164 : vector<1x16x256xbf16> to vector<16x256xbf16>
    %c1_113 = arith.constant 1 : index
    %c0_114 = arith.constant 0 : index
    %c34_115 = arith.constant 34 : index
    %166 = vector.load %arg20[%c1_113, %c0_114, %c34_115] : memref<2x16x290xbf16, #tpu.memory_space<vmem>>, vector<1x16x256xbf16>
    %167 = vector.shape_cast %166 : vector<1x16x256xbf16> to vector<16x256xbf16>
    %168 = vector.broadcast %5 : vector<1x256xbf16> to vector<16x256xbf16>
    %169 = arith.mulf %167, %168 : vector<16x256xbf16>
    %170 = tpu.concatenate %143, %145, %149, %153, %155, %159, %163, %165, %169 in 0 : vector<16x256xbf16>, vector<16x256xbf16>, vector<16x256xbf16>, vector<16x256xbf16>, vector<16x256xbf16>, vector<16x256xbf16>, vector<16x256xbf16>, vector<16x256xbf16>, vector<16x256xbf16> -> vector<144x256xbf16>
    %c0_116 = arith.constant 0 : index
    %c0_117 = arith.constant 0 : index
    %171 = vector.load %arg10[%c0_116, %c0_117] : memref<16x144xbf16, #tpu.memory_space<vmem>>, vector<16x144xbf16>
    %cst_118 = arith.constant dense<0.000000e+00> : vector<16x256xf32>
    %172 = tpu.matmul %171, %170, %cst_118 {dimension_numbers = #tpu.dot_dimension_numbers<[1], [0], [0], [1], [0, 0, 1, 1], [], []>} : vector<16x144xbf16>, vector<144x256xbf16>, vector<16x256xf32> -> vector<16x256xf32>
    %c0_119 = arith.constant 0 : index
    %c0_120 = arith.constant 0 : index
    %173 = vector.load %arg11[%c0_119, %c0_120] : memref<16x1xf32, #tpu.memory_space<vmem>>, vector<16x1xf32>
    %174 = vector.broadcast %173 : vector<16x1xf32> to vector<16x256xf32>
    %175 = arith.addf %172, %174 : vector<16x256xf32>
    %cst_121 = arith.constant 0.000000e+00 : f32
    %176 = vector.broadcast %cst_121 : f32 to vector<16x256xf32>
    %177 = arith.maximumf %175, %176 : vector<16x256xf32>
    %178 = arith.addf %135, %177 : vector<16x256xf32>
    %c0_122 = arith.constant 0 : index
    %c0_123 = arith.constant 0 : index
    %c0_124 = arith.constant 0 : index
    %179 = vector.load %arg16[%c0_122, %c0_123, %c0_124] : memref<1x16x256xf32, #tpu.memory_space<vmem>>, vector<1x16x256xf32>
    %180 = vector.shape_cast %179 : vector<1x16x256xf32> to vector<16x256xf32>
    %181 = vector.shape_cast %178 : vector<16x256xf32> to vector<1x16x256xf32>
    tpu.vector_store %arg16[%c0_122, %c0_123, %c0_124], %181 {strides = array<i32>} : memref<1x16x256xf32, #tpu.memory_space<vmem>>, vector<1x16x256xf32>,
    %c0_125 = arith.constant 0 : index
    %c0_126 = arith.constant 0 : index
    %182 = vector.load %arg12[%c0_125, %c0_126] : memref<16x16xf32, #tpu.memory_space<vmem>>, vector<16x16xf32>
    %cst_127 = arith.constant dense<0.000000e+00> : vector<16x256xf32>
    %183 = tpu.matmul %182, %135, %cst_127 {dimension_numbers = #tpu.dot_dimension_numbers<[1], [0], [0], [1], [0, 0, 1, 1], [], []>} : vector<16x16xf32>, vector<16x256xf32>, vector<16x256xf32> -> vector<16x256xf32>
    %c0_128 = arith.constant 0 : index
    %c0_129 = arith.constant 0 : index
    %184 = vector.load %arg13[%c0_128, %c0_129] : memref<16x1xf32, #tpu.memory_space<vmem>>, vector<16x1xf32>
    %185 = vector.broadcast %184 : vector<16x1xf32> to vector<16x256xf32>
    %186 = arith.addf %183, %185 : vector<16x256xf32>
    %c0_130 = arith.constant 0 : index
    %c0_131 = arith.constant 0 : index
    %187 = vector.load %arg14[%c0_130, %c0_131] : memref<16x16xf32, #tpu.memory_space<vmem>>, vector<16x16xf32>
    %cst_132 = arith.constant dense<0.000000e+00> : vector<16x256xf32>
    %188 = tpu.matmul %187, %177, %cst_132 {dimension_numbers = #tpu.dot_dimension_numbers<[1], [0], [0], [1], [0, 0, 1, 1], [], []>} : vector<16x16xf32>, vector<16x256xf32>, vector<16x256xf32> -> vector<16x256xf32>
    %c0_133 = arith.constant 0 : index
    %c0_134 = arith.constant 0 : index
    %189 = vector.load %arg15[%c0_133, %c0_134] : memref<16x1xf32, #tpu.memory_space<vmem>>, vector<16x1xf32>
    %190 = vector.broadcast %189 : vector<16x1xf32> to vector<16x256xf32>
    %191 = arith.addf %188, %190 : vector<16x256xf32>
    %192 = vector.extract_strided_slice %186 {offsets = [0, 0], sizes = [8, 256], strides = [1, 1]} : vector<16x256xf32> to vector<8x256xf32>
    %c0_135 = arith.constant 0 : index
    %c0_136 = arith.constant 0 : index
    %c0_137 = arith.constant 0 : index
    %193 = vector.load %arg18[%c0_135, %c0_136, %c0_137] : memref<1x8x256xf32, #tpu.memory_space<vmem>>, vector<1x8x256xf32>
    %194 = vector.shape_cast %193 : vector<1x8x256xf32> to vector<8x256xf32>
    %195 = vector.shape_cast %192 : vector<8x256xf32> to vector<1x8x256xf32>
    tpu.vector_store %arg18[%c0_135, %c0_136, %c0_137], %195 {strides = array<i32>} : memref<1x8x256xf32, #tpu.memory_space<vmem>>, vector<1x8x256xf32>,
    %196 = vector.extract_strided_slice %191 {offsets = [0, 0], sizes = [8, 256], strides = [1, 1]} : vector<16x256xf32> to vector<8x256xf32>
    %c0_138 = arith.constant 0 : index
    %c0_139 = arith.constant 0 : index
    %c0_140 = arith.constant 0 : index
    %197 = vector.load %arg19[%c0_138, %c0_139, %c0_140] : memref<1x8x256xf32, #tpu.memory_space<vmem>>, vector<1x8x256xf32>
    %198 = vector.shape_cast %197 : vector<1x8x256xf32> to vector<8x256xf32>
    %199 = vector.shape_cast %196 : vector<8x256xf32> to vector<1x8x256xf32>
    tpu.vector_store %arg19[%c0_138, %c0_139, %c0_140], %199 {strides = array<i32>} : memref<1x8x256xf32, #tpu.memory_space<vmem>>, vector<1x8x256xf32>,
    %200 = vector.extract_strided_slice %186 {offsets = [8, 0], sizes = [8, 256], strides = [1, 1]} : vector<16x256xf32> to vector<8x256xf32>
    %201 = vector.extract_strided_slice %191 {offsets = [8, 0], sizes = [8, 256], strides = [1, 1]} : vector<16x256xf32> to vector<8x256xf32>
    %202 = arith.addf %200, %201 : vector<8x256xf32>
    %c0_141 = arith.constant 0 : index
    %c0_142 = arith.constant 0 : index
    %c0_143 = arith.constant 0 : index
    %203 = vector.load %arg17[%c0_141, %c0_142, %c0_143] : memref<1x8x256xf32, #tpu.memory_space<vmem>>, vector<1x8x256xf32>
    %204 = vector.shape_cast %203 : vector<1x8x256xf32> to vector<8x256xf32>
    %205 = vector.shape_cast %202 : vector<8x256xf32> to vector<1x8x256xf32>
    tpu.vector_store %arg17[%c0_141, %c0_142, %c0_143], %205 {strides = array<i32>} : memref<1x8x256xf32, #tpu.memory_space<vmem>>, vector<1x8x256xf32>,
    return
  }
  func.func @transform_0(%arg0: i32) -> (i32, i32, i32) {
    %c0_i32 = arith.constant 0 : i32
    %c0_i32_0 = arith.constant 0 : i32
    %c0_i32_1 = arith.constant 0 : i32
    return %arg0, %c0_i32, %c0_i32_0 : i32, i32, i32
  }
  func.func @transform_1(%arg0: i32) -> (i32, i32) {
    %c0_i32 = arith.constant 0 : i32
    %c0_i32_0 = arith.constant 0 : i32
    %c0_i32_1 = arith.constant 0 : i32
    return %c0_i32, %c0_i32_0 : i32, i32
  }
  func.func @transform_2(%arg0: i32) -> i32 {
    %c0_i32 = arith.constant 0 : i32
    %c0_i32_0 = arith.constant 0 : i32
    return %c0_i32 : i32
  }
  func.func @transform_3(%arg0: i32) -> (i32, i32) {
    %c0_i32 = arith.constant 0 : i32
    %c0_i32_0 = arith.constant 0 : i32
    %c0_i32_1 = arith.constant 0 : i32
    return %c0_i32, %c0_i32_0 : i32, i32
  }
  func.func @transform_4(%arg0: i32) -> (i32, i32) {
    %c0_i32 = arith.constant 0 : i32
    %c0_i32_0 = arith.constant 0 : i32
    %c0_i32_1 = arith.constant 0 : i32
    return %c0_i32, %c0_i32_0 : i32, i32
  }
  func.func @transform_5(%arg0: i32) -> (i32, i32) {
    %c0_i32 = arith.constant 0 : i32
    %c0_i32_0 = arith.constant 0 : i32
    %c0_i32_1 = arith.constant 0 : i32
    return %c0_i32, %c0_i32_0 : i32, i32
  }
  func.func @transform_6(%arg0: i32) -> (i32, i32) {
    %c0_i32 = arith.constant 0 : i32
    %c0_i32_0 = arith.constant 0 : i32
    %c0_i32_1 = arith.constant 0 : i32
    return %c0_i32, %c0_i32_0 : i32, i32
  }
  func.func @transform_7(%arg0: i32) -> (i32, i32) {
    %c0_i32 = arith.constant 0 : i32
    %c0_i32_0 = arith.constant 0 : i32
    %c0_i32_1 = arith.constant 0 : i32
    return %c0_i32, %c0_i32_0 : i32, i32
  }
  func.func @transform_8(%arg0: i32) -> (i32, i32) {
    %c0_i32 = arith.constant 0 : i32
    %c0_i32_0 = arith.constant 0 : i32
    %c0_i32_1 = arith.constant 0 : i32
    return %c0_i32, %c0_i32_0 : i32, i32
  }
  func.func @transform_9(%arg0: i32) -> (i32, i32) {
    %c0_i32 = arith.constant 0 : i32
    %c0_i32_0 = arith.constant 0 : i32
    %c0_i32_1 = arith.constant 0 : i32
    return %c0_i32, %c0_i32_0 : i32, i32
  }
  func.func @transform_10(%arg0: i32) -> (i32, i32) {
    %c0_i32 = arith.constant 0 : i32
    %c0_i32_0 = arith.constant 0 : i32
    %c0_i32_1 = arith.constant 0 : i32
    return %c0_i32, %c0_i32_0 : i32, i32
  }
  func.func @transform_11(%arg0: i32) -> (i32, i32) {
    %c0_i32 = arith.constant 0 : i32
    %c0_i32_0 = arith.constant 0 : i32
    %c0_i32_1 = arith.constant 0 : i32
    return %c0_i32, %c0_i32_0 : i32, i32
  }
  func.func @transform_12(%arg0: i32) -> (i32, i32) {
    %c0_i32 = arith.constant 0 : i32
    %c0_i32_0 = arith.constant 0 : i32
    %c0_i32_1 = arith.constant 0 : i32
    return %c0_i32, %c0_i32_0 : i32, i32
  }
  func.func @transform_13(%arg0: i32) -> (i32, i32) {
    %c0_i32 = arith.constant 0 : i32
    %c0_i32_0 = arith.constant 0 : i32
    %c0_i32_1 = arith.constant 0 : i32
    return %c0_i32, %c0_i32_0 : i32, i32
  }
  func.func @transform_14(%arg0: i32) -> (i32, i32) {
    %c0_i32 = arith.constant 0 : i32
    %c0_i32_0 = arith.constant 0 : i32
    %c0_i32_1 = arith.constant 0 : i32
    return %c0_i32, %c0_i32_0 : i32, i32
  }
  func.func @transform_15(%arg0: i32) -> (i32, i32, i32) {
    %c0_i32 = arith.constant 0 : i32
    %c0_i32_0 = arith.constant 0 : i32
    %c0_i32_1 = arith.constant 0 : i32
    return %arg0, %c0_i32, %c0_i32_0 : i32, i32, i32
  }
  func.func @transform_16(%arg0: i32) -> (i32, i32, i32) {
    %c0_i32 = arith.constant 0 : i32
    %c0_i32_0 = arith.constant 0 : i32
    %c0_i32_1 = arith.constant 0 : i32
    return %arg0, %c0_i32, %c0_i32_0 : i32, i32, i32
  }
  func.func @transform_17(%arg0: i32) -> (i32, i32, i32) {
    %c0_i32 = arith.constant 0 : i32
    %c0_i32_0 = arith.constant 0 : i32
    %c0_i32_1 = arith.constant 0 : i32
    return %arg0, %c0_i32, %c0_i32_0 : i32, i32, i32
  }
  func.func @transform_18(%arg0: i32) -> (i32, i32, i32) {
    %c0_i32 = arith.constant 0 : i32
    %c0_i32_0 = arith.constant 0 : i32
    %c0_i32_1 = arith.constant 0 : i32
    return %arg0, %c0_i32, %c0_i32_0 : i32, i32, i32
  }
}

</mosaic_0001>

<bundles_post_ra>
// kernel: danet_head_forward.1
= control target key start
LH: loop header
LB: loop body
LE: loop exit
PB: predicated region body
PF: predicated region fallthrough
CT: control target
= control target key end

     0   :  { %s6435_s0 = inlined_call_operand.vmem [shape: bf16[2,64,290], index: 0, kind: input, shape index: {}]   ;;  %s6436_s1 = inlined_call_operand.vmem [shape: bf16[2,256], index: 1, kind: input, shape index: {}]   ;;  %s6437_s2 = inlined_call_operand.vmem [shape: f32[2], index: 2, kind: input, shape index: {}]   ;;  %s6438_s3 = inlined_call_operand.vmem [shape: bf16[32,576], index: 3, kind: input, shape index: {}]   ;;  %s6439_s4 = inlined_call_operand.vmem [shape: f32[32,1], index: 4, kind: input, shape index: {}]   ;;  %s6440_s5 = inlined_call_operand.vmem [shape: f32[32,16], index: 5, kind: input, shape index: {}]   ;;  %s6441_s6 = inlined_call_operand.vmem [shape: f32[32,1], index: 6, kind: input, shape index: {}]   ;;  %s6442_s7 = inlined_call_operand.vmem [shape: bf16[16,144], index: 7, kind: input, shape index: {}]   ;;  %s6443_s8 = inlined_call_operand.vmem [shape: f32[16,1], index: 8, kind: input, shape index: {}]   ;;  %s6444_s9 = inlined_call_operand.vmem [shape: bf16[16,144], index: 9, kind: input, shape index: {}]   ;;  %s6445_s10 = inlined_call_operand.vmem [shape: f32[16,1], index: 10, kind: input, shape index: {}]   ;;  %s6446_s11 = inlined_call_operand.vmem [shape: f32[16,16], index: 11, kind: input, shape index: {}]   ;;  %s6447_s12 = inlined_call_operand.vmem [shape: f32[16,1], index: 12, kind: input, shape index: {}]   ;;  %s6448_s13 = inlined_call_operand.vmem [shape: f32[16,16], index: 13, kind: input, shape index: {}]   ;;  %s6449_s14 = inlined_call_operand.vmem [shape: f32[16,1], index: 14, kind: input, shape index: {}]   ;;  %s6450_s15 = inlined_call_operand.vmem [shape: f32[2,16,256], index: 15, kind: output, shape index: {0}]   ;;  %s6451_s16 = inlined_call_operand.vmem [shape: f32[2,8,256], index: 16, kind: output, shape index: {1}]   ;;  %s6452_s17 = inlined_call_operand.vmem [shape: f32[2,8,256], index: 17, kind: output, shape index: {2}]   ;;  %s6453_s18 = inlined_call_operand.vmem [shape: f32[2,8,256], index: 18, kind: output, shape index: {3}]  }
   0x1   :  { %6523 = sst [smem:[#allocation54_spill]] %s6435_s0 }
   0x2   :  { %6524 = sst [smem:[#allocation55_spill]] %s6436_s1 }
   0x3   :  { %6525 = sst [smem:[#allocation56_spill]] %s6437_s2 }
   0x4   :  { %24 = vsyncpa [#allocation4], 0  ;;  %s4530_s27 = smov 0  }
   0x5 LB: > { %s3952_s28 = sadd.s32 4294967295, %s4415_s27   ;;  %p3954_p0 = scmp.ge.s32.totalorder %s4415_s27, 1  ;;  %s4415_s27 = sphi %s4530_s27, %s30_s27  }
   0x6   : > { %p459_p1 = scmp.lt.s32.totalorder %s4415_s27, 3  ;;  %s6526_s0 = sld [smem:[#allocation56_spill]] }
   0x7   : > { %p4182_p3 = scmp.eq.s32.totalorder %s3952_s28, 0 }
   0x8   : > { %p4541_p2 = pnand %p3954_p0, %p459_p1 }
   0xa   : > { %p4178_p4 = pneg %p4541_p2 }
   0xc   : > { %s475_s19 = sshll.u32 %s6526_s0, 4  ;;  %p4179_p5 = pnand %p4182_p3, %p4178_p4  ;;  %s476_s19 = int_to_ptr.vmem [resolvable:$true] %s475_s19 }
   0xd   : > { %s4390_s20 = scalar_lea.vmem %s476_s19, 16  ;;  %p4398_p10 = scmp.lt.s32.totalorder %s476_s19, %s476_s19 }
   0xe   : > { %p4391_p6 = scmp.ne.s32.totalorder %s476_s19, %s4390_s20  ;;  %p4392_p7 = pneg %p4179_p5 }
   0xf   : > { %p4399_p11 = scmp.lt.s32.totalorder %s4390_s20, %s4390_s20 }
  0x10   : > { %p4393_p8 = pnand %p4392_p7, %p4391_p6 }
  0x11   : > { %p4400_p12 = por %p4399_p11, %p4398_p10 }
  0x12   : > { %p4394_p9 = pneg %p4393_p8 }
  0x14   : > { %p4401_p13 = pnand %p4400_p12, %p4394_p9 }
  0x16   : > { %4404 = shalt.err (!%p4401_p13)
}
  0x17   : > { %s4417_s21 = smov [#allocation3]   ;;  %532 = sbr.rel (%p4541_p2) target bundleno = 3079 (0xc07), region = 80 }
  0x18   : > { %4181 = dma.vmem_to_smem (!%p4179_p5), %s476_s19, 16, %s4417_s21, [#allocation4]  }
  0x1c   : > { %4410 = dma.done.wait (%p4182_p3), [#allocation4], 16  }
  0x1d   : > { %4412 = vsyncadd (%p4182_p3), [#allocation4], 4294967280 }
  0x1e   : > { %538 = sfence }
  0x1f   : > { %p602_p0 = scmp.lt.s32.totalorder %s3952_s28, 1  ;;  %v659_v0 = vlaneseq  ;;  %s6528_s23 = sld [smem:[#allocation55_spill]]  ;;  %v4418_v2 = vmov 1966171168   ;;  %vm956_vm0 = vcmask 1039360   ;;  %vm751_vm1 = vcmask 130048  }
  0x20   : > { %v657_v3 = vunpack.c.l.s4 %v4418_v2  ;;  %s6529_s29 = sld [smem:[#allocation54_spill]]  ;;  %s6454_s0 = smov 127   ;;  %vm774_vm2 = vcmask 146432   ;;  %vm1183_vm3 = vcmask 908288   ;;  %vm728_vm4 = vcmask 15360  }
  0x21   : > { %s6663_s28 = smov (!%p602_p0, %s3952_s28), 1  ;;  %v660_v4 = vshrl.u32 %v659_v0, 7  ;;  %s4420_s19 = smov 16   ;;  %vm1410_vm5 = vcmask 777216   ;;  %vm797_vm6 = vcmask 261120   ;;  %vm820_vm7 = vcmask 277504  }
  0x22   : > { %s4173_s24 = smul.u32 96, %s6663_s28  ;;  %v658_v6 = vunpack.c.0.s8 %v657_v3  ;;  %s4421_s1 = smov 32   ;;  %vm1142_vm8 = vcmask 916480   ;;  %vm1276_vm9 = vcmask 900096   ;;  %vm1049_vm10 = vcmask 1031168  }
  0x23   : > { %v675_v17 = vsub.s32 0, %v660_v4  ;;  %s4422_s20 = smov 18   ;;  %s4423_s21 = smov 34   ;;  %vm1369_vm11 = vcmask 785408   ;;  %vm1503_vm12 = vcmask 769024   ;;  %vm1606_vm13 = vcmask 523264  }
  0x24   : > { %v661_v7 = vsub.s32 %v658_v6, %v660_v4  ;;  %s4424_s22 = smov 2   ;;  %s4425_s2 = smov 111   ;;  %vm1974_vm14 = vcmask 64512   ;;  %vm628_vm15 = vcmask 134144  }
  0x25   : > { %v3968_v1 = vld.sshfl [vmem:[%s6528_s23] sm:$0x11 pattern:$0x75316420]  ;;  %s4426_s23 = smov 95   ;;  %s4428_s25 = smov 110  }
  0x26   : > { %v655_v5 = vcombine.high %v3968_v1, %v3968_v1  ;;  %s4561_s30 = scalar_lea.vmem %s6529_s29, %s4173_s24  ;;  %v662_v15 = vrot.slane %v3968_v1, %v661_v7  ;;  %s4427_s24 = smov 112  }
  0x27   : > { %v4564_v8 = vld [vmem:[%s4561_s30 + $0x50] sm:$0xf]  ;;  %v4567_v9 = vld [vmem:[%s4561_s30 + $0x5c] sm:$0xf]  ;;  %v4570_v10 = vld [vmem:[%s4561_s30 + $0x48] sm:$0xff]  ;;  %s6458_s26 = smov 126  }
  0x28   : > { %v4574_v11 = vcombine.low %v4564_v8, %v4567_v9  ;;  %v4577_v12 = vld [vmem:[%s4561_s30 + $0x54] sm:$0xff]  ;;  %v4583_v14 = vld [vmem:[%s4561_s30 + $0x3c] sm:$0xff]  ;;  %v669_v16 = vrot.slane %v655_v5, %v661_v7  ;;  %v671_v20 = vpack.i.b16 %v662_v15, %v662_v15  ;;  %v706_v22 = vshrl.u32 %v662_v15, 16  ;;  %v4611_v33 = vld [vmem:[%s4561_s30 + $0x44] sm:$0xf]  ;;  %s4430_s29 = smov 96  }
  0x29   : > { %v4580_v13 = vld [vmem:[%s4561_s30 + $0x30] sm:$0xff]  ;;  %v4587_v18 = vcombine.high %v4570_v10, %v4577_v12  ;;  %v4599_v23 = vcombine.low %v4570_v10, %v4577_v12  ;;  %v4608_v32 = vld [vmem:[%s4561_s30 + $0x38] sm:$0xf]  ;;  %v4622_v37 = vld [vmem:[%s4561_s30 + $0x24] sm:$0xff] }
  0x2a   : > { %954 = vrot.lane.b32.xlu0 %v4574_v11, %s6454_s0  ;;  %v4593_v19 = vcombine.high %v4580_v13, %v4583_v14  ;;  %v678_v21 = vpack.i.b16 %v669_v16, %v669_v16  ;;  %v713_v24 = vshrl.u32 %v669_v16, 16  ;;  %v676_v25 = vrot.slane %v671_v20, %v675_v17  ;;  %v4619_v36 = vld [vmem:[%s4561_s30 + $0x18] sm:$0xff]  ;;  %v4629_v40 = vld [vmem:[%s4561_s30 + $0x20] sm:$0xf]  ;;  %v4632_v41 = vld [vmem:[%s4561_s30 + $0x2c] sm:$0xf] }
  0x2b   : > { %952 = vrot.lane.b32.xlu1 %v4587_v18, %s6454_s0  ;;  %v707_v27 = vpack.i.b16 %v706_v22, %v706_v22  ;;  %v3987_v35 = vcombine.low %v4608_v32, %v4611_v33  ;;  %v3985_v38 = vcombine.low %v4580_v13, %v4583_v14  ;;  %v3983_v39 = vcombine.high %v4619_v36, %v4622_v37  ;;  %v4641_v44 = vld [vmem:[%s4561_s30] sm:$0xff]  ;;  %v4644_v45 = vld [vmem:[%s4561_s30 + $0xc] sm:$0xff]  ;;  %v4647_v46 = vld [vmem:[%s4561_s30 + $0x8] sm:$0xf] }
  0x2c   : > { %v683_v26 = vrot.slane %v678_v21, %v675_v17  ;;  %v714_v28 = vpack.i.b16 %v713_v24, %v713_v24  ;;  %v3984_v42 = vcombine.low %v4629_v40, %v4632_v41  ;;  %v3982_v43 = vcombine.low %v4619_v36, %v4622_v37  ;;  %v4650_v47 = vld [vmem:[%s4561_s30 + $0x14] sm:$0xf]  ;;  %s6456_s30 = smov 94  }
  0x2d   : > { %v712_v30 = vrot.slane %v707_v27, %v675_v17  ;;  %v4655_v48 = vcombine.high %v4641_v44, %v4644_v45  ;;  %v4660_v49 = vcombine.low %v4647_v46, %v4650_v47  ;;  %v4666_v50 = vcombine.low %v4641_v44, %v4644_v45 }
  0x2e   : > { %946 = vrot.lane.b32.xlu0 %v4593_v19, %s6454_s0  ;;  %v4603_v29 = vcombine.low %v676_v25, %v683_v26  ;;  %v719_v31 = vrot.slane %v714_v28, %v675_v17 }
  0x2f   : > { %950 = vrot.lane.b32.xlu1 %v4599_v23, %s6454_s0 }
  0x30   : > { %6530 = vst [vmem:[#allocation6_spill] sm:$0xff] %v4603_v29  ;;  %v3970_v34 = vcombine.low %v712_v30, %v719_v31 }
  0x32   : > { %748 = vrot.lane.b32.xlu0 %v4603_v29, %s4420_s19 }
  0x33   : > { %794 = vrot.lane.b32.xlu1 %v4603_v29, %s4421_s1  ;;  %s6659_s1 = smov 127  }
  0x36   : > { %771 = vrot.lane.b32.xlu0 %v3970_v34, %s4422_s20  ;;  %s4100_s20 = sld [smem:[#allocation3 + $0x1]] }
  0x37   : > { %948 = vrot.lane.b32.xlu1 %v3987_v35, %s6454_s0 }
  0x3a   : > { %817 = vrot.lane.b32.xlu0 %v3970_v34, %s4423_s21 }
  0x3b   : > { %725 = vrot.lane.b32.xlu1 %v3970_v34, %s4424_s22 }
  0x3e   : > { %944 = vrot.lane.b32.xlu0 %v3985_v38, %s6454_s0 }
  0x3f   : > { %940 = vrot.lane.b32.xlu1 %v3983_v39, %s6454_s0 }
  0x42   : > { %942 = vrot.lane.b32.xlu0 %v3984_v42, %s6454_s0 }
  0x43   : > { %938 = vrot.lane.b32.xlu1 %v3982_v43, %s6454_s0 }
  0x46   : > { %934 = vrot.lane.b32.xlu0 %v4655_v48, %s6454_s0 }
  0x47   : > { %936 = vrot.lane.b32.xlu1 %v4660_v49, %s6454_s0 }
  0x4a   : > { %932 = vrot.lane.b32.xlu0 %v4666_v50, %s6454_s0  ;;  %s6658_s0 = smov 126  }
  0x4b   : > { %1179 = vrot.lane.b32.xlu1 %v4587_v18, %s4425_s2 }
  0x4e   : > { %1181 = vrot.lane.b32.xlu0 %v4574_v11, %s4425_s2 }
  0x4f   : > { %1177 = vrot.lane.b32.xlu1 %v4599_v23, %s4425_s2 }
  0x52   : > { %1175 = vrot.lane.b32.xlu0 %v3987_v35, %s4425_s2 }
  0x53   : > { %1173 = vrot.lane.b32.xlu1 %v4593_v19, %s4425_s2 }
  0x56   : > { %1169 = vrot.lane.b32.xlu0 %v3984_v42, %s4425_s2 }
  0x57   : > { %1171 = vrot.lane.b32.xlu1 %v3985_v38, %s4425_s2 }
  0x5a   : > { %1163 = vrot.lane.b32.xlu0 %v4660_v49, %s4425_s2 }
  0x5b   : > { %1167 = vrot.lane.b32.xlu1 %v3983_v39, %s4425_s2 }
  0x5e   : > { %1408 = vrot.lane.b32.xlu0 %v4574_v11, %s4426_s23 }
  0x5f   : > { %1165 = vrot.lane.b32.xlu1 %v3982_v43, %s4425_s2 }
  0x62   : > { %1402 = vrot.lane.b32.xlu0 %v3987_v35, %s4426_s23 }
  0x63   : > { %1161 = vrot.lane.b32.xlu1 %v4655_v48, %s4425_s2 }
  0x66   : > { %1396 = vrot.lane.b32.xlu0 %v3984_v42, %s4426_s23 }
  0x67   : > { %1159 = vrot.lane.b32.xlu1 %v4666_v50, %s4425_s2 }
  0x6b   : > { %1406 = vrot.lane.b32.xlu1 %v4587_v18, %s4426_s23 }
  0x6f   : > { %1404 = vrot.lane.b32.xlu1 %v4599_v23, %s4426_s23 }
  0x73   : > { %1400 = vrot.lane.b32.xlu1 %v4593_v19, %s4426_s23 }
  0x77   : > { %1398 = vrot.lane.b32.xlu1 %v3985_v38, %s4426_s23 }
  0x7b   : > { %1394 = vrot.lane.b32.xlu1 %v3983_v39, %s4426_s23 }
  0x7f   : > { %1392 = vrot.lane.b32.xlu1 %v3982_v43, %s4426_s23 }
  0x9c   : > { %v955_v51 = vpop.permute.xlu0 %954 }
  0x9d   : > { %v953_v52 = vpop.permute.xlu1 %952 }
  0x9e   : > { %v964_v53 = vsel %vm956_vm0, %v953_v52, %v955_v51 }
  0x9f   : > { %1613 = vmatprep.subr.bf16.mxu0 %v964_v53 }
  0xa0   : > { %v947_v54 = vpop.permute.xlu0 %946 }
  0xa1   : > { %v951_v55 = vpop.permute.xlu1 %950 }
  0xa2   : > { %v963_v56 = vsel %vm956_vm0, %v951_v55, %v953_v52 }
  0xa3   : > { %1614 = vmatpush1.bf16.msra.mxu0 %v963_v56 }
  0xa4   : > { %v749_v57 = vpop.permute.xlu0 %748 }
  0xa5   : > { %v4706_v58 = vpop.permute.xlu1 %794  ;;  %v4708_v59 = vrot.slane %v749_v57, 4 }
  0xa7   : > { %6531 = vst [vmem:[#allocation7_spill] sm:$0xff] %v4708_v59  ;;  %v4712_v60 = vsel %vm751_vm1, %v4708_v59, %v749_v57  ;;  %v768_v61 = vmul.bf16 %v4708_v59, %v4564_v8  ;;  %v770_v62 = vmul.bf16 %v4708_v59, %v4567_v9  ;;  %v764_v4 = vmul.bf16 %v4708_v59, %v4608_v32 }
  0xa8   : > { %6532 = vst [vmem:[#allocation8_spill] sm:$0xff] %v4712_v60  ;;  %v4718_v63 = vpop.permute.xlu0 %771  ;;  %v767_v0 = vmul.bf16 %v4712_v60, %v4570_v10  ;;  %v769_v1 = vmul.bf16 %v4712_v60, %v4577_v12  ;;  %v766_v5 = vmul.bf16 %v4708_v59, %v4611_v33  ;;  %v760_v16 = vmul.bf16 %v4708_v59, %v4629_v40 }
  0xa9   : > { %v949_v2 = vpop.permute.xlu1 %948  ;;  %v4014_v3 = vcombine.low %v768_v61, %v770_v62  ;;  %v762_v17 = vmul.bf16 %v4708_v59, %v4632_v41  ;;  %v763_v20 = vmul.bf16 %v4712_v60, %v4580_v13  ;;  %v765_v21 = vmul.bf16 %v4712_v60, %v4583_v14 }
  0xaa   : > { %v962_v6 = vsel %vm956_vm0, %v947_v54, %v949_v2  ;;  %v4013_v7 = vcombine.high %v767_v0, %v769_v1  ;;  %v4011_v15 = vcombine.low %v764_v4, %v766_v5  ;;  %v4012_v19 = vcombine.low %v767_v0, %v769_v1 }
  0xab   : > { %1615 = vmatprep.subr.bf16.mxu0 %v962_v6  ;;  %1140 = vrot.lane.b32.xlu1 %v4014_v3, %s4427_s24  ;;  %v4744_v22 = vrot.slane %v4718_v63, 4  ;;  %v4008_v25 = vcombine.low %v760_v16, %v762_v17  ;;  %v756_v26 = vmul.bf16 %v4708_v59, %v4647_v46  ;;  %v758_v27 = vmul.bf16 %v4708_v59, %v4650_v47 }
  0xac   : > { %v4730_v11 = vpop.permute.xlu0 %817  ;;  %1138 = vrot.lane.b32.xlu0 %v4013_v7, %s4427_s24  ;;  %v4010_v30 = vcombine.high %v763_v20, %v765_v21  ;;  %v4009_v42 = vcombine.low %v763_v20, %v765_v21  ;;  %v759_v43 = vmul.bf16 %v4712_v60, %v4619_v36  ;;  %v761_v51 = vmul.bf16 %v4712_v60, %v4622_v37 }
  0xad   : > { %v4737_v18 = vpop.permute.xlu1 %725  ;;  %6533 = vst [vmem:[#allocation9_spill] sm:$0xff] %v4744_v22  ;;  %v787_v31 = vmul.bf16 %v4744_v22, %v4608_v32  ;;  %v789_v34 = vmul.bf16 %v4744_v22, %v4611_v33  ;;  %v4005_v38 = vcombine.low %v756_v26, %v758_v27  ;;  %v781_v55 = vmul.bf16 %v4744_v22, %v4650_v47 }
  0xae   : > { %v4765_v53 = vrot.slane %v4737_v18, 4  ;;  %v4007_v61 = vcombine.high %v759_v43, %v761_v51  ;;  %v696_v3 = vmul.bf16 %v4603_v29, %v4570_v10  ;;  %v697_v4 = vmul.bf16 %v4603_v29, %v4577_v12 }
  0xaf   : > { %1134 = vrot.lane.b32.xlu1 %v4011_v15, %s4427_s24  ;;  %v4023_v52 = vcombine.low %v787_v31, %v789_v34  ;;  %v4006_v5 = vcombine.low %v759_v43, %v761_v51  ;;  %v755_v7 = vmul.bf16 %v4712_v60, %v4641_v44  ;;  %v757_v15 = vmul.bf16 %v4712_v60, %v4644_v45 }
  0xb0   : > { %v945_v23 = vpop.permute.xlu0 %944  ;;  %1136 = vrot.lane.b32.xlu0 %v4012_v19, %s4427_s24  ;;  %6534 = vst [vmem:[#allocation10_spill] sm:$0xff] %v4765_v53  ;;  %v745_v0 = vmul.bf16 %v4765_v53, %v4564_v8  ;;  %v747_v1 = vmul.bf16 %v4765_v53, %v4567_v9  ;;  %v741_v16 = vmul.bf16 %v4765_v53, %v4608_v32 }
  0xb1   : > { %v961_v24 = vsel %vm956_vm0, %v945_v23, %v947_v54  ;;  %v941_v28 = vpop.permute.xlu1 %940  ;;  %v779_v54 = vmul.bf16 %v4744_v22, %v4647_v46  ;;  %v743_v20 = vmul.bf16 %v4765_v53, %v4611_v33  ;;  %v695_v31 = vmul.bf16 %v4603_v29, %v4583_v14 }
  0xb2   : > { %1616 = vmatpush1.bf16.msra.mxu0 %v961_v24  ;;  %v4002_v19 = vcombine.low %v745_v0, %v747_v1  ;;  %v3978_v24 = vcombine.high %v696_v3, %v697_v4  ;;  %v4004_v34 = vcombine.high %v755_v7, %v757_v15  ;;  %v791_v43 = vmul.bf16 %v4744_v22, %v4564_v8 }
  0xb3   : > { %1128 = vrot.lane.b32.xlu1 %v4008_v25, %s4427_s24  ;;  %v4017_v62 = vcombine.low %v779_v54, %v781_v55  ;;  %v793_v51 = vmul.bf16 %v4744_v22, %v4567_v9 }
  0xb4   : > { %1132 = vrot.lane.b32.xlu0 %v4010_v30, %s4427_s24  ;;  %v943_v35 = vpop.permute.xlu0 %942  ;;  %v694_v30 = vmul.bf16 %v4603_v29, %v4580_v13 }
  0xb5   : > { %v939_v39 = vpop.permute.xlu1 %938  ;;  %v960_v17 = vsel %vm956_vm0, %v941_v28, %v943_v35  ;;  %v3999_v35 = vcombine.low %v741_v16, %v743_v20  ;;  %v4026_v0 = vcombine.low %v791_v43, %v793_v51  ;;  %v785_v16 = vmul.bf16 %v4744_v22, %v4632_v41 }
  0xb6   : > { %1617 = vmatprep.subr.bf16.mxu0 %v960_v17  ;;  %v959_v21 = vsel %vm956_vm0, %v939_v39, %v941_v28  ;;  %v3977_v28 = vcombine.low %v696_v3, %v697_v4  ;;  %v739_v39 = vmul.bf16 %v4765_v53, %v4632_v41  ;;  %v3976_v55 = vcombine.high %v694_v30, %v695_v31 }
  0xb7   : > { %1122 = vrot.lane.b32.xlu1 %v4005_v38, %s4427_s24  ;;  %1618 = vmatpush1.bf16.msra.mxu0 %v959_v21  ;;  %v737_v38 = vmul.bf16 %v4765_v53, %v4629_v40  ;;  %v3975_v1 = vcombine.low %v694_v30, %v695_v31 }
  0xb8   : > { %1130 = vrot.lane.b32.xlu0 %v4009_v42, %s4427_s24  ;;  %v935_v56 = vpop.permute.xlu0 %934  ;;  %v692_v42 = vmul.bf16 %v4603_v29, %v4619_v36 }
  0xb9   : > { %v937_v57 = vpop.permute.xlu1 %936 }
  0xba   : > { %v958_v26 = vsel %vm956_vm0, %v935_v56, %v937_v57  ;;  %v4003_v57 = vcombine.low %v755_v7, %v757_v15  ;;  %v691_v7 = vmul.bf16 %v4603_v29, %v4644_v45  ;;  %v783_v15 = vmul.bf16 %v4744_v22, %v4629_v40 }
  0xbb   : > { %1268 = vrot.lane.b32.xlu1 %v4023_v52, %s4428_s25  ;;  %1619 = vmatprep.subr.bf16.mxu0 %v958_v26  ;;  %v693_v52 = vmul.bf16 %v4603_v29, %v4622_v37 }
  0xbc   : > { %1126 = vrot.lane.b32.xlu0 %v4007_v61, %s4427_s24  ;;  %v933_v2 = vpop.permute.xlu0 %932  ;;  %v4020_v30 = vcombine.low %v783_v15, %v785_v16 }
  0xbd   : > { %v4782_v6 = vpop.permute.xlu1 %1179  ;;  %v957_v27 = vsel %vm956_vm0, %v933_v2, %v935_v56  ;;  %v4819_v56 = vsel %vm774_vm2, %v4744_v22, %v4718_v63  ;;  %v3974_v2 = vcombine.high %v692_v42, %v693_v52  ;;  %v690_v63 = vmul.bf16 %v4603_v29, %v4641_v44 }
  0xbe   : > { %1620 = vmatpush1.bf16.msra.mxu0 %v957_v27  ;;  %6535 = vst [vmem:[#allocation11_spill] sm:$0xff] %v4819_v56  ;;  %v790_v3 = vmul.bf16 %v4819_v56, %v4570_v10  ;;  %v792_v4 = vmul.bf16 %v4819_v56, %v4577_v12  ;;  %v786_v21 = vmul.bf16 %v4819_v56, %v4580_v13  ;;  %vm633_vm2 = vcmask 273544  }
  0xbf   : > { %1256 = vrot.lane.b32.xlu1 %v4017_v62, %s4428_s25  ;;  %1621 = vmatprep.subr.bf16.mxu0 %v3978_v24  ;;  %v3996_v62 = vcombine.low %v737_v38, %v739_v39  ;;  %v788_v24 = vmul.bf16 %v4819_v56, %v4583_v14  ;;  %v3972_v27 = vcombine.high %v690_v63, %v691_v7 }
  0xc0   : > { %1124 = vrot.lane.b32.xlu0 %v4006_v5, %s4427_s24  ;;  %v1182_v23 = vpop.permute.xlu0 %1181  ;;  %v4025_v20 = vcombine.high %v790_v3, %v792_v4  ;;  %v4024_v39 = vcombine.low %v790_v3, %v792_v4 }
  0xc1   : > { %v1178_v25 = vpop.permute.xlu1 %1177  ;;  %v4843_v31 = vsel %vm1183_vm3, %v4782_v6, %v1182_v23  ;;  %v3971_v23 = vcombine.low %v690_v63, %v691_v7  ;;  %v4022_v43 = vcombine.high %v786_v21, %v788_v24  ;;  %v4888_v7 = vrot.slane %v4706_v58, 4 }
  0xc2   : > { %1622 = vmatpush1.bf16.msra.mxu0 %v3977_v28 }
  0xc3   : > { %1047 = vrot.lane.b32.xlu1 %v4002_v19, %s6458_s26  ;;  %1623 = vmatprep.subr.bf16.mxu0 %v3976_v55  ;;  %v3973_v19 = vcombine.low %v692_v42, %v693_v52  ;;  %6537 = vst [vmem:[#allocation13_spill] sm:$0xff] %v4888_v7 }
  0xc4   : > { %1120 = vrot.lane.b32.xlu0 %v4004_v34, %s4427_s24  ;;  %v1176_v61 = vpop.permute.xlu0 %1175  ;;  %v4847_v34 = vsel %vm1183_vm3, %v1178_v25, %v4782_v6  ;;  %v782_v6 = vmul.bf16 %v4819_v56, %v4619_v36  ;;  %v784_v25 = vmul.bf16 %v4819_v56, %v4622_v37 }
  0xc5   : > { %v1174_v54 = vpop.permute.xlu1 %1173 }
  0xc6   : > { %1624 = vmatpush1.bf16.msra.mxu0 %v3975_v1  ;;  %v4850_v28 = vsel %vm1183_vm3, %v1174_v54, %v1176_v61  ;;  %v778_v61 = vmul.bf16 %v4819_v56, %v4641_v44  ;;  %v4018_v1 = vcombine.low %v782_v6, %v784_v25 }
  0xc7   : > { %1041 = vrot.lane.b32.xlu1 %v3999_v35, %s6458_s26  ;;  %1625 = vmatprep.subr.bf16.mxu0 %v3974_v2 }
  0xc8   : > { %1118 = vrot.lane.b32.xlu0 %v4003_v57, %s4427_s24  ;;  %v1170_v17 = vpop.permute.xlu0 %1169  ;;  %v4021_v57 = vcombine.low %v786_v21, %v788_v24  ;;  %v735_v21 = vmul.bf16 %v4765_v53, %v4650_v47 }
  0xc9   : > { %v1172_v5 = vpop.permute.xlu1 %1171 }
  0xca   : > { %v4854_v35 = vsel %vm1183_vm3, %v1172_v5, %v1174_v54  ;;  %1626 = vmatpush1.bf16.msra.mxu0 %v3973_v19  ;;  %v4019_v54 = vcombine.high %v782_v6, %v784_v25  ;;  %v4883_v5 = vsel %vm728_vm4, %v4765_v53, %v4737_v18  ;;  %vm3008_vm4 = vcmask 1043592  }
  0xcb   : > { %1035 = vrot.lane.b32.xlu1 %v3996_v62, %s6458_s26  ;;  %1627 = vmatprep.subr.bf16.mxu0 %v3972_v27  ;;  %v780_v62 = vmul.bf16 %v4819_v56, %v4644_v45  ;;  %6536 = vst [vmem:[#allocation12_spill] sm:$0xff] %v4883_v5  ;;  %v746_v19 = vmul.bf16 %v4883_v5, %v4577_v12 }
  0xcc   : > { %1274 = vrot.lane.b32.xlu0 %v4026_v0, %s4428_s25  ;;  %v1164_v52 = vpop.permute.xlu0 %1163 }
  0xcd   : > { %v1168_v26 = vpop.permute.xlu1 %1167  ;;  %v4016_v3 = vcombine.high %v778_v61, %v780_v62  ;;  %v4015_v16 = vcombine.low %v778_v61, %v780_v62 }
  0xce   : > { %v4857_v38 = vsel %vm1183_vm3, %v1168_v26, %v1170_v17  ;;  %1628 = vmatpush1.bf16.msra.mxu0 %v3971_v23  ;;  %v744_v17 = vmul.bf16 %v4883_v5, %v4570_v10 }
  0xcf   : > { %1272 = vrot.lane.b32.xlu1 %v4025_v20, %s4428_s25  ;;  %v733_v20 = vmul.bf16 %v4765_v53, %v4647_v46 }
  0xd0   : > { %1262 = vrot.lane.b32.xlu0 %v4020_v30, %s4428_s25  ;;  %v1409_v63 = vpop.permute.xlu0 %1408  ;;  %v4001_v27 = vcombine.high %v744_v17, %v746_v19 }
  0xd1   : > { %v1166_v42 = vpop.permute.xlu1 %1165  ;;  %v3993_v23 = vcombine.low %v733_v20, %v735_v21 }
  0xd2   : > { %v4865_v51 = vsel %vm1183_vm3, %v1166_v42, %v1168_v26  ;;  %v4906_v26 = vsel %vm797_vm6, %v4888_v7, %v4706_v58  ;;  %v4000_v58 = vcombine.low %v744_v17, %v746_v19  ;;  %v740_v42 = vmul.bf16 %v4883_v5, %v4580_v13 }
  0xd3   : > { %1270 = vrot.lane.b32.xlu1 %v4024_v39, %s4428_s25  ;;  %6538 = vst [vmem:[#allocation14_spill] sm:$0xff] %v4906_v26  ;;  %v813_v39 = vmul.bf16 %v4906_v26, %v4570_v10  ;;  %v815_v6 = vmul.bf16 %v4906_v26, %v4577_v12  ;;  %vm3009_vm6 = vcmask 1047556  }
  0xd4   : > { %1266 = vrot.lane.b32.xlu0 %v4022_v43, %s4428_s25  ;;  %v742_v43 = vmul.bf16 %v4883_v5, %v4583_v14 }
  0xd5   : > { %v1162_v55 = vpop.permute.xlu1 %1161  ;;  %v4036_v62 = vcombine.low %v813_v39, %v815_v6 }
  0xd6   : > { %v4874_v0 = vsel %vm1183_vm3, %v1162_v55, %v1164_v52  ;;  %v4929_v52 = vrot.slane %v4730_v11, 4 }
  0xd7   : > { %1260 = vrot.lane.b32.xlu1 %v4019_v54, %s4428_s25  ;;  %v4037_v54 = vcombine.high %v813_v39, %v815_v6  ;;  %v805_v6 = vmul.bf16 %v4906_v26, %v4619_v36 }
  0xd8   : > { %1264 = vrot.lane.b32.xlu0 %v4021_v57, %s4428_s25  ;;  %6539 = vst [vmem:[#allocation15_spill] sm:$0xff] %v4929_v52  ;;  %v837_v57 = vmul.bf16 %v4929_v52, %v4564_v8  ;;  %v839_v61 = vmul.bf16 %v4929_v52, %v4567_v9 }
  0xd9   : > { %v1160_v2 = vpop.permute.xlu1 %1159 }
  0xda   : > { %v4879_v4 = vsel %vm1183_vm3, %v1160_v2, %v1162_v55  ;;  %v3998_v55 = vcombine.high %v740_v42, %v742_v43  ;;  %v736_v2 = vmul.bf16 %v4883_v5, %v4619_v36 }
  0xdb   : > { %1258 = vrot.lane.b32.xlu1 %v4018_v1, %s4428_s25  ;;  %v3997_v1 = vcombine.low %v740_v42, %v742_v43 }
  0xdc   : > { %1254 = vrot.lane.b32.xlu0 %v4016_v3, %s4428_s25  ;;  %v738_v3 = vmul.bf16 %v4883_v5, %v4622_v37 }
  0xdd   : > { %v1407_v15 = vpop.permute.xlu1 %1406 }
  0xde   : > { %v4895_v18 = vsel %vm1410_vm5, %v1407_v15, %v1409_v63  ;;  %v4050_v63 = vcombine.low %v837_v57, %v839_v61  ;;  %v3995_v17 = vcombine.high %v736_v2, %v738_v3  ;;  %v3994_v20 = vcombine.low %v736_v2, %v738_v3  ;;  %v4226_v61 = vld [vmem:[%s6438_s3 + $0x4] ss:$20 sps:$4 sm:$0xff]  }
  0xdf   : > { %1388 = vrot.lane.b32.xlu1 %v4655_v48, %s4426_s23  ;;  %v1403_v48 = vpop.permute.xlu0 %1402  ;;  %v4976_v57 = vsel %vm820_vm7, %v4929_v52, %v4730_v11  ;;  %1645 = vmatprep.mubr.bf16.mxu0 %v4226_v61  ;;  %vm3001_vm7 = vcmask 138240  }
  0xe0   : > { %1252 = vrot.lane.b32.xlu0 %v4015_v16, %s4428_s25  ;;  %v811_v16 = vmul.bf16 %v4906_v26, %v4583_v14  ;;  %6540 = vst [vmem:[#allocation16_spill] sm:$0xff] %v4976_v57  ;;  %v836_v11 = vmul.bf16 %v4976_v57, %v4570_v10  ;;  %v838_v2 = vmul.bf16 %v4976_v57, %v4577_v12 }
  0xe1   : > { %v1405_v24 = vpop.permute.xlu1 %1404  ;;  %v828_v61 = vmul.bf16 %v4976_v57, %v4619_v36 }
  0xe2   : > { %v4909_v30 = vsel %vm1410_vm5, %v1405_v24, %v1407_v15  ;;  %v809_v15 = vmul.bf16 %v4906_v26, %v4580_v13  ;;  %v833_v24 = vmul.bf16 %v4929_v52, %v4608_v32  ;;  %v4048_v12 = vcombine.low %v836_v11, %v838_v2 }
  0xe3   : > { %1386 = vrot.lane.b32.xlu1 %v4666_v50, %s4426_s23 }
  0xe4   : > { %1045 = vrot.lane.b32.xlu0 %v4001_v27, %s6458_s26  ;;  %v4034_v19 = vcombine.high %v809_v15, %v811_v16  ;;  %v4033_v21 = vcombine.low %v809_v15, %v811_v16  ;;  %v835_v27 = vmul.bf16 %v4929_v52, %v4611_v33  ;;  %v803_v15 = vmul.bf16 %v4906_v26, %v4644_v45 }
  0xe5   : > { %v4918_v25 = vpop.permute.xlu1 %1400  ;;  %v4049_v16 = vcombine.high %v836_v11, %v838_v2 }
  0xe6   : > { %v4926_v50 = vsel %vm1410_vm5, %v4918_v25, %v1403_v48  ;;  %v732_v48 = vmul.bf16 %v4883_v5, %v4641_v44  ;;  %v4047_v39 = vcombine.low %v833_v24, %v835_v27  ;;  %v825_v27 = vmul.bf16 %v4929_v52, %v4647_v46 }
  0xe7   : > { %1029 = vrot.lane.b32.xlu1 %v3993_v23, %s6458_s26  ;;  %v734_v23 = vmul.bf16 %v4883_v5, %v4644_v45 }
  0xe8   : > { %1043 = vrot.lane.b32.xlu0 %v4000_v58, %s6458_s26  ;;  %v807_v58 = vmul.bf16 %v4906_v26, %v4622_v37 }
  0xe9   : > { %v3992_v42 = vcombine.high %v732_v48, %v734_v23 }
  0xea   : > { %v4031_v43 = vcombine.high %v805_v6, %v807_v58 }
  0xeb   : > { %1365 = vrot.lane.b32.xlu1 %v4037_v54, %s4430_s29  ;;  %v3991_v54 = vcombine.low %v732_v48, %v734_v23  ;;  %v827_v48 = vmul.bf16 %v4929_v52, %v4650_v47 }
  0xec   : > { %1039 = vrot.lane.b32.xlu0 %v3998_v55, %s6458_s26  ;;  %v814_v55 = vmul.bf16 %v4888_v7, %v4564_v8  ;;  %v831_v8 = vmul.bf16 %v4929_v52, %v4632_v41 }
  0xef   : > { %1363 = vrot.lane.b32.xlu1 %v4036_v62, %s4430_s29  ;;  %v4030_v62 = vcombine.low %v805_v6, %v807_v58 }
  0xf0   : > { %1037 = vrot.lane.b32.xlu0 %v3997_v1, %s6458_s26  ;;  %v829_v1 = vmul.bf16 %v4929_v52, %v4629_v40 }
  0xf2   : > { %v4044_v3 = vcombine.low %v829_v1, %v831_v8 }
  0xf3   : > { %1501 = vrot.lane.b32.xlu1 %v4050_v63, %s6456_s30  ;;  %v801_v63 = vmul.bf16 %v4906_v26, %v4641_v44 }
  0xf4   : > { %1033 = vrot.lane.b32.xlu0 %v3995_v17, %s6458_s26  ;;  %v4998_v17 = vpop.permute.xlu1 %1398 }
  0xf5   : > { %v4028_v10 = vcombine.high %v801_v63, %v803_v15 }
  0xf7   : > { %1359 = vrot.lane.b32.xlu1 %v4034_v19, %s4430_s29  ;;  %v810_v19 = vmul.bf16 %v4888_v7, %v4608_v32  ;;  %v832_v32 = vmul.bf16 %v4976_v57, %v4580_v13  ;;  %v806_v13 = vmul.bf16 %v4888_v7, %v4629_v40 }
  0xf8   : > { %1031 = vrot.lane.b32.xlu0 %v3994_v20, %s6458_s26  ;;  %v812_v20 = vmul.bf16 %v4888_v7, %v4611_v33  ;;  %v5007_v24 = vpop.permute.xlu1 %1394  ;;  %v834_v33 = vmul.bf16 %v4976_v57, %v4583_v14  ;;  %v808_v14 = vmul.bf16 %v4888_v7, %v4632_v41 }
  0xfa   : > { %v4035_v23 = vcombine.low %v810_v19, %v812_v20  ;;  %v4046_v6 = vcombine.high %v832_v32, %v834_v33  ;;  %v824_v19 = vmul.bf16 %v4976_v57, %v4641_v44  ;;  %v826_v20 = vmul.bf16 %v4976_v57, %v4644_v45  ;;  %v1533_v45 = vld [vmem:[%s6439_s4 + $0x8] sm:$0xff] }
  0xfb   : > { %1357 = vrot.lane.b32.xlu1 %v4033_v21, %s4430_s29  ;;  %v4027_v21 = vcombine.low %v801_v63, %v803_v15  ;;  %v804_v63 = vmul.bf16 %v4888_v7, %v4650_v47 }
  0xfc   : > { %1390 = vrot.lane.b32.xlu0 %v4660_v49, %s4426_s23  ;;  %v816_v49 = vmul.bf16 %v4888_v7, %v4567_v9  ;;  %v5020_v58 = vpop.permute.xlu1 %1392 }
  0xfe   : > { %v4038_v9 = vcombine.low %v814_v55, %v816_v49  ;;  %v4032_v49 = vcombine.low %v806_v13, %v808_v14  ;;  %v1532_v13 = vld [vmem:[%s6439_s4] sm:$0xff] }
  0xff   : > { %1495 = vrot.lane.b32.xlu1 %v4047_v39, %s6456_s30  ;;  %v4041_v39 = vcombine.low %v825_v27, %v827_v48  ;;  %v4040_v48 = vcombine.high %v824_v19, %v826_v20 }
 0x100   : > { %1027 = vrot.lane.b32.xlu0 %v3992_v42, %s6458_s26  ;;  %v5023_v42 = vpop.permute.xlu0 %1396 }
 0x103   : > { %1353 = vrot.lane.b32.xlu1 %v4031_v43, %s4430_s29  ;;  %v4045_v43 = vcombine.low %v832_v32, %v834_v33  ;;  %v4039_v33 = vcombine.low %v824_v19, %v826_v20 }
 0x104   : > { %1025 = vrot.lane.b32.xlu0 %v3991_v54, %s6458_s26  ;;  %s2811_s26 = sld [smem:[#allocation3]] }
 0x107   : > { %1351 = vrot.lane.b32.xlu1 %v4030_v62, %s4430_s29  ;;  %v830_v62 = vmul.bf16 %v4976_v57, %v4622_v37 }
 0x108   : > { %1367 = vrot.lane.b32.xlu0 %v4038_v9, %s4430_s29  ;;  %v4232_v9 = vld [vmem:[%s6438_s3 + $0xc] ss:$20 sps:$4 sm:$0xff]  }
 0x109   : > { %v4043_v41 = vcombine.high %v828_v61, %v830_v62  ;;  %1698 = vmatprep.mubr.bf16.mxu1 %v4232_v9  ;;  %v4042_v2 = vcombine.low %v828_v61, %v830_v62 }
 0x10b   : > { %1489 = vrot.lane.b32.xlu1 %v4044_v3, %s6456_s30  ;;  %v802_v3 = vmul.bf16 %v4888_v7, %v4647_v46  ;;  %v6466_v46 = vmov 0  }
 0x10c   : > { %1499 = vrot.lane.b32.xlu0 %v4049_v16, %s6456_s30  ;;  %4210 = vset.pattern.permute.xlu1 %v6466_v46 }
 0x10d   : > { %4211 = vset.pattern.permute.xlu0 %v6466_v46 }
 0x10f   : > { %1347 = vrot.lane.b32.xlu1 %v4028_v10, %s4430_s29 }
 0x110   : > { %1497 = vrot.lane.b32.xlu0 %v4048_v12, %s6456_s30  ;;  %v4029_v12 = vcombine.low %v802_v3, %v804_v63 }
 0x113   : > { %1345 = vrot.lane.b32.xlu1 %v4027_v21, %s4430_s29 }
 0x114   : > { %1361 = vrot.lane.b32.xlu0 %v4035_v23, %s4430_s29 }
 0x117   : > { %1483 = vrot.lane.b32.xlu1 %v4041_v39, %s6456_s30 }
 0x118   : > { %1493 = vrot.lane.b32.xlu0 %v4046_v6, %s6456_s30  ;;  %v1785_v6 = vld [vmem:[%s6441_s6 + $0x8] sm:$0xff] }
 0x11b   : > { %1543 = vperm.xlu1 %4210, %v1533_v45  }
 0x11c   : > { %1491 = vrot.lane.b32.xlu0 %v4045_v43, %s6456_s30 }
 0x11d   : > { %v1141_v54 = vpop.permute.xlu1 %1140 }
 0x11e   : > { %v1139_v55 = vpop.permute.xlu0 %1138 }
 0x11f   : > { %v1150_v1 = vsel %vm1142_vm8, %v1139_v55, %v1141_v54  ;;  %1795 = vperm.xlu1 %4210, %v1785_v6  }
 0x120   : > { %1355 = vrot.lane.b32.xlu0 %v4032_v49, %s4430_s29  ;;  %1629 = vmatprep.subr.bf16.mxu0 %v1150_v1 }
 0x121   : > { %v1135_v40 = vpop.permute.xlu1 %1134 }
 0x122   : > { %v1137_v8 = vpop.permute.xlu0 %1136 }
 0x123   : > { %v1149_v11 = vsel %vm1142_vm8, %v1137_v8, %v1139_v55  ;;  %v1784_v55 = vld [vmem:[%s6441_s6] sm:$0xff] }
 0x124   : > { %1487 = vrot.lane.b32.xlu0 %v4043_v41, %s6456_s30  ;;  %1630 = vmatpush2.bf16.msra.mxu0 %v1149_v11 }
 0x125   : > { %v1129_v36 = vpop.permute.xlu1 %1128  ;;  %1790 = vperm.xlu1 %4210, %v1784_v55  }
 0x126   : > { %v1133_v37 = vpop.permute.xlu0 %1132 }
 0x127   : > { %v1148_v15 = vsel %vm1142_vm8, %v1133_v37, %v1135_v40 }
 0x128   : > { %1485 = vrot.lane.b32.xlu0 %v4042_v2, %s6456_s30  ;;  %1631 = vmatprep.subr.bf16.mxu0 %v1148_v15 }
 0x129   : > { %v1123_v16 = vpop.permute.xlu1 %1122 }
 0x12a   : > { %v1131_v10 = vpop.permute.xlu0 %1130 }
 0x12b   : > { %v1147_v21 = vsel %vm1142_vm8, %v1131_v10, %v1133_v37 }
 0x12c   : > { %1349 = vrot.lane.b32.xlu0 %v4029_v12, %s4430_s29  ;;  %1632 = vmatpush2.bf16.msra.mxu0 %v1147_v21 }
 0x12d   : > { %v1269_v47 = vpop.permute.xlu1 %1268 }
 0x12e   : > { %v1127_v27 = vpop.permute.xlu0 %1126 }
 0x12f   : > { %v1146_v23 = vsel %vm1142_vm8, %v1127_v27, %v1129_v36 }
 0x130   : > { %1481 = vrot.lane.b32.xlu0 %v4040_v48, %s6456_s30  ;;  %1633 = vmatprep.subr.bf16.mxu0 %v1146_v23 }
 0x131   : > { %v1257_v44 = vpop.permute.xlu1 %1256 }
 0x132   : > { %v1125_v32 = vpop.permute.xlu0 %1124 }
 0x133   : > { %v1145_v39 = vsel %vm1142_vm8, %v1125_v32, %v1127_v27 }
 0x134   : > { %1479 = vrot.lane.b32.xlu0 %v4039_v33, %s6456_s30  ;;  %1634 = vmatpush2.bf16.msra.mxu0 %v1145_v39  ;;  %s4434_s30 = smov 17  }
 0x135   : > { %v1048_v43 = vpop.permute.xlu1 %1047 }
 0x136   : > { %v1121_v14 = vpop.permute.xlu0 %1120 }
 0x137   : > { %v1144_v54 = vsel %vm1142_vm8, %v1121_v14, %v1123_v16 }
 0x138   : > { %1635 = vmatprep.subr.bf16.mxu0 %v1144_v54  ;;  %1538 = vperm.xlu0 %4211, %v1532_v13   ;;  %v1415_v13 = vsel %vm1410_vm5, %v4998_v17, %v4918_v25 }
 0x139   : > { %v1042_v49 = vpop.permute.xlu1 %1041 }
 0x13a   : > { %v1119_v61 = vpop.permute.xlu0 %1118 }
 0x13b   : > { %v1143_v62 = vsel %vm1142_vm8, %v1119_v61, %v1121_v14  ;;  %v4224_v61 = vld [vmem:[%s6438_s3] ss:$20 sps:$4 sm:$0xff]  }
 0x13c   : > { %1636 = vmatpush2.bf16.msra.mxu0 %v1143_v62 }
 0x13d   : > { %v1036_v1 = vpop.permute.xlu1 %1035 }
 0x13e   : > { %v1275_v40 = vpop.permute.xlu0 %1274 }
 0x141   : > { %v1273_v8 = vpop.permute.xlu1 %1272 }
 0x142   : > { %v1263_v41 = vpop.permute.xlu0 %1262  ;;  %v1284_v9 = vsel %vm1276_vm9, %v1273_v8, %v1275_v40 }
 0x143   : > { %1666 = vmatprep.subr.bf16.mxu1 %v1284_v9 }
 0x145   : > { %v1271_v11 = vpop.permute.xlu1 %1270 }
 0x146   : > { %v1267_v36 = vpop.permute.xlu0 %1266  ;;  %v1283_v37 = vsel %vm1276_vm9, %v1271_v11, %v1273_v8  ;;  %v4229_v11 = vld [vmem:[%s6438_s3 + $0x28] ss:$20 sps:$4 sm:$0xff]  }
 0x147   : > { %1667 = vmatpush1.bf16.msra.mxu1 %v1283_v37  ;;  %v1282_v2 = vsel %vm1276_vm9, %v1267_v36, %v1269_v47 }
 0x148   : > { %1668 = vmatprep.subr.bf16.mxu1 %v1282_v2 }
 0x149   : > { %v1261_v3 = vpop.permute.xlu1 %1260 }
 0x14a   : > { %v1265_v63 = vpop.permute.xlu0 %1264  ;;  %v1280_v16 = vsel %vm1276_vm9, %v1261_v3, %v1263_v41 }
 0x14b   : > { %v1281_v15 = vsel %vm1276_vm9, %v1265_v63, %v1267_v36 }
 0x14c   : > { %1669 = vmatpush1.bf16.msra.mxu1 %v1281_v15 }
 0x14d   : > { %v1259_v10 = vpop.permute.xlu1 %1258  ;;  %1670 = vmatprep.subr.bf16.mxu1 %v1280_v16 }
 0x14e   : > { %v1255_v12 = vpop.permute.xlu0 %1254  ;;  %v1279_v19 = vsel %vm1276_vm9, %v1259_v10, %v1261_v3 }
 0x14f   : > { %v1278_v20 = vsel %vm1276_vm9, %v1255_v12, %v1257_v44 }
 0x150   : > { %1671 = vmatpush1.bf16.msra.mxu1 %v1279_v19 }
 0x151   : > { %v1389_v21 = vpop.permute.xlu1 %1388  ;;  %1672 = vmatprep.subr.bf16.mxu1 %v1278_v20 }
 0x152   : > { %v1253_v27 = vpop.permute.xlu0 %1252 }
 0x153   : > { %v1277_v47 = vsel %vm1276_vm9, %v1253_v27, %v1255_v12 }
 0x154   : > { %1673 = vmatpush1.bf16.msra.mxu1 %v1277_v47 }
 0x155   : > { %v1387_v48 = vpop.permute.xlu1 %1386  ;;  %1674 = vmatprep.subr.bf16.mxu1 %v4843_v31 }
 0x156   : > { %v1046_v23 = vpop.permute.xlu0 %1045  ;;  %v1411_v17 = vsel %vm1410_vm5, %v1387_v48, %v1389_v21 }
 0x157   : > { %v1057_v45 = vsel %vm1049_vm10, %v1046_v23, %v1048_v43 }
 0x158   : > { %1637 = vmatprep.subr.bf16.mxu0 %v1057_v45  ;;  %1675 = vmatpush1.bf16.msra.mxu1 %v4847_v34 }
 0x159   : > { %1676 = vmatprep.subr.bf16.mxu1 %v4850_v28  ;;  %v1030_v44 = vpop.permute.xlu1 %1029 }
 0x15a   : > { %v1044_v32 = vpop.permute.xlu0 %1043 }
 0x15b   : > { %v1056_v33 = vsel %vm1049_vm10, %v1044_v32, %v1046_v23 }
 0x15c   : > { %1638 = vmatpush2.bf16.msra.mxu0 %v1056_v33  ;;  %1677 = vmatpush1.bf16.msra.mxu1 %v4854_v35 }
 0x15d   : > { %1678 = vmatprep.subr.bf16.mxu1 %v4857_v38  ;;  %v1366_v6 = vpop.permute.xlu1 %1365 }
 0x15e   : > { %v1040_v39 = vpop.permute.xlu0 %1039 }
 0x15f   : > { %v1055_v31 = vsel %vm1049_vm10, %v1040_v39, %v1042_v49 }
 0x160   : > { %1639 = vmatprep.subr.bf16.mxu0 %v1055_v31  ;;  %1679 = vmatpush1.bf16.msra.mxu1 %v4865_v51 }
 0x161   : > { %1680 = vmatprep.subr.bf16.mxu1 %v4874_v0  ;;  %v1364_v35 = vpop.permute.xlu1 %1363 }
 0x162   : > { %v1038_v34 = vpop.permute.xlu0 %1037  ;;  %v1376_v40 = vsel %vm1369_vm11, %v1364_v35, %v1366_v6 }
 0x163   : > { %v1054_v28 = vsel %vm1049_vm10, %v1038_v34, %v1040_v39 }
 0x164   : > { %1640 = vmatpush2.bf16.msra.mxu0 %v1054_v28  ;;  %1681 = vmatpush1.bf16.msra.mxu1 %v4879_v4  ;;  %v1414_v4 = vsel %vm1410_vm5, %v5007_v24, %v5023_v42  ;;  %v4230_v28 = vld [vmem:[%s6438_s3 + $0x8] ss:$20 sps:$4 sm:$0xff]  }
 0x165   : > { %1682 = vmatprep.subr.bf16.mxu1 %v4895_v18  ;;  %v1502_v14 = vpop.permute.xlu1 %1501 }
 0x166   : > { %v1034_v43 = vpop.permute.xlu0 %1033 }
 0x167   : > { %v1053_v38 = vsel %vm1049_vm10, %v1034_v43, %v1036_v1 }
 0x168   : > { %1641 = vmatprep.subr.bf16.mxu0 %v1053_v38  ;;  %1683 = vmatpush2.bf16.msra.mxu1 %v4909_v30  ;;  %v1413_v30 = vsel %vm1410_vm5, %v5020_v58, %v5007_v24  ;;  %v4227_v58 = vld [vmem:[%s6438_s3 + $0x2c] ss:$20 sps:$4 sm:$0xff]  }
 0x169   : > { %1684 = vmatprep.subr.bf16.mxu1 %v4926_v50  ;;  %v1360_v54 = vpop.permute.xlu1 %1359 }
 0x16a   : > { %v1032_v51 = vpop.permute.xlu0 %1031 }
 0x16b   : > { %v1052_v0 = vsel %vm1049_vm10, %v1032_v51, %v1034_v43 }
 0x16c   : > { %1642 = vmatpush2.bf16.msra.mxu0 %v1052_v0  ;;  %1685 = vmatpush2.bf16.msra.mxu1 %v1415_v13  ;;  %v4233_v13 = vld [vmem:[%s6438_s3 + $0x10] ss:$20 sps:$4 sm:$0xff]  }
 0x16d   : > { %1686 = vmatprep.subr.bf16.mxu1 %v1414_v4  ;;  %v1358_v24 = vpop.permute.xlu1 %1357  ;;  %v4236_v4 = vld [vmem:[%s6438_s3 + $0x30] ss:$20 sps:$4 sm:$0xff]  }
 0x16e   : > { %v1391_v18 = vpop.permute.xlu0 %1390  ;;  %v1374_v15 = vsel %vm1369_vm11, %v1358_v24, %v1360_v54 }
 0x16f   : > { %v1412_v50 = vsel %vm1410_vm5, %v1389_v21, %v1391_v18  ;;  %v4237_v18 = vld [vmem:[%s6438_s3 + $0x38] ss:$20 sps:$4 sm:$0xff]  }
 0x170   : > { %1687 = vmatpush2.bf16.msra.mxu1 %v1413_v30  ;;  %v6460_v30 = vmov 0.0  }
 0x171   : > { %1688 = vmatprep.subr.bf16.mxu1 %v1412_v50  ;;  %v1496_v8 = vpop.permute.xlu1 %1495 }
 0x172   : > { %v1028_v55 = vpop.permute.xlu0 %1027 }
 0x173   : > { %v1051_v25 = vsel %vm1049_vm10, %v1028_v55, %v1030_v44 }
 0x174   : > { %1643 = vmatprep.subr.bf16.mxu0 %v1051_v25  ;;  %1689 = vmatpush2.bf16.msra.mxu1 %v1411_v17 }
 0x175   : > { %v1354_v2 = vpop.permute.xlu1 %1353 }
 0x176   : > { %v1026_v49 = vpop.permute.xlu0 %1025 }
 0x177   : > { %v1050_v42 = vsel %vm1049_vm10, %v1026_v49, %v1028_v55 }
 0x178   : > { %1644 = vmatpush2.bf16.msra.mxu0 %v1050_v42 }
 0x179   : > { %v1352_v16 = vpop.permute.xlu1 %1351 }
 0x17a   : > { %v1368_v62 = vpop.permute.xlu0 %1367  ;;  %v1372_v48 = vsel %vm1369_vm11, %v1352_v16, %v1354_v2 }
 0x17b   : > { %v1377_v1 = vsel %vm1369_vm11, %v1366_v6, %v1368_v62  ;;  %1646 = vmatmul.mubr.bf16.vlgmr.msra.gmra.mxu0 %v4224_v61 }
 0x17c   : > { %1690 = vmatprep.subr.bf16.mxu1 %v1377_v1  ;;  %1655 = vmatprep.mubr.bf16.mxu0 %v4227_v58 }
 0x17d   : > { %1691 = vmatpush2.bf16.msra.mxu1 %v1376_v40  ;;  %v1490_v21 = vpop.permute.xlu1 %1489 }
 0x17e   : > { %v1500_v41 = vpop.permute.xlu0 %1499 }
 0x17f   : > { %v1511_v9 = vsel %vm1503_vm12, %v1500_v41, %v1502_v14  ;;  %v4234_v14 = vld [vmem:[%s6438_s3 + $0x34] ss:$20 sps:$4 sm:$0xff]  }
 0x180   : > { %1727 = vmatprep.subr.bf16.mxu0 %v1511_v9 }
 0x181   : > { %v1348_v23 = vpop.permute.xlu1 %1347 }
 0x182   : > { %v1498_v36 = vpop.permute.xlu0 %1497 }
 0x183   : > { %v1510_v37 = vsel %vm1503_vm12, %v1498_v36, %v1500_v41  ;;  %1656 = vmatmul.mubr.bf16.gmra.mxu0 %v4229_v11 }
 0x184   : > { %1728 = vmatpush1.bf16.msra.mxu0 %v1510_v37  ;;  %1751 = vmatprep.mubr.bf16.mxu0 %v6466_v46 }
 0x185   : > { %v1346_v39 = vpop.permute.xlu1 %1345 }
 0x186   : > { %v1362_v3 = vpop.permute.xlu0 %1361  ;;  %v1370_v34 = vsel %vm1369_vm11, %v1346_v39, %v1348_v23  ;;  %v1783_v39 = vld [vmem:[%s6440_s5 + $0x18] sm:$0xff] }
 0x187   : > { %v1375_v63 = vsel %vm1369_vm11, %v1360_v54, %v1362_v3 }
 0x188   : > { %1692 = vmatprep.subr.bf16.mxu1 %v1375_v63 }
 0x189   : > { %1693 = vmatpush2.bf16.msra.mxu1 %v1374_v15  ;;  %v1484_v35 = vpop.permute.xlu1 %1483 }
 0x18a   : > { %v1494_v10 = vpop.permute.xlu0 %1493 }
 0x18b   : > { %v1509_v12 = vsel %vm1503_vm12, %v1494_v10, %v1496_v8 }
 0x18c   : > { %1729 = vmatprep.subr.bf16.mxu0 %v1509_v12 }
 0x18e   : > { %v1492_v19 = vpop.permute.xlu0 %1491 }
 0x18f   : > { %v1508_v20 = vsel %vm1503_vm12, %v1492_v19, %v1494_v10 }
 0x190   : > { %1730 = vmatpush1.bf16.msra.mxu0 %v1508_v20 }
 0x192   : > { %v1356_v27 = vpop.permute.xlu0 %1355 }
 0x193   : > { %v1373_v47 = vsel %vm1369_vm11, %v1354_v2, %v1356_v27 }
 0x194   : > { %1694 = vmatprep.subr.bf16.mxu1 %v1373_v47 }
 0x195   : > { %1695 = vmatpush2.bf16.msra.mxu1 %v1372_v48 }
 0x196   : > { %v1488_v45 = vpop.permute.xlu0 %1487  ;;  %v1544_v1 = vpop.permute.xlu1 %1543 }
 0x197   : > { %v1507_v44 = vsel %vm1503_vm12, %v1488_v45, %v1490_v21 }
 0x198   : > { %1731 = vmatprep.subr.bf16.mxu0 %v1507_v44 }
 0x19a   : > { %v1486_v32 = vpop.permute.xlu0 %1485 }
 0x19b   : > { %v1506_v33 = vsel %vm1503_vm12, %v1486_v32, %v1488_v45  ;;  %v1781_v32 = vld [vmem:[%s6440_s5 + $0x8] sm:$0xff] }
 0x19c   : > { %1732 = vmatpush1.bf16.msra.mxu0 %v1506_v33 }
 0x19e   : > { %v1350_v31 = vpop.permute.xlu0 %1349 }
 0x19f   : > { %v1371_v6 = vsel %vm1369_vm11, %v1348_v23, %v1350_v31 }
 0x1a0   : > { %1696 = vmatprep.subr.bf16.mxu1 %v1371_v6 }
 0x1a1   : > { %1697 = vmatpush2.bf16.msra.mxu1 %v1370_v34 }
 0x1a2   : > { %4165 = vmatprep.subr.bf16.mxu1 %v1511_v9  ;;  %v1482_v43 = vpop.permute.xlu0 %1481 }
 0x1a3   : > { %v1505_v38 = vsel %vm1503_vm12, %v1482_v43, %v1484_v35 }
 0x1a4   : > { %1699 = vmatmul.mubr.bf16.vlgmr.msra.gmra.mxu1 %v4230_v28  ;;  %1733 = vmatprep.subr.bf16.mxu0 %v1505_v38 }
 0x1a5   : > { %4169 = vmatpush1.bf16.msra.mxu1 %v1510_v37  ;;  %1708 = vmatprep.mubr.bf16.mxu1 %v4234_v14 }
 0x1a6   : > { %4166 = vmatprep.subr.bf16.mxu1 %v1509_v12  ;;  %v1480_v51 = vpop.permute.xlu0 %1479 }
 0x1a7   : > { %v1504_v0 = vsel %vm1503_vm12, %v1480_v51, %v1482_v43  ;;  %v1796_v51 = vpop.permute.xlu1 %1795 }
 0x1a8   : > { %1734 = vmatpush1.bf16.msra.mxu0 %v1504_v0 }
 0x1a9   : > { %4170 = vmatpush1.bf16.msra.mxu1 %v1508_v20 }
 0x1aa   : > { %4167 = vmatprep.subr.bf16.mxu1 %v1507_v44  ;;  %v1780_v44 = vld [vmem:[%s6440_s5] sm:$0xff] }
 0x1ab   : > { %4061 = vmatmul.mubr.msk.bf16.vlgmr.msra.gmra.mxu0 %vm1606_vm13, %v4233_v13  ;;  %v1791_v14 = vpop.permute.xlu1 %1790 }
 0x1ac   : > { %1709 = vmatmul.mubr.bf16.gmra.mxu1 %v4236_v4  ;;  %2135 = vmatprep.mubr.f32.mxu0 %v6460_v30 }
 0x1ad   : > { %4171 = vmatpush1.bf16.msra.mxu1 %v1506_v33  ;;  %1761 = vmatprep.mubr.bf16.mxu1 %v6466_v46  ;;  %v1782_v33 = vld [vmem:[%s6440_s5 + $0x10] sm:$0xff] }
 0x1ae   : > { %4168 = vmatprep.subr.bf16.mxu1 %v1505_v38 }
 0x1b1   : > { %4172 = vmatpush1.bf16.msra.mxu1 %v1504_v0 }
 0x1b3   : > { %v1539_v40 = vpop.permute.xlu0 %1538 }
 0x1b4   : > { %4062 = vmatmul.mubr.msk.bf16.vlgmr.msra.gmra.mxu1 %vm1606_vm13, %v4237_v18  ;;  %vm6088_vm13 = vmor %vm3009_vm6, %vm3008_vm4 }
 0x1b5   : > { %1885 = vmatprep.mubr.f32.mxu1 %v6460_v30 }
 0x23b   : > { %v1647_v50 = vpop.f32.mrf.mxu0 }
 0x23c   : > { %v1648_v2 = vadd.f32 %v1647_v50, %v1539_v40 }
 0x23d   : > { %v1649_v54 = vpop.f32.mrf.mxu0 }
 0x23e   : > { %v1650_v37 = vadd.f32 %v1649_v54, %v1539_v40  ;;  %v1787_v40 = vld [vmem:[%s6441_s6 + $0x18] sm:$0xff] }
 0x23f   : > { %v1651_v55 = vpop.f32.mrf.mxu0 }
 0x240   : > { %v1652_v41 = vadd.f32 %v1651_v55, %v1544_v1 }
 0x241   : > { %v1653_v25 = vpop.f32.mrf.mxu0 }
 0x242   : > { %v1654_v36 = vadd.f32 %v1653_v25, %v1544_v1  ;;  %v1535_v1 = vld [vmem:[%s6439_s4 + $0x18] sm:$0xff] }
 0x243   : > { %v5155_v17 = vpop.f32.mrf.mxu0 }
 0x244   : > { %6541 = vst [vmem:[#allocation17_spill] sm:$0xff] %v5155_v17 }
 0x245   : > { %v5157_v49 = vpop.f32.mrf.mxu0 }
 0x246   : > { %6542 = vst [vmem:[#allocation18_spill] sm:$0xff] %v5157_v49 }
 0x247   : > { %v5159_v61 = vpop.f32.mrf.mxu0 }
 0x248   : > { %6543 = vst [vmem:[#allocation19_spill] sm:$0xff] %v5159_v61 }
 0x249   : > { %v5161_v58 = vpop.f32.mrf.mxu0 }
 0x24a   : > { %6544 = vst [vmem:[#allocation20_spill] sm:$0xff] %v5161_v58 }
 0x264   : > { %v1700_v42 = vpop.f32.mrf.mxu1 }
 0x265   : > { %v1701_v10 = vadd.f32 %v1700_v42, %v1648_v2 }
 0x266   : > { %v1702_v24 = vpop.f32.mrf.mxu1 }
 0x267   : > { %v1703_v15 = vadd.f32 %v1702_v24, %v1650_v37  ;;  %v1786_v24 = vld [vmem:[%s6441_s6 + $0x10] sm:$0xff] }
 0x268   : > { %v1704_v62 = vpop.f32.mrf.mxu1 }
 0x269   : > { %v1705_v3 = vadd.f32 %v1704_v62, %v1652_v41  ;;  %v1534_v62 = vld [vmem:[%s6439_s4 + $0x10] sm:$0xff] }
 0x26a   : > { %v1706_v9 = vpop.f32.mrf.mxu1 }
 0x26b   : > { %v1753_v8 = vpop.f32.mrf.mxu0  ;;  %v1707_v16 = vadd.f32 %v1706_v9, %v1654_v36 }
 0x26c   : > { %v5169_v27 = vadd.f32 %v1753_v8, %v1701_v10  ;;  %v5202_v31 = vpop.f32.mrf.mxu1 }
 0x26d   : > { %v1755_v11 = vpop.f32.mrf.mxu0  ;;  %6549 = vst [vmem:[#allocation25_spill] sm:$0xff] %v5202_v31 }
 0x26e   : > { %v5165_v20 = vadd.f32 %v1755_v11, %v1703_v15  ;;  %6548 = vst [vmem:[#allocation24_spill] sm:$0xff] %v5169_v27  ;;  %v6465_v45 = vmax.f32 %v5169_v27, 0.0  ;;  %v5204_v6 = vpop.f32.mrf.mxu1 }
 0x26f   : > { %v1757_v63 = vpop.f32.mrf.mxu0  ;;  %6550 = vst [vmem:[#allocation26_spill] sm:$0xff] %v5204_v6 }
 0x270   : > { %v5163_v12 = vadd.f32 %v1757_v63, %v1705_v3  ;;  %6546 = vst [vmem:[#allocation22_spill] sm:$0xff] %v5165_v20  ;;  %v6464_v23 = vmax.f32 %v5165_v20, 0.0  ;;  %v5206_v34 = vpop.f32.mrf.mxu1 }
 0x271   : > { %v1759_v19 = vpop.f32.mrf.mxu0  ;;  %6551 = vst [vmem:[#allocation27_spill] sm:$0xff] %v5206_v34 }
 0x272   : > { %6545 = vst [vmem:[#allocation21_spill] sm:$0xff] %v5163_v12  ;;  %v5167_v21 = vadd.f32 %v1759_v19, %v1707_v16  ;;  %v6463_v48 = vmax.f32 %v5163_v12, 0.0  ;;  %v5208_v28 = vpop.f32.mrf.mxu1 }
 0x273   : > { %6552 = vst [vmem:[#allocation28_spill] sm:$0xff] %v5208_v28 }
 0x274   : > { %6547 = vst [vmem:[#allocation23_spill] sm:$0xff] %v5167_v21  ;;  %v6462_v47 = vmax.f32 %v5167_v21, 0.0  ;;  %v5210_v35 = vpop.f32.mrf.mxu1 }
 0x275   : > { %6553 = vst [vmem:[#allocation29_spill] sm:$0xff] %v5210_v35 }
 0x276   : > { %1849 = vmatprep.subr.mxu1 %v6462_v47  ;;  %v5212_v43 = vpop.f32.mrf.mxu1 }
 0x277   : > { %1850 = vmatpush1.msra.mxu1 %v6463_v48  ;;  %6554 = vst [vmem:[#allocation30_spill] sm:$0xff] %v5212_v43 }
 0x278   : > { %1851 = vmatprep.subr.mxu1 %v6464_v23  ;;  %v5214_v38 = vpop.f32.mrf.mxu1 }
 0x279   : > { %1852 = vmatpush1.msra.mxu1 %v6465_v45  ;;  %6555 = vst [vmem:[#allocation31_spill] sm:$0xff] %v5214_v38 }
 0x27a   : > { %4063 = vmatmul.mubr.msk.f32.vlgmr.msra.gmra.mxu1 %vm751_vm1, %v1780_v44  ;;  %v5216_v0 = vpop.f32.mrf.mxu1 }
 0x27b   : > { %1891 = vmatprep.mubr.f32.mxu1 %v6460_v30  ;;  %6556 = vst [vmem:[#allocation32_spill] sm:$0xff] %v5216_v0 }
 0x27e   : > { %4064 = vmatmul.mubr.msk.f32.gmra.mxu1 %vm751_vm1, %v1781_v32 }
 0x27f   : > { %1897 = vmatprep.mubr.f32.mxu1 %v6460_v30 }
 0x282   : > { %4065 = vmatmul.mubr.msk.f32.gmra.mxu1 %vm751_vm1, %v1782_v33 }
 0x283   : > { %1903 = vmatprep.mubr.f32.mxu1 %v6460_v30 }
 0x286   : > { %4066 = vmatmul.mubr.msk.f32.gmra.mxu1 %vm751_vm1, %v1783_v39 }
 0x33a   : > { %v1887_v13 = vpop.f32.mrf.mxu1 }
 0x33b   : > { %v1888_v50 = vadd.f32 %v1887_v13, %v1791_v14 }
 0x33c   : > { %v1889_v4 = vpop.f32.mrf.mxu1 }
 0x33d   : > { %v1890_v18 = vadd.f32 %v1889_v4, %v1791_v14 }
 0x33e   : > { %v1893_v54 = vpop.f32.mrf.mxu1 }
 0x33f   : > { %v1894_v55 = vadd.f32 %v1893_v54, %v1796_v51  ;;  %2101 = vmatprep.subr.mxu0 %v1890_v18 }
 0x340   : > { %v1895_v25 = vpop.f32.mrf.mxu1  ;;  %2102 = vmatpush1.msra.mxu0 %v1888_v50 }
 0x341   : > { %v1896_v42 = vadd.f32 %v1895_v25, %v1796_v51  ;;  %1910 = vxpose.xlu0.b32.start.end [1/1] (short) %v1894_v55, 128 }
 0x343   : > { %1942 = vxpose.xlu1.b32.start.end [1/1] (short) %v1896_v42, 128 }
 0x39d   : > { %1800 = vperm.xlu1 %4210, %v1786_v24  }
 0x3a1   : > { %1548 = vperm.xlu1 %4210, %v1534_v62  }
 0x3a6   : > { %1553 = vperm.xlu0 %4211, %v1535_v1  }
 0x3aa   : > { %1805 = vperm.xlu0 %4211, %v1787_v40  }
 0x3bd   : > { %v1926_v8 = vpop.trf.xlu0 }
 0x3be   : > { %4067 = vmatmul.mubr.msk.f32.vlgmr.msra.gmra.mxu0 %vm1974_vm14, %v1926_v8  ;;  %v5276_v8 = vpop.f32.mrf.mxu1 }
 0x3bf   : > { %2141 = vmatprep.mubr.f32.mxu0 %v6460_v30  ;;  %v1958_v9 = vpop.trf.xlu1  ;;  %6557 = vst [vmem:[#allocation33_spill] sm:$0xff] %v5276_v8 }
 0x3c1   : > { %v1927_v41 = vpop.trf.xlu0 }
 0x3c2   : > { %4068 = vmatmul.mubr.msk.f32.gmra.mxu0 %vm1974_vm14, %v1927_v41 }
 0x3c3   : > { %2147 = vmatprep.mubr.f32.mxu0 %v6460_v30  ;;  %v1959_v37 = vpop.trf.xlu1 }
 0x3c5   : > { %v1928_v11 = vpop.trf.xlu0 }
 0x3c6   : > { %4069 = vmatmul.mubr.msk.f32.gmra.mxu0 %vm1974_vm14, %v1928_v11 }
 0x3c7   : > { %2153 = vmatprep.mubr.f32.mxu0 %v6460_v30  ;;  %v1960_v3 = vpop.trf.xlu1 }
 0x3c9   : > { %v1929_v36 = vpop.trf.xlu0 }
 0x3ca   : > { %4070 = vmatmul.mubr.msk.f32.gmra.mxu0 %vm1974_vm14, %v1929_v36 }
 0x3cb   : > { %2159 = vmatprep.mubr.f32.mxu0 %v6460_v30  ;;  %v1961_v16 = vpop.trf.xlu1 }
 0x3cd   : > { %v1930_v2 = vpop.trf.xlu0 }
 0x3ce   : > { %4071 = vmatmul.mubr.msk.f32.gmra.mxu0 %vm1974_vm14, %v1930_v2 }
 0x3cf   : > { %2165 = vmatprep.mubr.f32.mxu0 %v6460_v30  ;;  %v1962_v19 = vpop.trf.xlu1 }
 0x3d1   : > { %v1931_v63 = vpop.trf.xlu0 }
 0x3d2   : > { %4072 = vmatmul.mubr.msk.f32.gmra.mxu0 %vm1974_vm14, %v1931_v63 }
 0x3d3   : > { %2171 = vmatprep.mubr.f32.mxu0 %v6460_v30  ;;  %v1963_v33 = vpop.trf.xlu1 }
 0x3d5   : > { %v1932_v15 = vpop.trf.xlu0 }
 0x3d6   : > { %4073 = vmatmul.mubr.msk.f32.gmra.mxu0 %vm1974_vm14, %v1932_v15 }
 0x3d7   : > { %2177 = vmatprep.mubr.f32.mxu0 %v6460_v30  ;;  %v1964_v51 = vpop.trf.xlu1 }
 0x3d9   : > { %v1933_v10 = vpop.trf.xlu0 }
 0x3da   : > { %4074 = vmatmul.mubr.msk.f32.gmra.mxu0 %vm1974_vm14, %v1933_v10 }
 0x3db   : > { %2183 = vmatprep.mubr.f32.mxu0 %v6460_v30  ;;  %v1965_v4 = vpop.trf.xlu1 }
 0x3dd   : > { %v1934_v44 = vpop.trf.xlu0 }
 0x3de   : > { %4075 = vmatmul.mubr.msk.f32.gmra.mxu0 %vm1974_vm14, %v1934_v44 }
 0x3df   : > { %2189 = vmatprep.mubr.f32.mxu0 %v6460_v30  ;;  %v1966_v50 = vpop.trf.xlu1 }
 0x3e1   : > { %v1935_v32 = vpop.trf.xlu0 }
 0x3e2   : > { %4076 = vmatmul.mubr.msk.f32.gmra.mxu0 %vm1974_vm14, %v1935_v32 }
 0x3e3   : > { %2195 = vmatprep.mubr.f32.mxu0 %v6460_v30  ;;  %v1967_v25 = vpop.trf.xlu1 }
 0x3e5   : > { %v1936_v39 = vpop.trf.xlu0 }
 0x3e6   : > { %4077 = vmatmul.mubr.msk.f32.gmra.mxu0 %vm1974_vm14, %v1936_v39 }
 0x3e7   : > { %2201 = vmatprep.mubr.f32.mxu0 %v6460_v30  ;;  %v1968_v42 = vpop.trf.xlu1 }
 0x3e9   : > { %v1937_v13 = vpop.trf.xlu0 }
 0x3ea   : > { %4078 = vmatmul.mubr.msk.f32.gmra.mxu0 %vm1974_vm14, %v1937_v13 }
 0x3eb   : > { %2207 = vmatprep.mubr.f32.mxu0 %v6460_v30  ;;  %v1969_v24 = vpop.trf.xlu1 }
 0x3ed   : > { %v1938_v14 = vpop.trf.xlu0 }
 0x3ee   : > { %4079 = vmatmul.mubr.msk.f32.gmra.mxu0 %vm1974_vm14, %v1938_v14 }
 0x3ef   : > { %2213 = vmatprep.mubr.f32.mxu0 %v6460_v30  ;;  %v1970_v62 = vpop.trf.xlu1 }
 0x3f1   : > { %v1939_v18 = vpop.trf.xlu0 }
 0x3f2   : > { %4080 = vmatmul.mubr.msk.f32.gmra.mxu0 %vm1974_vm14, %v1939_v18 }
 0x3f3   : > { %2219 = vmatprep.mubr.f32.mxu0 %v6460_v30  ;;  %v1971_v1 = vpop.trf.xlu1 }
 0x3f5   : > { %v1940_v54 = vpop.trf.xlu0 }
 0x3f6   : > { %4081 = vmatmul.mubr.msk.f32.gmra.mxu0 %vm1974_vm14, %v1940_v54 }
 0x3f7   : > { %2225 = vmatprep.mubr.f32.mxu0 %v6460_v30  ;;  %v1972_v40 = vpop.trf.xlu1 }
 0x3f9   : > { %v1941_v55 = vpop.trf.xlu0 }
 0x3fa   : > { %4082 = vmatmul.mubr.msk.f32.gmra.mxu0 %vm1974_vm14, %v1941_v55 }
 0x3fb   : > { %2231 = vmatprep.mubr.f32.mxu0 %v6460_v30  ;;  %v1973_v41 = vpop.trf.xlu1 }
 0x3fe   : > { %4083 = vmatmul.mubr.msk.f32.gmra.mxu0 %vm1974_vm14, %v1958_v9  ;;  %v1901_v9 = vpop.f32.mrf.mxu1 }
 0x3ff   : > { %2237 = vmatprep.mubr.f32.mxu0 %v6460_v30 }
 0x400   : > { %v5282_v11 = vpop.f32.mrf.mxu1 }
 0x401   : > { %6558 = vst [vmem:[#allocation34_spill] sm:$0xff] %v5282_v11 }
 0x402   : > { %4084 = vmatmul.mubr.msk.f32.gmra.mxu0 %vm1974_vm14, %v1959_v37  ;;  %v1907_v2 = vpop.f32.mrf.mxu1 }
 0x403   : > { %2243 = vmatprep.mubr.f32.mxu0 %v6460_v30 }
 0x406   : > { %4085 = vmatmul.mubr.msk.f32.gmra.mxu0 %vm1974_vm14, %v1960_v3 }
 0x407   : > { %2249 = vmatprep.mubr.f32.mxu0 %v6460_v30 }
 0x40a   : > { %4086 = vmatmul.mubr.msk.f32.gmra.mxu0 %vm1974_vm14, %v1961_v16 }
 0x40b   : > { %2255 = vmatprep.mubr.f32.mxu0 %v6460_v30 }
 0x40e   : > { %4087 = vmatmul.mubr.msk.f32.gmra.mxu0 %vm1974_vm14, %v1962_v19 }
 0x40f   : > { %2261 = vmatprep.mubr.f32.mxu0 %v6460_v30 }
 0x412   : > { %4088 = vmatmul.mubr.msk.f32.gmra.mxu0 %vm1974_vm14, %v1963_v33 }
 0x413   : > { %2267 = vmatprep.mubr.f32.mxu0 %v6460_v30 }
 0x416   : > { %4089 = vmatmul.mubr.msk.f32.gmra.mxu0 %vm1974_vm14, %v1964_v51 }
 0x417   : > { %2273 = vmatprep.mubr.f32.mxu0 %v6460_v30 }
 0x418   : > { %v5287_v37 = vpop.permute.xlu1 %1800 }
 0x419   : > { %6560 = vst [vmem:[#allocation36_spill] sm:$0xff] %v5287_v37  ;;  %v1902_v63 = vadd.f32 %v1901_v9, %v5287_v37 }
 0x41a   : > { %4090 = vmatmul.mubr.msk.f32.gmra.mxu0 %vm1974_vm14, %v1965_v4 }
 0x41b   : > { %2279 = vmatprep.mubr.f32.mxu0 %v6460_v30 }
 0x41e   : > { %4091 = vmatmul.mubr.msk.f32.gmra.mxu0 %vm1974_vm14, %v1966_v50 }
 0x41f   : > { %2285 = vmatprep.mubr.f32.mxu0 %v6460_v30 }
 0x421   : > { %v5284_v36 = vpop.permute.xlu0 %1553 }
 0x422   : > { %6559 = vst [vmem:[#allocation35_spill] sm:$0xff] %v5284_v36  ;;  %4092 = vmatmul.mubr.msk.f32.gmra.mxu0 %vm1974_vm14, %v1967_v25 }
 0x423   : > { %2291 = vmatprep.mubr.f32.mxu0 %v6460_v30 }
 0x425   : > { %v5290_v3 = vpop.permute.xlu0 %1805 }
 0x426   : > { %6561 = vst [vmem:[#allocation37_spill] sm:$0xff] %v5290_v3  ;;  %v1908_v15 = vadd.f32 %v1907_v2, %v5290_v3  ;;  %4093 = vmatmul.mubr.msk.f32.gmra.mxu0 %vm1974_vm14, %v1968_v42 }
 0x427   : > { %2297 = vmatprep.mubr.f32.mxu0 %v6460_v30 }
 0x428   : > { %v2735_v16 = vpack.c.bf16 %v1908_v15, %v1902_v63 }
 0x42a   : > { %4094 = vmatmul.mubr.msk.f32.gmra.mxu0 %vm1974_vm14, %v1969_v24  ;;  %2800 = vmatprep.mubr.bf16.mxu1 %v2735_v16 }
 0x42b   : > { %2303 = vmatprep.mubr.f32.mxu0 %v6460_v30 }
 0x42e   : > { %4095 = vmatmul.mubr.msk.f32.gmra.mxu0 %vm1974_vm14, %v1970_v62 }
 0x42f   : > { %2309 = vmatprep.mubr.f32.mxu0 %v6460_v30 }
 0x432   : > { %4096 = vmatmul.mubr.msk.f32.gmra.mxu0 %vm1974_vm14, %v1971_v1 }
 0x433   : > { %2315 = vmatprep.mubr.f32.mxu0 %v6460_v30 }
 0x436   : > { %4097 = vmatmul.mubr.msk.f32.gmra.mxu0 %vm1974_vm14, %v1972_v40 }
 0x437   : > { %2321 = vmatprep.mubr.f32.mxu0 %v6460_v30 }
 0x43a   : > { %4098 = vmatmul.mubr.msk.f32.gmra.mxu0 %vm1974_vm14, %v1973_v41 }
 0x47e   : > { %v5305_v10 = vpop.f32.mrf.mxu0 }
 0x480   : > { %v5307_v19 = vpop.f32.mrf.mxu0 }
 0x482   : > { %v5309_v44 = vpop.f32.mrf.mxu0 }
 0x484   : > { %v5311_v32 = vpop.f32.mrf.mxu0 }
 0x486   : > { %v5313_v33 = vpop.f32.mrf.mxu0 }
 0x487   : > { %v2328_v37 = vmax.f32 %v5305_v10, %v5313_v33 }
 0x488   : > { %v5315_v39 = vpop.f32.mrf.mxu0 }
 0x48a   : > { %v5317_v51 = vpop.f32.mrf.mxu0 }
 0x48b   : > { %v2329_v38 = vmax.f32 %v5309_v44, %v5317_v51 }
 0x48c   : > { %v5319_v13 = vpop.f32.mrf.mxu0 }
 0x48d   : > { %6562 = vst [vmem:[#allocation38_spill] sm:$0xff] %v5319_v13 }
 0x48e   : > { %v5321_v14 = vpop.f32.mrf.mxu0 }
 0x48f   : > { %v2330_v31 = vmax.f32 %v2328_v37, %v5321_v14 }
 0x490   : > { %v5323_v4 = vpop.f32.mrf.mxu0 }
 0x492   : > { %v5325_v18 = vpop.f32.mrf.mxu0 }
 0x493   : > { %v2331_v11 = vmax.f32 %v2329_v38, %v5325_v18 }
 0x494   : > { %v5327_v50 = vpop.f32.mrf.mxu0 }
 0x496   : > { %v5329_v54 = vpop.f32.mrf.mxu0 }
 0x497   : > { %v2332_v0 = vmax.f32 %v2330_v31, %v5329_v54 }
 0x498   : > { %v5331_v55 = vpop.f32.mrf.mxu0 }
 0x49a   : > { %v5333_v25 = vpop.f32.mrf.mxu0 }
 0x49b   : > { %v2333_v34 = vmax.f32 %v2331_v11, %v5333_v25 }
 0x49c   : > { %v5335_v42 = vpop.f32.mrf.mxu0 }
 0x49e   : > { %v5337_v24 = vpop.f32.mrf.mxu0 }
 0x49f   : > { %6563 = vst [vmem:[#allocation39_spill] sm:$0xff] %v5337_v24  ;;  %v2334_v17 = vmax.f32 %v2332_v0, %v5337_v24 }
 0x4a0   : > { %v5339_v62 = vpop.f32.mrf.mxu0 }
 0x4a2   : > { %v5341_v1 = vpop.f32.mrf.mxu0 }
 0x4a3   : > { %v2335_v28 = vmax.f32 %v2333_v34, %v5341_v1 }
 0x4a4   : > { %v5343_v40 = vpop.f32.mrf.mxu0 }
 0x4a6   : > { %v5345_v41 = vpop.f32.mrf.mxu0 }
 0x4a7   : > { %6564 = vst [vmem:[#allocation40_spill] sm:$0xff] %v5345_v41  ;;  %v2336_v49 = vmax.f32 %v2334_v17, %v5345_v41 }
 0x4a8   : > { %v5347_v9 = vpop.f32.mrf.mxu0 }
 0x4aa   : > { %v5349_v2 = vpop.f32.mrf.mxu0 }
 0x4ab   : > { %v2337_v37 = vmax.f32 %v2335_v28, %v5349_v2 }
 0x4ac   : > { %v5351_v63 = vpop.f32.mrf.mxu0 }
 0x4ae   : > { %v5353_v15 = vpop.f32.mrf.mxu0 }
 0x4af   : > { %6565 = vst [vmem:[#allocation41_spill] sm:$0xff] %v5353_v15  ;;  %v2338_v38 = vmax.f32 %v2336_v49, %v5353_v15 }
 0x4b0   : > { %v5355_v16 = vpop.f32.mrf.mxu0 }
 0x4b2   : > { %v5357_v30 = vpop.f32.mrf.mxu0 }
 0x4b3   : > { %v2339_v31 = vmax.f32 %v2337_v37, %v5357_v30  ;;  %v2366_v37 = vmax.f32 %v5311_v32, %v5319_v13 }
 0x4b4   : > { %v5359_v47 = vpop.f32.mrf.mxu0 }
 0x4b6   : > { %v5361_v48 = vpop.f32.mrf.mxu0 }
 0x4b7   : > { %v2340_v11 = vmax.f32 %v2338_v38, %v5361_v48 }
 0x4b8   : > { %v5363_v23 = vpop.f32.mrf.mxu0 }
 0x4ba   : > { %v5365_v45 = vpop.f32.mrf.mxu0 }
 0x4bb   : > { %6566 = vst [vmem:[#allocation42_spill] sm:$0xff] %v5365_v45  ;;  %v2341_v0 = vmax.f32 %v2339_v31, %v5365_v45 }
 0x4bc   : > { %v5367_v46 = vpop.f32.mrf.mxu0 }
 0x4be   : > { %v5369_v5 = vpop.f32.mrf.mxu0 }
 0x4bf   : > { %v2342_v34 = vmax.f32 %v2340_v11, %v5369_v5  ;;  %v2365_v11 = vmax.f32 %v5307_v19, %v5315_v39 }
 0x4c0   : > { %v5371_v60 = vpop.f32.mrf.mxu0 }
 0x4c2   : > { %v5373_v56 = vpop.f32.mrf.mxu0 }
 0x4c3   : > { %v2343_v17 = vmax.f32 %v2341_v0, %v5373_v56  ;;  %v2368_v0 = vmax.f32 %v2366_v37, %v5327_v50 }
 0x4c4   : > { %v5375_v57 = vpop.f32.mrf.mxu0 }
 0x4c5   : > { %v2370_v13 = vmax.f32 %v2368_v0, %v5335_v42 }
 0x4c6   : > { %v5377_v29 = vpop.f32.mrf.mxu0 }
 0x4c7   : > { %6567 = vst [vmem:[#allocation43_spill] sm:$0xff] %v5377_v29  ;;  %v2344_v28 = vmax.f32 %v2342_v34, %v5377_v29  ;;  %v2367_v29 = vmax.f32 %v2365_v11, %v5323_v4  ;;  %v2372_v37 = vmax.f32 %v2370_v13, %v5343_v40 }
 0x4c8   : > { %v5379_v7 = vpop.f32.mrf.mxu0 }
 0x4c9   : > { %v2374_v0 = vmax.f32 %v2372_v37, %v5351_v63 }
 0x4ca   : > { %v5381_v52 = vpop.f32.mrf.mxu0 }
 0x4cb   : > { %6568 = vst [vmem:[#allocation44_spill] sm:$0xff] %v5381_v52  ;;  %v2345_v49 = vmax.f32 %v2343_v17, %v5381_v52  ;;  %v2376_v13 = vmax.f32 %v2374_v0, %v5359_v47 }
 0x4cc   : > { %v5383_v53 = vpop.f32.mrf.mxu0 }
 0x4ce   : > { %v5385_v59 = vpop.f32.mrf.mxu0 }
 0x4cf   : > { %6569 = vst [vmem:[#allocation45_spill] sm:$0xff] %v5385_v59  ;;  %v2346_v38 = vmax.f32 %v2344_v28, %v5385_v59  ;;  %v2369_v59 = vmax.f32 %v2367_v29, %v5331_v55 }
 0x4d0   : > { %v5387_v26 = vpop.f32.mrf.mxu0 }
 0x4d1   : > { %v2371_v11 = vmax.f32 %v2369_v59, %v5339_v62  ;;  %v2378_v59 = vmax.f32 %v2376_v13, %v5367_v46 }
 0x4d2   : > { %v5389_v22 = vpop.f32.mrf.mxu0 }
 0x4d3   : > { %6570 = vst [vmem:[#allocation46_spill] sm:$0xff] %v5389_v22  ;;  %v2347_v31 = vmax.f32 %v2345_v49, %v5389_v22  ;;  %v2373_v29 = vmax.f32 %v2371_v11, %v5347_v9 }
 0x4d4   : > { %v5391_v21 = vpop.f32.mrf.mxu0 }
 0x4d6   : > { %v5393_v12 = vpop.f32.mrf.mxu0 }
 0x4d7   : > { %v2348_v34 = vmax.f32 %v2346_v38, %v5393_v12 }
 0x4d8   : > { %v5395_v20 = vpop.f32.mrf.mxu0 }
 0x4da   : > { %v5397_v27 = vpop.f32.mrf.mxu0 }
 0x4db   : > { %6571 = vst [vmem:[#allocation47_spill] sm:$0xff] %v5397_v27  ;;  %v2349_v17 = vmax.f32 %v2347_v31, %v5397_v27 }
 0x4dc   : > { %v5399_v35 = vpop.f32.mrf.mxu0 }
 0x4de   : > { %v5401_v8 = vpop.f32.mrf.mxu0 }
 0x4df   : > { %v2350_v28 = vmax.f32 %v2348_v34, %v5401_v8 }
 0x4e0   : > { %v5407_v43 = vpop.f32.mrf.mxu0 }
 0x4e2   : > { %v5411_v3 = vpop.f32.mrf.mxu0 }
 0x4e3   : > { %6572 = vst [vmem:[#allocation48_spill] sm:$0xff] %v5411_v3  ;;  %v2351_v49 = vmax.f32 %v2349_v17, %v5411_v3 }
 0x4e4   : > { %v5415_v6 = vpop.f32.mrf.mxu0 }
 0x4e6   : > { %v5419_v61 = vpop.f32.mrf.mxu0 }
 0x4e7   : > { %6573 = vst [vmem:[#allocation49_spill] sm:$0xff] %v5419_v61  ;;  %v2352_v38 = vmax.f32 %v2350_v28, %v5419_v61 }
 0x4e8   : > { %v5423_v58 = vpop.f32.mrf.mxu0 }
 0x4ea   : > { %v5427_v36 = vpop.f32.mrf.mxu0 }
 0x4eb   : > { %6574 = vst [vmem:[#allocation50_spill] sm:$0xff] %v5427_v36  ;;  %v2353_v31 = vmax.f32 %v2351_v49, %v5427_v36  ;;  %v2375_v36 = vmax.f32 %v2373_v29, %v5355_v16 }
 0x4ec   : > { %v5431_v24 = vpop.f32.mrf.mxu0 }
 0x4ed   : > { %v2377_v37 = vmax.f32 %v2375_v36, %v5363_v23 }
 0x4ee   : > { %v5435_v41 = vpop.f32.mrf.mxu0 }
 0x4ef   : > { %6575 = vst [vmem:[#allocation51_spill] sm:$0xff] %v5435_v41  ;;  %v2354_v34 = vmax.f32 %v2352_v38, %v5435_v41  ;;  %v2380_v38 = vmax.f32 %v2378_v59, %v5375_v57 }
 0x4f0   : > { %v5439_v15 = vpop.f32.mrf.mxu0 }
 0x4f1   : > { %v2382_v11 = vmax.f32 %v2380_v38, %v5383_v53 }
 0x4f2   : > { %v5445_v45 = vpop.f32.mrf.mxu0 }
 0x4f3   : > { %6576 = vst [vmem:[#allocation52_spill] sm:$0xff] %v5445_v45  ;;  %v2355_v17 = vmax.f32 %v2353_v31, %v5445_v45  ;;  %v2379_v45 = vmax.f32 %v2377_v37, %v5371_v60 }
 0x4f4   : > { %v5452_v52 = vpop.f32.mrf.mxu0 }
 0x4f5   : > { %v2381_v0 = vmax.f32 %v2379_v45, %v5379_v7 }
 0x4f6   : > { %v5458_v22 = vpop.f32.mrf.mxu0 }
 0x4f7   : > { %v2356_v28 = vmax.f32 %v2354_v34, %v5458_v22  ;;  %v2384_v34 = vmax.f32 %v2382_v11, %v5391_v21  ;;  %v2383_v29 = vmax.f32 %v2381_v0, %v5387_v26 }
 0x4f8   : > { %v5464_v27 = vpop.f32.mrf.mxu0 }
 0x4f9   : > { %v2386_v13 = vmax.f32 %v2384_v34, %v5399_v35  ;;  %v2385_v36 = vmax.f32 %v2383_v29, %v5395_v20 }
 0x4fa   : > { %v5470_v3 = vpop.f32.mrf.mxu0 }
 0x4fb   : > { %v2357_v49 = vmax.f32 %v2355_v17, %v5470_v3  ;;  %v2387_v37 = vmax.f32 %v2385_v36, %v5407_v43 }
 0x4fd   : > { %v2358_v61 = vmax.f32 %v2356_v28, %v2357_v49  ;;  %v2388_v49 = vmax.f32 %v2386_v13, %v5415_v6  ;;  %v2389_v45 = vmax.f32 %v2387_v37, %v5423_v58 }
 0x4ff   : > { %v2359_v31 = vrot.slane %v2358_v61, 4  ;;  %v2390_v38 = vmax.f32 %v2388_v49, %v5431_v24  ;;  %v2391_v0 = vmax.f32 %v2389_v45, %v5439_v15 }
 0x501   : > { %v2360_v41 = vmax.f32 %v2358_v61, %v2359_v31  ;;  %v5490_v61 = vpop.f32.mrf.mxu0  ;;  %v2392_v31 = vmax.f32 %v2390_v38, %v5452_v52  ;;  %v2393_v34 = vmax.f32 %v2391_v0, %v5464_v27 }
 0x503   : > { %v2361_v17 = vrot.slane %v2360_v41, 2 }
 0x505   : > { %v2362_v28 = vmax.f32 %v2360_v41, %v2361_v17  ;;  %v2394_v41 = vmax.f32 %v2392_v31, %v5490_v61 }
 0x507   : > { %v2363_v59 = vrot.slane %v2362_v28, 1  ;;  %v2395_v36 = vmax.f32 %v2393_v34, %v2394_v41 }
 0x509   : > { %v5494_v11 = vmax.f32 %v2362_v28, %v2363_v59  ;;  %v2396_v45 = vrot.slane %v2395_v36, 4 }
 0x50b   : > { %v2402_v17 = vsub.f32 %v5305_v10, %v5494_v11  ;;  %v2404_v29 = vsub.f32 %v5309_v44, %v5494_v11  ;;  %v2406_v13 = vsub.f32 %v5313_v33, %v5494_v11  ;;  %v2408_v28 = vsub.f32 %v5317_v51, %v5494_v11 }
 0x50c   : > { %v2410_v37 = vsub.f32 %v5321_v14, %v5494_v11  ;;  %v2412_v10 = vsub.f32 %v5325_v18, %v5494_v11  ;;  %v2414_v33 = vsub.f32 %v5329_v54, %v5494_v11  ;;  %v2397_v0 = vmax.f32 %v2395_v36, %v2396_v45  ;;  %v6577_v14 = vld [vmem:[#allocation39_spill] sm:$0xff]  ;;  %v6578_v54 = vld [vmem:[#allocation40_spill] sm:$0xff]  ;;  %v6581_v45 = vld [vmem:[#allocation41_spill] sm:$0xff] }
 0x50d   : > { %v2466_v49 = vmul.f32 1.442695, %v2402_v17  ;;  %v2470_v59 = vmul.f32 1.442695, %v2404_v29  ;;  %v2474_v38 = vmul.f32 1.442695, %v2406_v13  ;;  %v2416_v51 = vsub.f32 %v5333_v25, %v5494_v11 }
 0x50e   : > { %v2478_v44 = vmul.f32 1.442695, %v2408_v28  ;;  %v2482_v31 = vmul.f32 1.442695, %v2410_v37  ;;  %v2486_v41 = vmul.f32 1.442695, %v2412_v10  ;;  %v2418_v34 = vsub.f32 %v6577_v14, %v5494_v11 }
 0x50f   : > { %4250 = vpow2.f32 %v2466_v49  ;;  %v2490_v17 = vmul.f32 1.442695, %v2414_v33  ;;  %v2398_v29 = vrot.slane %v2397_v0, 2  ;;  %v2420_v18 = vsub.f32 %v5341_v1, %v5494_v11 }
 0x510   : > { %4252 = vpow2.f32 %v2470_v59  ;;  %v2494_v13 = vmul.f32 1.442695, %v2416_v51  ;;  %v2422_v28 = vsub.f32 %v6578_v54, %v5494_v11  ;;  %v2498_v36 = vmul.f32 1.442695, %v2418_v34 }
 0x511   : > { %4254 = vpow2.f32 %v2474_v38  ;;  %v2399_v49 = vmax.f32 %v2397_v0, %v2398_v29  ;;  %v2424_v59 = vsub.f32 %v5349_v2, %v5494_v11  ;;  %v2502_v37 = vmul.f32 1.442695, %v2420_v18 }
 0x512   : > { %4256 = vpow2.f32 %v2478_v44  ;;  %v2426_v1 = vsub.f32 %v6581_v45, %v5494_v11  ;;  %v2506_v10 = vmul.f32 1.442695, %v2422_v28  ;;  %v2428_v0 = vsub.f32 %v5357_v30, %v5494_v11 }
 0x513   : > { %4258 = vpow2.f32 %v2482_v31  ;;  %v2400_v31 = vrot.slane %v2399_v49, 1  ;;  %v2510_v2 = vmul.f32 1.442695, %v2424_v59  ;;  %v2430_v14 = vsub.f32 %v5361_v48, %v5494_v11 }
 0x514   : > { %4260 = vpow2.f32 %v2486_v41  ;;  %v2514_v34 = vmul.f32 1.442695, %v2426_v1  ;;  %v2518_v54 = vmul.f32 1.442695, %v2428_v0  ;;  %v2434_v48 = vsub.f32 %v5369_v5, %v5494_v11 }
 0x515   : > { %4262 = vpow2.f32 %v2490_v17  ;;  %v5543_v18 = vmax.f32 %v2399_v49, %v2400_v31  ;;  %v2436_v59 = vsub.f32 %v5373_v56, %v5494_v11  ;;  %v6585_v56 = vld [vmem:[#allocation43_spill] sm:$0xff] }
 0x516   : > { %4264 = vpow2.f32 %v2494_v13  ;;  %v6584_v13 = vld [vmem:[#allocation42_spill] sm:$0xff]  ;;  %v2438_v0 = vsub.f32 %v6585_v56, %v5494_v11 }
 0x517   : > { %4266 = vpow2.f32 %v2498_v36  ;;  %v2432_v30 = vsub.f32 %v6584_v13, %v5494_v11  ;;  %v2403_v1 = vsub.f32 %v5307_v19, %v5543_v18  ;;  %v2405_v31 = vsub.f32 %v5311_v32, %v5543_v18 }
 0x518   : > { %4268 = vpow2.f32 %v2502_v37  ;;  %v2522_v37 = vmul.f32 1.442695, %v2430_v14  ;;  %v2407_v19 = vsub.f32 %v5315_v39, %v5543_v18  ;;  %v2538_v39 = vmul.f32 1.442695, %v2438_v0 }
 0x519   : > { %4270 = vpow2.f32 %v2506_v10  ;;  %v2526_v10 = vmul.f32 1.442695, %v2432_v30  ;;  %v2468_v30 = vmul.f32 1.442695, %v2403_v1  ;;  %v2411_v1 = vsub.f32 %v5323_v4, %v5543_v18 }
 0x51a   : > { %4272 = vpow2.f32 %v2510_v2  ;;  %v2530_v2 = vmul.f32 1.442695, %v2434_v48  ;;  %v2472_v48 = vmul.f32 1.442695, %v2405_v31  ;;  %v2446_v4 = vsub.f32 %v5393_v12, %v5494_v11 }
 0x51b   : > { %4274 = vpow2.f32 %v2514_v34  ;;  %v2417_v12 = vsub.f32 %v5335_v42, %v5543_v18  ;;  %v6591_v42 = vld [vmem:[#allocation48_spill] sm:$0xff] }
 0x51c   : > { %v5521_v25 = vpop.eup %4250  ;;  %4276 = vpow2.f32 %v2518_v54  ;;  %v6587_v54 = vld [vmem:[#allocation38_spill] sm:$0xff] }
 0x51d   : > { %6579 = vst [vmem:[#allocation39_spill] sm:$0xff] %v5521_v25  ;;  %v5525_v38 = vpop.eup %4252  ;;  %4278 = vpow2.f32 %v2522_v37 }
 0x51e   : > { %6580 = vst [vmem:[#allocation40_spill] sm:$0xff] %v5525_v38  ;;  %v2594_v44 = vadd.f32 %v5525_v38, %v5521_v25  ;;  %v5531_v33 = vpop.eup %4254  ;;  %4280 = vpow2.f32 %v2526_v10  ;;  %v2476_v10 = vmul.f32 1.442695, %v2407_v19 }
 0x51f   : > { %6582 = vst [vmem:[#allocation41_spill] sm:$0xff] %v5531_v33  ;;  %v5536_v41 = vpop.eup %4256  ;;  %4282 = vpow2.f32 %v2530_v2  ;;  %v2413_v2 = vsub.f32 %v5327_v50, %v5543_v18  ;;  %v6590_v50 = vld [vmem:[#allocation47_spill] sm:$0xff] }
 0x520   : > { %v2595_v51 = vadd.f32 %v5531_v33, %v2594_v44  ;;  %6583 = vst [vmem:[#allocation53_spill] sm:$0xff] %v5536_v41  ;;  %v5541_v29 = vpop.eup %4258 }
 0x521   : > { %v5548_v36 = vpop.eup %4260 }
 0x522   : > { %v2596_v17 = vadd.f32 %v5536_v41, %v2595_v51  ;;  %v5555_v45 = vpop.eup %4262  ;;  %v2534_v51 = vmul.f32 1.442695, %v2436_v59  ;;  %v6588_v59 = vld [vmem:[#allocation45_spill] sm:$0xff] }
 0x523   : > { %v5562_v5 = vpop.eup %4264 }
 0x524   : > { %v2597_v28 = vadd.f32 %v5541_v29, %v2596_v17  ;;  %v5569_v34 = vpop.eup %4266  ;;  %v6586_v17 = vld [vmem:[#allocation44_spill] sm:$0xff]  ;;  %4284 = vpow2.f32 %v2534_v51 }
 0x525   : > { %v2440_v13 = vsub.f32 %v6586_v17, %v5494_v11  ;;  %v5576_v37 = vpop.eup %4268  ;;  %4286 = vpow2.f32 %v2468_v30  ;;  %v2484_v30 = vmul.f32 1.442695, %v2411_v1  ;;  %v2554_v1 = vmul.f32 1.442695, %v2446_v4 }
 0x526   : > { %v2598_v49 = vadd.f32 %v5548_v36, %v2597_v28  ;;  %v2409_v28 = vsub.f32 %v6587_v54, %v5543_v18  ;;  %v5583_v56 = vpop.eup %4270  ;;  %4288 = vpow2.f32 %v2472_v48  ;;  %v2448_v48 = vsub.f32 %v6590_v50, %v5494_v11 }
 0x527   : > { %v2542_v31 = vmul.f32 1.442695, %v2440_v13  ;;  %v5590_v51 = vpop.eup %4272  ;;  %4290 = vpow2.f32 %v2538_v39  ;;  %v2415_v13 = vsub.f32 %v5331_v55, %v5543_v18  ;;  %v2450_v55 = vsub.f32 %v5401_v8, %v5494_v11 }
 0x528   : > { %v2599_v44 = vadd.f32 %v5555_v45, %v2598_v49  ;;  %v2442_v49 = vsub.f32 %v6588_v59, %v5494_v11  ;;  %v2480_v0 = vmul.f32 1.442695, %v2409_v28  ;;  %4292 = vpow2.f32 %v2476_v10  ;;  %v5597_v59 = vpop.eup %4274 }
 0x529   : > { %4294 = vpow2.f32 %v2542_v31  ;;  %v5604_v39 = vpop.eup %4276  ;;  %v2421_v8 = vsub.f32 %v5343_v40, %v5543_v18  ;;  %v2496_v4 = vmul.f32 1.442695, %v2417_v12  ;;  %v6595_v40 = vld [vmem:[#allocation50_spill] sm:$0xff] }
 0x52a   : > { %v2600_v14 = vadd.f32 %v5562_v5, %v2599_v44  ;;  %v2546_v19 = vmul.f32 1.442695, %v2442_v49  ;;  %4296 = vpow2.f32 %v2480_v0  ;;  %v2488_v49 = vmul.f32 1.442695, %v2413_v2  ;;  %v5611_v31 = vpop.eup %4278 }
 0x52b   : > { %v2558_v2 = vmul.f32 1.442695, %v2448_v48  ;;  %v2423_v48 = vsub.f32 %v5347_v9, %v5543_v18  ;;  %v2456_v12 = vsub.f32 %v6595_v40, %v5494_v11  ;;  %v6598_v9 = vld [vmem:[#allocation51_spill] sm:$0xff] }
 0x52c   : > { %v2601_v32 = vadd.f32 %v5569_v34, %v2600_v14  ;;  %v6589_v14 = vld [vmem:[#allocation46_spill] sm:$0xff]  ;;  %4298 = vpow2.f32 %v2546_v19  ;;  %v5618_v19 = vpop.eup %4280 }
 0x52d   : > { %v2444_v17 = vsub.f32 %v6589_v14, %v5494_v11  ;;  %v2419_v14 = vsub.f32 %v5339_v62, %v5543_v18  ;;  %4300 = vpow2.f32 %v2484_v30  ;;  %v6592_v62 = vld [vmem:[#allocation49_spill] sm:$0xff]  ;;  %v5622_v30 = vpop.eup %4282 }
 0x52e   : > { %v2602_v44 = vadd.f32 %v5576_v37, %v2601_v32  ;;  %6593 = vst [vmem:[#allocation42_spill] sm:$0xff] %v5622_v30 }
 0x52f   : > { %v2550_v28 = vmul.f32 1.442695, %v2444_v17  ;;  %v2492_v17 = vmul.f32 1.442695, %v2415_v13  ;;  %v2562_v13 = vmul.f32 1.442695, %v2450_v55 }
 0x530   : > { %v2603_v54 = vadd.f32 %v5583_v56, %v2602_v44 }
 0x531   : > { %4302 = vpow2.f32 %v2550_v28  ;;  %v2500_v28 = vmul.f32 1.442695, %v2419_v14  ;;  %v2458_v14 = vsub.f32 %v6598_v9, %v5494_v11 }
 0x532   : > { %v2604_v32 = vadd.f32 %v5590_v51, %v2603_v54  ;;  %v2452_v54 = vsub.f32 %v6591_v42, %v5494_v11  ;;  %4304 = vpow2.f32 %v2488_v49  ;;  %v2504_v42 = vmul.f32 1.442695, %v2421_v8 }
 0x533   : > { %4306 = vpow2.f32 %v2554_v1  ;;  %v2425_v1 = vsub.f32 %v5351_v63, %v5543_v18 }
 0x534   : > { %v2605_v44 = vadd.f32 %v5597_v59, %v2604_v32  ;;  %v2454_v32 = vsub.f32 %v6592_v62, %v5494_v11  ;;  %4308 = vpow2.f32 %v2492_v17  ;;  %v2566_v49 = vmul.f32 1.442695, %v2452_v54 }
 0x535   : > { %4310 = vpow2.f32 %v2558_v2  ;;  %v2427_v2 = vsub.f32 %v5355_v16, %v5543_v18 }
 0x536   : > { %v2606_v10 = vadd.f32 %v5604_v39, %v2605_v44  ;;  %v5627_v44 = vpop.eup %4284  ;;  %4312 = vpow2.f32 %v2496_v4  ;;  %v2570_v17 = vmul.f32 1.442695, %v2454_v32  ;;  %v6599_v4 = vld [vmem:[#allocation52_spill] sm:$0xff]  ;;  %v2429_v32 = vsub.f32 %v5359_v47, %v5543_v18 }
 0x537   : > { %6594 = vst [vmem:[#allocation43_spill] sm:$0xff] %v5627_v44  ;;  %4314 = vpow2.f32 %v2562_v13  ;;  %v2460_v40 = vsub.f32 %v6599_v4, %v5494_v11  ;;  %v2574_v13 = vmul.f32 1.442695, %v2456_v12  ;;  %v2578_v4 = vmul.f32 1.442695, %v2458_v14 }
 0x538   : > { %v2607_v0 = vadd.f32 %v5611_v31, %v2606_v10  ;;  %v5631_v10 = vpop.eup %4286  ;;  %4316 = vpow2.f32 %v2500_v28  ;;  %v2512_v28 = vmul.f32 1.442695, %v2425_v1  ;;  %v2431_v12 = vsub.f32 %v5363_v23, %v5543_v18 }
 0x539   : > { %6596 = vst [vmem:[#allocation44_spill] sm:$0xff] %v5631_v10  ;;  %4318 = vpow2.f32 %v2566_v49  ;;  %v2433_v14 = vsub.f32 %v5367_v46, %v5543_v18 }
 0x53a   : > { %v2608_v50 = vadd.f32 %v5618_v19, %v2607_v0  ;;  %v5636_v0 = vpop.eup %4288  ;;  %4320 = vpow2.f32 %v2504_v42  ;;  %v2524_v46 = vmul.f32 1.442695, %v2431_v12  ;;  %v2439_v12 = vsub.f32 %v5379_v7, %v5543_v18 }
 0x53b   : > { %6597 = vst [vmem:[#allocation38_spill] sm:$0xff] %v5636_v0  ;;  %v5642_v54 = vpop.eup %4290  ;;  %v2631_v63 = vadd.f32 %v5636_v0, %v5631_v10  ;;  %4322 = vpow2.f32 %v2570_v17 }
 0x53c   : > { %v2609_v55 = vadd.f32 %v5622_v30, %v2608_v50  ;;  %v2508_v50 = vmul.f32 1.442695, %v2423_v48  ;;  %v5647_v8 = vpop.eup %4292 }
 0x53d   : > { %v5653_v16 = vpop.eup %4294  ;;  %v2632_v48 = vadd.f32 %v5647_v8, %v2631_v63  ;;  %v2464_v63 = vsub.f32 %v5470_v3, %v5494_v11  ;;  %v2435_v3 = vsub.f32 %v5371_v60, %v5543_v18  ;;  %v2528_v60 = vmul.f32 1.442695, %v2433_v14 }
 0x53e   : > { %v2610_v62 = vadd.f32 %v5627_v44, %v2609_v55  ;;  %v5657_v55 = vpop.eup %4296  ;;  %v2462_v44 = vsub.f32 %v5458_v22, %v5494_v11  ;;  %4324 = vpow2.f32 %v2508_v50  ;;  %v2582_v22 = vmul.f32 1.442695, %v2460_v40 }
 0x53f   : > { %6600 = vst [vmem:[#allocation45_spill] sm:$0xff] %v5657_v55  ;;  %v5663_v49 = vpop.eup %4298  ;;  %v2633_v1 = vadd.f32 %v5657_v55, %v2632_v48  ;;  %4326 = vpow2.f32 %v2574_v13  ;;  %v2441_v14 = vsub.f32 %v5383_v53, %v5543_v18 }
 0x540   : > { %v2611_v9 = vadd.f32 %v5642_v54, %v2610_v62  ;;  %v2516_v62 = vmul.f32 1.442695, %v2427_v2  ;;  %v5667_v42 = vpop.eup %4300  ;;  %4328 = vpow2.f32 %v2512_v28  ;;  %v2586_v48 = vmul.f32 1.442695, %v2462_v44 }
 0x541   : > { %v5673_v17 = vpop.eup %4302  ;;  %v2634_v2 = vadd.f32 %v5667_v42, %v2633_v1  ;;  %4330 = vpow2.f32 %v2578_v4  ;;  %v2437_v28 = vsub.f32 %v5375_v57, %v5543_v18  ;;  %v2532_v57 = vmul.f32 1.442695, %v2435_v3 }
 0x542   : > { %v2612_v47 = vadd.f32 %v5653_v16, %v2611_v9  ;;  %v2520_v9 = vmul.f32 1.442695, %v2429_v32  ;;  %v5677_v50 = vpop.eup %4304  ;;  %4332 = vpow2.f32 %v2516_v62  ;;  %v2590_v32 = vmul.f32 1.442695, %v2464_v63 }
 0x543   : > { %v5681_v11 = vpop.eup %4306  ;;  %v2635_v13 = vadd.f32 %v5677_v50, %v2634_v2  ;;  %4334 = vpow2.f32 %v2582_v22  ;;  %v2536_v7 = vmul.f32 1.442695, %v2437_v28  ;;  %v2443_v3 = vsub.f32 %v5387_v26, %v5543_v18 }
 0x544   : > { %v2613_v23 = vadd.f32 %v5663_v49, %v2612_v47  ;;  %v5685_v47 = vpop.eup %4308  ;;  %4336 = vpow2.f32 %v2520_v9  ;;  %v2445_v28 = vsub.f32 %v5391_v21, %v5543_v18 }
 0x545   : > { %v5689_v4 = vpop.eup %4310  ;;  %v2636_v1 = vadd.f32 %v5685_v47, %v2635_v13  ;;  %4338 = vpow2.f32 %v2586_v48 }
 0x546   : > { %v2614_v40 = vadd.f32 %v5673_v17, %v2613_v23  ;;  %v5693_v23 = vpop.eup %4312  ;;  %4340 = vpow2.f32 %v2524_v46 }
 0x547   : > { %v5697_v62 = vpop.eup %4314  ;;  %v2637_v22 = vadd.f32 %v5693_v23, %v2636_v1  ;;  %4342 = vpow2.f32 %v2590_v32 }
 0x548   : > { %v2615_v44 = vadd.f32 %v5681_v11, %v2614_v40  ;;  %v5701_v2 = vpop.eup %4316  ;;  %4344 = vpow2.f32 %v2528_v60 }
 0x549   : > { %v5705_v9 = vpop.eup %4318  ;;  %v2638_v40 = vadd.f32 %v5701_v2, %v2637_v22  ;;  %4346 = vpow2.f32 %v2532_v57  ;;  %v2544_v22 = vmul.f32 1.442695, %v2441_v14  ;;  %v2449_v14 = vsub.f32 %v5399_v35, %v5543_v18 }
 0x54a   : > { %v2616_v63 = vadd.f32 %v5689_v4, %v2615_v44  ;;  %v5709_v13 = vpop.eup %4320  ;;  %v2540_v44 = vmul.f32 1.442695, %v2439_v12  ;;  %4348 = vpow2.f32 %v2536_v7  ;;  %v2447_v12 = vsub.f32 %v5395_v20, %v5543_v18 }
 0x54b   : > { %v5713_v46 = vpop.eup %4322  ;;  %v2639_v53 = vadd.f32 %v5709_v13, %v2638_v40  ;;  %v2548_v40 = vmul.f32 1.442695, %v2443_v3  ;;  %v2451_v3 = vsub.f32 %v5407_v43, %v5543_v18 }
 0x54c   : > { %v2617_v48 = vadd.f32 %v5697_v62, %v2616_v63  ;;  %v5717_v1 = vpop.eup %4324  ;;  %4350 = vpow2.f32 %v2540_v44 }
 0x54d   : > { %v5721_v60 = vpop.eup %4326  ;;  %v2640_v26 = vadd.f32 %v5717_v1, %v2639_v53  ;;  %4352 = vpow2.f32 %v2544_v22  ;;  %v2552_v53 = vmul.f32 1.442695, %v2445_v28  ;;  %v2453_v28 = vsub.f32 %v5415_v6, %v5543_v18 }
 0x54e   : > { %v2618_v32 = vadd.f32 %v5705_v9, %v2617_v48  ;;  %v5725_v30 = vpop.eup %4328  ;;  %4354 = vpow2.f32 %v2548_v40 }
 0x54f   : > { %v5729_v57 = vpop.eup %4330  ;;  %v2641_v21 = vadd.f32 %v5725_v30, %v2640_v26  ;;  %v2556_v26 = vmul.f32 1.442695, %v2447_v12  ;;  %4356 = vpow2.f32 %v2552_v53  ;;  %v2455_v12 = vsub.f32 %v5423_v58, %v5543_v18 }
 0x550   : > { %v2619_v63 = vadd.f32 %v5713_v46, %v2618_v32  ;;  %v5733_v38 = vpop.eup %4332  ;;  %v2459_v58 = vsub.f32 %v5439_v15, %v5543_v18  ;;  %v2463_v15 = vsub.f32 %v5464_v27, %v5543_v18 }
 0x551   : > { %v5737_v7 = vpop.eup %4334  ;;  %v2642_v20 = vadd.f32 %v5733_v38, %v2641_v21  ;;  %v2560_v21 = vmul.f32 1.442695, %v2449_v14  ;;  %4358 = vpow2.f32 %v2556_v26  ;;  %v2568_v14 = vmul.f32 1.442695, %v2453_v28 }
 0x552   : > { %v2620_v48 = vadd.f32 %v5721_v60, %v2619_v63  ;;  %v5741_v25 = vpop.eup %4336  ;;  %v2588_v27 = vmul.f32 1.442695, %v2463_v15 }
 0x553   : > { %v5745_v44 = vpop.eup %4338  ;;  %v2643_v35 = vadd.f32 %v5741_v25, %v2642_v20  ;;  %4360 = vpow2.f32 %v2560_v21 }
 0x554   : > { %v2621_v32 = vadd.f32 %v5729_v57, %v2620_v48  ;;  %v5749_v0 = vpop.eup %4340 }
 0x555   : > { %v5753_v22 = vpop.eup %4342  ;;  %v2644_v43 = vadd.f32 %v5749_v0, %v2643_v35 }
 0x556   : > { %v2622_v63 = vadd.f32 %v5737_v7, %v2621_v32  ;;  %v5757_v10 = vpop.eup %4344  ;;  %v2564_v32 = vmul.f32 1.442695, %v2451_v3  ;;  %v2572_v3 = vmul.f32 1.442695, %v2455_v12  ;;  %v2580_v12 = vmul.f32 1.442695, %v2459_v58 }
 0x557   : > { %v2645_v20 = vadd.f32 %v5757_v10, %v2644_v43  ;;  %v5763_v6 = vpop.eup %4346 }
 0x558   : > { %v2623_v48 = vadd.f32 %v5745_v44, %v2622_v63  ;;  %6601 = vst [vmem:[#allocation46_spill] sm:$0xff] %v5763_v6  ;;  %v2457_v63 = vsub.f32 %v5431_v24, %v5543_v18  ;;  %v5768_v41 = vpop.eup %4348  ;;  %4362 = vpow2.f32 %v2564_v32  ;;  %v2461_v24 = vsub.f32 %v5452_v52, %v5543_v18 }
 0x559   : > { %v2646_v35 = vadd.f32 %v5763_v6, %v2645_v20  ;;  %6602 = vst [vmem:[#allocation47_spill] sm:$0xff] %v5768_v41  ;;  %v5773_v43 = vpop.eup %4350  ;;  %4364 = vpow2.f32 %v2568_v14  ;;  %v2465_v52 = vsub.f32 %v5490_v61, %v5543_v18 }
 0x55a   : > { %v2624_v40 = vadd.f32 %v5753_v22, %v2623_v48  ;;  %v2576_v28 = vmul.f32 1.442695, %v2457_v63  ;;  %v5778_v20 = vpop.eup %4352  ;;  %4366 = vpow2.f32 %v2572_v3 }
 0x55b   : > { %v2647_v26 = vadd.f32 %v5768_v41, %v2646_v35  ;;  %v2584_v35 = vmul.f32 1.442695, %v2461_v24 }
 0x55c   : > { %v2625_v53 = vrot.slane %v2624_v40, 4  ;;  %4368 = vpow2.f32 %v2576_v28 }
 0x55d   : > { %v2648_v21 = vadd.f32 %v5773_v43, %v2647_v26  ;;  %4370 = vpow2.f32 %v2580_v12 }
 0x55e   : > { %v2626_v48 = vadd.f32 %v2625_v53, %v2624_v40  ;;  %v5783_v53 = vpop.eup %4354  ;;  %4372 = vpow2.f32 %v2584_v35 }
 0x55f   : > { %v2649_v32 = vadd.f32 %v5778_v20, %v2648_v21  ;;  %v5788_v14 = vpop.eup %4356 }
 0x560   : > { %v2627_v33 = vrot.slane %v2626_v48, 2  ;;  %v5791_v58 = vpop.eup %4358 }
 0x561   : > { %v2650_v63 = vadd.f32 %v5783_v53, %v2649_v32  ;;  %v5794_v24 = vpop.eup %4360 }
 0x562   : > { %v2628_v40 = vadd.f32 %v2627_v33, %v2626_v48  ;;  %v2592_v48 = vmul.f32 1.442695, %v2465_v52 }
 0x563   : > { %v2651_v33 = vadd.f32 %v5788_v14, %v2650_v63 }
 0x564   : > { %v2629_v41 = vrot.slane %v2628_v40, 1 }
 0x565   : > { %v2652_v3 = vadd.f32 %v5791_v58, %v2651_v33  ;;  %v5797_v18 = vpop.eup %4362 }
 0x566   : > { %v2630_v26 = vadd.f32 %v2629_v41, %v2628_v40  ;;  %v5800_v28 = vpop.eup %4364 }
 0x567   : > { %v2653_v61 = vadd.f32 %v5794_v24, %v2652_v3  ;;  %v5803_v15 = vpop.eup %4366 }
 0x568   : > { %4374 = vrcp.f32 %v2630_v26 }
 0x569   : > { %4376 = vpow2.f32 %v2588_v27  ;;  %v2654_v41 = vadd.f32 %v5797_v18, %v2653_v61  ;;  %v5806_v12 = vpop.eup %4368 }
 0x56a   : > { %4378 = vpow2.f32 %v2592_v48  ;;  %v4371_v35 = vpop.eup %4370 }
 0x56b   : > { %v2655_v21 = vadd.f32 %v5800_v28, %v2654_v41  ;;  %v4373_v52 = vpop.eup %4372 }
 0x56d   : > { %v2656_v40 = vadd.f32 %v5803_v15, %v2655_v21 }
 0x56f   : > { %v2657_v32 = vadd.f32 %v5806_v12, %v2656_v40 }
 0x571   : > { %v2658_v63 = vadd.f32 %v4371_v35, %v2657_v32 }
 0x573   : > { %v2659_v27 = vadd.f32 %v4373_v52, %v2658_v63 }
 0x575   : > { %v5809_v26 = vpop.eup %4374 }
 0x576   : > { %v2698_v33 = vmul.f32 %v5809_v26, %v5611_v31  ;;  %v2700_v48 = vmul.f32 %v5809_v26, %v5618_v19  ;;  %v4377_v3 = vpop.eup %4376  ;;  %v5817_v40 = vmul.f32 %v5809_v26, %v5745_v44  ;;  %v5821_v32 = vmul.f32 %v5809_v26, %v5753_v22 }
 0x577   : > { %v2660_v61 = vadd.f32 %v4377_v3, %v2659_v27  ;;  %v4379_v21 = vpop.eup %4378  ;;  %v5825_v31 = vmul.f32 %v5809_v26, %v5729_v57  ;;  %v5829_v19 = vmul.f32 %v5809_v26, %v5737_v7  ;;  %v5835_v44 = vmul.f32 %v5809_v26, %v5713_v46 }
 0x578   : > { %v2750_v41 = vpack.c.bf16 %v2700_v48, %v2698_v33  ;;  %v5839_v22 = vmul.f32 %v5809_v26, %v5721_v60  ;;  %v5845_v33 = vmul.f32 %v5809_v26, %v5697_v62  ;;  %v5853_v7 = vmul.f32 %v5809_v26, %v5681_v11 }
 0x579   : > { %v2661_v6 = vadd.f32 %v4379_v21, %v2660_v61  ;;  %v5863_v62 = vmul.f32 %v5809_v26, %v5663_v49  ;;  %v5869_v48 = vmul.f32 %v5809_v26, %v5673_v17  ;;  %v5873_v11 = vmul.f32 %v5809_v26, %v5642_v54 }
 0x57a   : > { %v5877_v61 = vmul.f32 %v5809_v26, %v5653_v16 }
 0x57b   : > { %v2662_v55 = vrot.slane %v2661_v6, 4  ;;  %v2756_v60 = vpack.c.bf16 %v5869_v48, %v5863_v62  ;;  %v6629_v48 = vld [vmem:[#allocation34_spill] sm:$0xff] }
 0x57c   : > { %v6627_v62 = vpack.c.bf16 %v5877_v61, %v5873_v11  ;;  %v6635_v11 = vld [vmem:[#allocation29_spill] sm:$0xff] }
 0x57d   : > { %v2663_v63 = vadd.f32 %v2662_v55, %v2661_v6  ;;  %v5849_v55 = vmul.f32 %v5809_v26, %v5705_v9  ;;  %v5859_v6 = vmul.f32 %v5809_v26, %v5689_v4  ;;  %v2694_v9 = vmul.f32 %v5809_v26, %v5597_v59 }
 0x57f   : > { %v2664_v46 = vrot.slane %v2663_v63, 2  ;;  %v2758_v49 = vpack.c.bf16 %v5859_v6, %v5853_v7  ;;  %v6621_v7 = vld [vmem:[#allocation17_spill] sm:$0xff] }
 0x581   : > { %v2665_v4 = vadd.f32 %v2664_v46, %v2663_v63 }
 0x583   : > { %v2666_v17 = vrot.slane %v2665_v4, 1 }
 0x585   : > { %v2667_v57 = vadd.f32 %v2666_v17, %v2665_v4 }
 0x587   : > { %4380 = vrcp.f32 %v2667_v57  ;;  %v2696_v57 = vmul.f32 %v5809_v26, %v5604_v39 }
 0x589   : > { %v2748_v59 = vpack.c.bf16 %v2696_v57, %v2694_v9  ;;  %v2686_v57 = vmul.f32 %v5809_v26, %v5569_v34  ;;  %v2682_v34 = vmul.f32 %v5809_v26, %v5555_v45 }
 0x594   : > { %v5885_v27 = vpop.eup %4380 }
 0x595   : > { %v2699_v54 = vmul.f32 %v5885_v27, %v5749_v0  ;;  %v2701_v16 = vmul.f32 %v5885_v27, %v5757_v10  ;;  %v2695_v63 = vmul.f32 %v5885_v27, %v5733_v38  ;;  %v2697_v46 = vmul.f32 %v5885_v27, %v5741_v25 }
 0x596   : > { %v2691_v0 = vmul.f32 %v5885_v27, %v5717_v1  ;;  %v2693_v10 = vmul.f32 %v5885_v27, %v5725_v30  ;;  %v2690_v38 = vmul.f32 %v5809_v26, %v5583_v56  ;;  %v2692_v25 = vmul.f32 %v5809_v26, %v5590_v51 }
 0x597   : > { %v2751_v4 = vpack.c.bf16 %v2701_v16, %v2699_v54  ;;  %v2749_v17 = vpack.c.bf16 %v2697_v46, %v2695_v63  ;;  %v2687_v39 = vmul.f32 %v5885_v27, %v5701_v2  ;;  %v5910_v54 = vmul.f32 %v5885_v27, %v4377_v3 }
 0x598   : > { %v5913_v1 = vmul.f32 %v5885_v27, %v4379_v21  ;;  %v2689_v30 = vmul.f32 %v5885_v27, %v5709_v13  ;;  %v5918_v56 = vmul.f32 %v5885_v27, %v4371_v35  ;;  %v5921_v51 = vmul.f32 %v5885_v27, %v4373_v52 }
 0x599   : > { %2768 = vmatprep.subr.bf16.mxu1 %v2751_v4  ;;  %v2747_v2 = vpack.c.bf16 %v2693_v10, %v2691_v0  ;;  %v2725_v21 = vmul.f32 %v5885_v27, %v5806_v12  ;;  %v2719_v13 = vmul.f32 %v5885_v27, %v5797_v18  ;;  %v2721_v52 = vmul.f32 %v5885_v27, %v5800_v28 }
 0x59a   : > { %2769 = vmatpush1.bf16.msra.mxu1 %v2750_v41  ;;  %v5925_v41 = vmul.f32 %v5885_v27, %v5803_v15  ;;  %v2767_v3 = vpack.c.bf16 %v5913_v1, %v5910_v54  ;;  %v2765_v35 = vpack.c.bf16 %v5921_v51, %v5918_v56  ;;  %v2715_v15 = vmul.f32 %v5885_v27, %v5791_v58  ;;  %v6606_v51 = vld [vmem:[#allocation44_spill] sm:$0xff] }
 0x59b   : > { %2770 = vmatprep.subr.bf16.mxu1 %v2749_v17  ;;  %v2717_v9 = vmul.f32 %v5885_v27, %v5794_v24  ;;  %v2711_v12 = vmul.f32 %v5885_v27, %v5783_v53  ;;  %v2713_v18 = vmul.f32 %v5885_v27, %v5788_v14  ;;  %v5948_v63 = vmul.f32 %v5885_v27, %v5773_v43 }
 0x59c   : > { %v2763_v16 = vpack.c.bf16 %v2725_v21, %v5925_v41  ;;  %v2761_v28 = vpack.c.bf16 %v2721_v52, %v2719_v13  ;;  %v5952_v58 = vmul.f32 %v5885_v27, %v5778_v20  ;;  %v2746_v24 = vpack.c.bf16 %v2692_v25, %v2690_v38  ;;  %v6607_v41 = vld [vmem:[#allocation38_spill] sm:$0xff]  ;;  %v6608_v21 = vld [vmem:[#allocation39_spill] sm:$0xff]  ;;  %v6609_v52 = vld [vmem:[#allocation40_spill] sm:$0xff] }
 0x59d   : > { %v2759_v46 = vpack.c.bf16 %v2717_v9, %v2715_v15  ;;  %v2688_v53 = vmul.f32 %v5809_v26, %v5576_v37  ;;  %v2757_v4 = vpack.c.bf16 %v2713_v18, %v2711_v12  ;;  %v2745_v14 = vpack.c.bf16 %v2689_v30, %v2687_v39  ;;  %v6603_v39 = vld [vmem:[#allocation45_spill] sm:$0xff] }
 0x59e   : > { %2771 = vmatpush1.bf16.msra.mxu1 %v2748_v59  ;;  %v2683_v43 = vmul.f32 %v5885_v27, %v5685_v47  ;;  %v2685_v17 = vmul.f32 %v5885_v27, %v5693_v23  ;;  %v2755_v0 = vpack.c.bf16 %v5952_v58, %v5948_v63  ;;  %v2684_v37 = vmul.f32 %v5809_v26, %v5562_v5  ;;  %v6605_v30 = vld [vmem:[#allocation53_spill] sm:$0xff] }
 0x59f   : > { %2772 = vmatprep.subr.bf16.mxu1 %v2747_v2  ;;  %v2744_v20 = vpack.c.bf16 %v2688_v53, %v2686_v57  ;;  %v2679_v38 = vmul.f32 %v5885_v27, %v5667_v42  ;;  %v2681_v47 = vmul.f32 %v5885_v27, %v5677_v50  ;;  %v2678_v25 = vmul.f32 %v5809_v26, %v5541_v29  ;;  %v6604_v50 = vld [vmem:[#allocation41_spill] sm:$0xff]  ;;  %v6614_v57 = vld [vmem:[#allocation35_spill] sm:$0xff] }
 0x5a0   : > { %v2743_v10 = vpack.c.bf16 %v2685_v17, %v2683_v43  ;;  %v2742_v23 = vpack.c.bf16 %v2684_v37, %v2682_v34  ;;  %v2680_v59 = vmul.f32 %v5809_v26, %v5548_v36  ;;  %v2675_v5 = vmul.f32 %v5885_v27, %v5647_v8  ;;  %v6624_v43 = vld [vmem:[#allocation42_spill] sm:$0xff]  ;;  %v6626_v37 = vld [vmem:[#allocation32_spill] sm:$0xff] }
 0x5a1   : > { %v2741_v45 = vpack.c.bf16 %v2681_v47, %v2679_v38  ;;  %v2677_v54 = vmul.f32 %v5885_v27, %v6603_v39  ;;  %v2674_v1 = vmul.f32 %v5809_v26, %v6604_v50  ;;  %v2676_v56 = vmul.f32 %v5809_v26, %v6605_v30  ;;  %v6630_v38 = vld [vmem:[#allocation25_spill] sm:$0xff]  ;;  %v6633_v39 = vld [vmem:[#allocation36_spill] sm:$0xff] }
 0x5a2   : > { %2773 = vmatpush1.bf16.msra.mxu1 %v2746_v24  ;;  %v2740_v42 = vpack.c.bf16 %v2680_v59, %v2678_v25  ;;  %v2671_v36 = vmul.f32 %v5885_v27, %v6606_v51  ;;  %v2673_v2 = vmul.f32 %v5885_v27, %v6607_v41  ;;  %v2670_v13 = vmul.f32 %v5809_v26, %v6608_v21  ;;  %v6632_v59 = vld [vmem:[#allocation31_spill] sm:$0xff] }
 0x5a3   : > { %2774 = vmatprep.subr.bf16.mxu1 %v2745_v14  ;;  %v2739_v29 = vpack.c.bf16 %v2677_v54, %v2675_v5  ;;  %v2738_v8 = vpack.c.bf16 %v2676_v56, %v2674_v1  ;;  %v2672_v15 = vmul.f32 %v5809_v26, %v6609_v52  ;;  %v6610_v18 = vpack.c.bf16 %v5821_v32, %v5817_v40  ;;  %v6615_v40 = vld [vmem:[#allocation20_spill] sm:$0xff] }
 0x5a4   : > { %v2737_v9 = vpack.c.bf16 %v2673_v2, %v2671_v36  ;;  %v6611_v63 = vpack.c.bf16 %v5829_v19, %v5825_v31  ;;  %v6612_v58 = vpack.c.bf16 %v5839_v22, %v5835_v44  ;;  %v6613_v24 = vpack.c.bf16 %v5849_v55, %v5845_v33  ;;  %v6616_v31 = vld [vmem:[#allocation18_spill] sm:$0xff]  ;;  %v6617_v44 = vld [vmem:[#allocation19_spill] sm:$0xff] }
 0x5a5   : > { %v2736_v12 = vpack.c.bf16 %v2672_v15, %v2670_v13  ;;  %v1664_v32 = vadd.f32 %v6615_v40, %v6614_v57  ;;  %v1662_v22 = vadd.f32 %v6617_v44, %v6614_v57  ;;  %v6620_v55 = vld [vmem:[#allocation47_spill] sm:$0xff]  ;;  %v2702_v17 = vmul.f32 %v5809_v26, %v6624_v43  ;;  %v6637_v15 = vld [vmem:[#allocation24_spill] sm:$0xff] }
 0x5a6   : > { %2775 = vmatpush1.bf16.msra.mxu1 %v2744_v20  ;;  %v6625_v20 = vld [vmem:[#allocation43_spill] sm:$0xff]  ;;  %v6636_v36 = vmov 0   ;;  %v2812_v41 = vstv %s2811_s26 }
 0x5a7   : > { %2776 = vmatprep.subr.bf16.mxu1 %v2743_v10  ;;  %v2704_v34 = vmul.f32 %v5809_v26, %v6625_v20  ;;  %v6634_v26 = vld [vmem:[#allocation33_spill] sm:$0xff]  ;;  %629 = vst.msk [vmem:[#allocation2] sm:$0xf] %vm628_vm15, %v6636_v36  ;;  %630 = vst.msk [vmem:[#allocation2 + $0xc] sm:$0xf] %vm628_vm15, %v6636_v36 }
 0x5a8   : > { %v1900_v54 = vadd.f32 %v6634_v26, %v6633_v39  ;;  %634 = vst.msk [vmem:[#allocation2 + $0x8] sm:$0xf] %vm633_vm2, %v6636_v36  ;;  %635 = vst.msk [vmem:[#allocation2 + $0x14] sm:$0xf] %vm633_vm2, %v6636_v36 }
 0x5a9   : > { %v2752_v5 = vpack.c.bf16 %v2704_v34, %v2702_v17  ;;  %631 = vst.msk [vmem:[#allocation2 + $0x18] sm:$0xf] %vm628_vm15, %v6636_v36  ;;  %632 = vst.msk [vmem:[#allocation2 + $0x24] sm:$0xf] %vm628_vm15, %v6636_v36 }
 0x5aa   : > { %2777 = vmatpush1.bf16.msra.mxu1 %v2742_v23  ;;  %v6631_v23 = vld [vmem:[#allocation30_spill] sm:$0xff]  ;;  %636 = vst.msk [vmem:[#allocation2 + $0x20] sm:$0xf] %vm633_vm2, %v6636_v36  ;;  %637 = vst.msk [vmem:[#allocation2 + $0x2c] sm:$0xf] %vm633_vm2, %v6636_v36 }
 0x5ab   : > { %2778 = vmatprep.subr.bf16.mxu1 %v2741_v45 }
 0x5ae   : > { %2779 = vmatpush1.bf16.msra.mxu1 %v2740_v42 }
 0x5af   : > { %2780 = vmatprep.subr.bf16.mxu1 %v2739_v29 }
 0x5b2   : > { %2781 = vmatpush1.bf16.msra.mxu1 %v2738_v8 }
 0x5b3   : > { %2782 = vmatprep.subr.bf16.mxu1 %v2737_v9  ;;  %v6638_v9 = vmax.f32 %v6637_v15, 0.0 }
 0x5b6   : > { %2783 = vmatpush1.bf16.msra.mxu1 %v2736_v12 }
 0x5b7   : > { %2784 = vmatprep.subr.bf16.mxu1 %v2767_v3  ;;  %v1549_v3 = vpop.permute.xlu1 %1548 }
 0x5b8   : > { %v1660_v19 = vadd.f32 %v6616_v31, %v1549_v3  ;;  %v1658_v6 = vadd.f32 %v6621_v7, %v1549_v3  ;;  %v6641_v31 = vld [vmem:[#allocation21_spill] sm:$0xff] }
 0x5ba   : > { %2785 = vmatpush2.bf16.msra.mxu1 %v6610_v18  ;;  %v1711_v47 = vadd.f32 %v6630_v38, %v1658_v6  ;;  %v6639_v18 = vld [vmem:[#allocation22_spill] sm:$0xff] }
 0x5bb   : > { %2786 = vmatprep.subr.bf16.mxu1 %v2765_v35  ;;  %v6618_v35 = vld [vmem:[#allocation28_spill] sm:$0xff] }
 0x5bc   : > { %v1764_v61 = vadd.f32 %v6635_v11, %v1711_v47 }
 0x5be   : > { %2787 = vmatpush2.bf16.msra.mxu1 %v6611_v63  ;;  %v6049_v56 = vmax.f32 %v1764_v61, 0.0  ;;  %v6640_v63 = vmax.f32 %v6639_v18, 0.0 }
 0x5bf   : > { %2788 = vmatprep.subr.bf16.mxu1 %v2763_v16  ;;  %v1717_v16 = vadd.f32 %v6618_v35, %v1664_v32 }
 0x5c1   : > { %v1770_v10 = vadd.f32 %v6626_v37, %v1717_v16 }
 0x5c2   : > { %2789 = vmatpush2.bf16.msra.mxu1 %v6612_v58 }
 0x5c3   : > { %2790 = vmatprep.subr.bf16.mxu1 %v2761_v28  ;;  %v6619_v28 = vld [vmem:[#allocation46_spill] sm:$0xff]  ;;  %v6038_v42 = vmax.f32 %v1770_v10, 0.0 }
 0x5c4   : > { %v2703_v33 = vmul.f32 %v5885_v27, %v6619_v28 }
 0x5c6   : > { %2791 = vmatpush2.bf16.msra.mxu1 %v6613_v24 }
 0x5c7   : > { %2792 = vmatprep.subr.bf16.mxu1 %v2759_v46  ;;  %v2705_v46 = vmul.f32 %v5885_v27, %v6620_v55 }
 0x5c9   : > { %v2753_v27 = vpack.c.bf16 %v2705_v46, %v2703_v33 }
 0x5ca   : > { %2793 = vmatpush2.bf16.msra.mxu1 %v2758_v49  ;;  %v6622_v49 = vld [vmem:[#allocation26_spill] sm:$0xff] }
 0x5cb   : > { %2794 = vmatprep.subr.bf16.mxu1 %v2757_v4  ;;  %v1713_v53 = vadd.f32 %v6622_v49, %v1660_v19  ;;  %v6623_v4 = vld [vmem:[#allocation27_spill] sm:$0xff]  ;;  %v6642_v19 = vmax.f32 %v6641_v31, 0.0 }
 0x5cc   : > { %v1715_v14 = vadd.f32 %v6623_v4, %v1662_v22  ;;  %v6643_v22 = vld [vmem:[#allocation23_spill] sm:$0xff] }
 0x5cd   : > { %v1766_v25 = vadd.f32 %v6631_v23, %v1713_v53  ;;  %v6644_v35 = vmax.f32 %v6643_v22, 0.0 }
 0x5ce   : > { %2795 = vmatpush2.bf16.msra.mxu1 %v2756_v60  ;;  %v6628_v60 = vld [vmem:[#allocation37_spill] sm:$0xff]  ;;  %v1768_v45 = vadd.f32 %v6632_v59, %v1715_v14 }
 0x5cf   : > { %2796 = vmatprep.subr.bf16.mxu1 %v2755_v0  ;;  %v1906_v0 = vadd.f32 %v6629_v48, %v6628_v60  ;;  %v6042_v1 = vmax.f32 %v1766_v25, 0.0 }
 0x5d0   : > { %v6044_v30 = vmax.f32 %v1768_v45, 0.0 }
 0x5d1   : > { %v2734_v50 = vpack.c.bf16 %v1906_v0, %v1900_v54  ;;  %v2928_v29 = vpack.c.bf16 %v6038_v42, %v6042_v1 }
 0x5d2   : > { %2797 = vmatpush2.bf16.msra.mxu1 %v6627_v62  ;;  %v2927_v51 = vpack.c.bf16 %v6044_v30, %v6049_v56 }
 0x5d3   : > { %2798 = vmatprep.subr.bf16.mxu1 %v2753_v27 }
 0x5d6   : > { %2799 = vmatpush2.bf16.msra.mxu1 %v2752_v5 }
 0x5d7   : > { %2849 = vmatprep.subr.mxu1 %v6038_v42 }
 0x5d9   : > { %2801 = vmatmul.mubr.bf16.vlgmr.msra.gmra.mxu1 %v2734_v50 }
 0x5da   : > { %2850 = vmatpush1.xpose.msra.mxu1 %v6044_v30  ;;  %2885 = vmatprep.mubr.f32.mxu1 %v6042_v1 }
 0x5db   : > { %2851 = vmatprep.subr.mxu1 %v6042_v1 }
 0x5de   : > { %2852 = vmatpush1.xpose.msra.mxu1 %v6049_v56 }
 0x5df   : > { %2946 = vmatprep.subr.bf16.mxu1 %v2928_v29 }
 0x5e1   : > { %2886 = vmatmul.mubr.f32.vlgmr.msra.gmra.mxu1 %v6049_v56 }
 0x5e2   : > { %2890 = vmatprep.mubr.f32.mxu1 %v6038_v42  ;;  %2947 = vmatpush1.bf16.msra.mxu1 %v2927_v51 }
 0x5e5   : > { %2891 = vmatmul.mubr.f32.gmra.mxu1 %v6044_v30 }
 0x5e6   : > { %2964 = vmatprep.mubr.bf16.mxu1 %v6636_v36 }
 0x699   : > { %v2802_v2 = vpop.f32.mrf.mxu1 }
 0x69a   : > { %v2813_v8 = vmul.f32 %v2812_v41, %v2802_v2 }
 0x69b   : > { %v2804_v21 = vpop.f32.mrf.mxu1 }
 0x69c   : > { %v2814_v13 = vmul.f32 %v2812_v41, %v2804_v21  ;;  %v2817_v12 = vadd.f32 %v2813_v8, %v6638_v9  ;;  %v6648_v9 = vld [vmem:[#allocation14_spill] sm:$0xff] }
 0x69d   : > { %v2806_v52 = vpop.f32.mrf.mxu1 }
 0x69e   : > { %v2818_v58 = vadd.f32 %v2814_v13, %v6640_v63  ;;  %v2815_v24 = vmul.f32 %v2812_v41, %v2806_v52  ;;  %v6647_v13 = vld [vmem:[#allocation9_spill] sm:$0xff] }
 0x69f   : > { %v2808_v3 = vpop.f32.mrf.mxu1 }
 0x6a0   : > { %v4161_v57 = vpack.c.bf16 %v2818_v58, %v2817_v12  ;;  %v2816_v40 = vmul.f32 %v2812_v41, %v2808_v3  ;;  %v2819_v44 = vadd.f32 %v2815_v24, %v6642_v19  ;;  %v6649_v58 = vld [vmem:[#allocation7_spill] sm:$0xff]  ;;  %v6650_v3 = vld [vmem:[#allocation10_spill] sm:$0xff]  ;;  %v6652_v19 = vld [vmem:[#allocation13_spill] sm:$0xff] }
 0x6a1   : > { %v2887_v32 = vpop.f32.mrf.mxu1 }
 0x6a2   : > { %v2820_v16 = vadd.f32 %v2816_v40, %v6644_v35  ;;  %v2896_v28 = vsel %vm751_vm1, %v2887_v32, -inf  ;;  %v6651_v40 = vld [vmem:[#allocation15_spill] sm:$0xff] }
 0x6a3   : > { %2897 = vmax.xlane.f32.xlu0 %v2896_v28  ;;  %v2889_v33 = vpop.f32.mrf.mxu1 }
 0x6a4   : > { %v4162_v55 = vpack.c.bf16 %v2820_v16, %v2819_v44 }
 0x6a5   : > { %v2892_v46 = vpop.f32.mrf.mxu1 }
 0x6a6   : > { %v2899_v7 = vsel %vm751_vm1, %v2892_v46, -inf }
 0x6a7   : > { %2900 = vmax.xlane.f32.xlu1 %v2899_v7  ;;  %v2894_v6 = vpop.f32.mrf.mxu1 }
 0x72c   : > { %v2898_v49 = vpop.xlane.xlu0 %2897 }
 0x72d   : > { %v2902_v53 = vsub.f32 %v2898_v49, %v2887_v32  ;;  %v6654_v49 = vld [vmem:[#allocation16_spill] sm:$0xff] }
 0x72f   : > { %v2904_v4 = vsel %vm751_vm1, %v2902_v53, -inf }
 0x730   : > { %2905 = vmax.xlane.f32.xlu0 %v2904_v4  ;;  %v2901_v14 = vpop.xlane.xlu1 %2900 }
 0x731   : > { %v2903_v43 = vsub.f32 %v2901_v14, %v2892_v46  ;;  %v6653_v46 = vld [vmem:[#allocation6_spill] sm:$0xff] }
 0x733   : > { %v2907_v17 = vsel %vm751_vm1, %v2903_v43, -inf }
 0x734   : > { %2908 = vmax.xlane.f32.xlu0 %v2907_v17 }
 0x7b9   : > { %v2906_v20 = vpop.xlane.xlu0 %2905 }
 0x7ba   : > { %v2910_v34 = vsub.f32 %v2902_v53, %v2906_v20 }
 0x7bc   : > { %v2912_v37 = vmul.f32 1.442695, %v2910_v34 }
 0x7bd   : > { %v2909_v10 = vpop.xlane.xlu0 %2908 }
 0x7be   : > { %4382 = vpow2.f32 %v2912_v37  ;;  %v2911_v27 = vsub.f32 %v2903_v43, %v2909_v10 }
 0x7c0   : > { %v2914_v62 = vmul.f32 1.442695, %v2911_v27 }
 0x7c2   : > { %4384 = vpow2.f32 %v2914_v62 }
 0x7cb   : > { %v4383_v60 = vpop.eup %4382 }
 0x7cc   : > { %v2916_v48 = vsel %vm751_vm1, %v4383_v60, 0.0 }
 0x7cd   : > { %2917 = vadd.xlane.f32.xlu1 %v2916_v48 }
 0x7cf   : > { %v4385_v0 = vpop.eup %4384 }
 0x7d0   : > { %v2919_v38 = vsel %vm751_vm1, %v4385_v0, 0.0 }
 0x7d1   : > { %2920 = vadd.xlane.f32.xlu0 %v2919_v38 }
 0x7de   : > { %2995 = vrot.lane.b32.xlu1 %v4161_v57, %s4434_s30 }
 0x7e7   : > { %2997 = vrot.lane.b32.xlu0 %v4162_v55, %s4434_s30 }
 0x856   : > { %v2918_v47 = vpop.xlane.xlu1 %2917 }
 0x857   : > { %4386 = vrcp.f32 %v2918_v47 }
 0x85a   : > { %v2921_v23 = vpop.xlane.xlu0 %2920  ;;  %v2996_v25 = vpop.permute.xlu1 %2995 }
 0x85b   : > { %4388 = vrcp.f32 %v2921_v23  ;;  %v2999_v45 = vrot.slane %v2996_v25, 4  ;;  %v6656_v23 = vld [vmem:[#allocation8_spill] sm:$0xff] }
 0x85d   : > { %v3002_v5 = vsel %vm3001_vm7, %v2999_v45, %v2996_v25  ;;  %3012 = vst.msk [vmem:[#allocation2 + $0x8] sm:$0xf] %vm628_vm15, %v2999_v45 }
 0x85e   : > { %3011 = vst.msk [vmem:[#allocation2] sm:$0xff] %vm6088_vm13, %v3002_v5  ;;  %v2998_v39 = vpop.permute.xlu0 %2997 }
 0x85f   : > { %v3000_v26 = vrot.slane %v2998_v39, 4 }
 0x861   : > { %v3003_v54 = vsel %vm3001_vm7, %v3000_v26, %v2998_v39  ;;  %3014 = vst.msk [vmem:[#allocation2 + $0x14] sm:$0xf] %vm628_vm15, %v3000_v26  ;;  %v6657_v26 = vld [vmem:[#allocation12_spill] sm:$0xff] }
 0x862   : > { %3013 = vst.msk [vmem:[#allocation2 + $0xc] sm:$0xff] %vm6088_vm13, %v3003_v54 }
 0x864   : > { %v4387_v50 = vpop.eup %4386  ;;  %v3019_v29 = vld [vmem:[#allocation2 + $0x8] sm:$0xf] }
 0x865   : > { %v3015_v61 = vld [vmem:[#allocation2] sm:$0xff]  ;;  %v2924_v36 = vmul.f32 %v4387_v50, %v4383_v60  ;;  %v3030_v63 = vmul.bf16 %v3019_v29, %v6647_v13  ;;  %v3026_v24 = vmul.bf16 %v3019_v29, %v6649_v58  ;;  %v3022_v57 = vmul.bf16 %v3019_v29, %v6650_v3  ;;  %v6655_v60 = vld [vmem:[#allocation11_spill] sm:$0xff] }
 0x866   : > { %v6104_v12 = vmul.bf16 %v3015_v61, %v6648_v9  ;;  %v3038_v32 = vmul.bf16 %v3019_v29, %v6651_v40  ;;  %v6124_v7 = vmul.bf16 %v6653_v46, %v3015_v61  ;;  %v6130_v53 = vmul.bf16 %v3015_v61, %v6654_v49 }
 0x867   : > { %v3034_v14 = vmul.bf16 %v3019_v29, %v6652_v19  ;;  %v3025_v45 = vmul.bf16 %v3015_v61, %v6656_v23  ;;  %v3021_v50 = vmul.bf16 %v3015_v61, %v6657_v26 }
 0x868   : > { %v4389_v11 = vpop.eup %4388  ;;  %v3020_v51 = vld [vmem:[#allocation2 + $0x14] sm:$0xf] }
 0x869   : > { %v2925_v41 = vmul.f32 %v4389_v11, %v4385_v0  ;;  %v3016_v2 = vld [vmem:[#allocation2 + $0xc] sm:$0xff]  ;;  %v6100_v8 = vcombine.low %v3019_v29, %v3020_v51  ;;  %v3032_v52 = vmul.bf16 %v3020_v51, %v6647_v13  ;;  %v3036_v44 = vmul.bf16 %v3020_v51, %v6652_v19 }
 0x86a   : > { %v4106_v21 = vcombine.high %v3015_v61, %v3016_v2  ;;  %v6107_v18 = vmul.bf16 %v3016_v2, %v6648_v9  ;;  %v4105_v31 = vcombine.low %v3015_v61, %v3016_v2  ;;  %v3028_v28 = vmul.bf16 %v3020_v51, %v6649_v58 }
 0x86b   : > { %v2926_v15 = vpack.c.bf16 %v2925_v41, %v2924_v36  ;;  %v4116_v16 = vcombine.low %v3030_v63, %v3032_v52  ;;  %v3024_v33 = vmul.bf16 %v3020_v51, %v6650_v3  ;;  %v3040_v55 = vmul.bf16 %v3020_v51, %v6651_v40 }
 0x86c   : > { %3178 = vrot.lane.b32.xlu0 %v4106_v21, %s4426_s23  ;;  %v4118_v22 = vcombine.high %v6104_v12, %v6107_v18  ;;  %v4117_v35 = vcombine.low %v6104_v12, %v6107_v18  ;;  %v6127_v6 = vmul.bf16 %v6653_v46, %v3016_v2  ;;  %v6133_v4 = vmul.bf16 %v3016_v2, %v6654_v49 }
 0x86d   : > { %4099 = vmatmul.mubr.msk.bf16.vlgmr.msra.gmra.mxu1 %vm751_vm1, %v2926_v15  ;;  %v4113_v43 = vcombine.low %v3026_v24, %v3028_v28  ;;  %v4110_v17 = vcombine.low %v3022_v57, %v3024_v33  ;;  %v6137_v20 = vcombine.low %v3038_v32, %v3040_v55  ;;  %v4119_v62 = vcombine.low %v3034_v14, %v3036_v44 }
 0x86e   : > { %v4104_v34 = vcombine.high %v6124_v7, %v6127_v6  ;;  %v4103_v37 = vcombine.low %v6124_v7, %v6127_v6  ;;  %v4121_v10 = vcombine.high %v6130_v53, %v6133_v4  ;;  %v4120_v27 = vcombine.low %v6130_v53, %v6133_v4  ;;  %v3211_v53 = vld [vmem:[%s6443_s8] sm:$0xff]  ;;  %v3684_v4 = vld [vmem:[%s6449_s14 + $0x8] sm:$0xff] }
 0x86f   : > { %v3031_v48 = vmul.bf16 %v3016_v2, %v6655_v60  ;;  %v3029_v0 = vmul.bf16 %v3015_v61, %v6655_v60  ;;  %v3027_v25 = vmul.bf16 %v3016_v2, %v6656_v23  ;;  %v3023_v54 = vmul.bf16 %v3016_v2, %v6657_v26 }
 0x870   : > { %3176 = vrot.lane.b32.xlu0 %v4105_v31, %s4426_s23  ;;  %v2976_v51 = vstv %s4100_s20 }
 0x871   : > { %v4115_v38 = vcombine.high %v3029_v0, %v3031_v48  ;;  %v4114_v47 = vcombine.low %v3029_v0, %v3031_v48  ;;  %v4112_v5 = vcombine.high %v3025_v45, %v3027_v25  ;;  %v4111_v39 = vcombine.low %v3025_v45, %v3027_v25 }
 0x872   : > { %v4109_v11 = vcombine.high %v3021_v50, %v3023_v54  ;;  %v4108_v29 = vcombine.low %v3021_v50, %v3023_v54 }
 0x874   : > { %3170 = vrot.lane.b32.xlu0 %v4119_v62, %s4430_s29 }
 0x878   : > { %3145 = vrot.lane.b32.xlu0 %v4115_v38, %s4428_s25 }
 0x87c   : > { %3143 = vrot.lane.b32.xlu0 %v4114_v47, %s4428_s25 }
 0x880   : > { %3122 = vrot.lane.b32.xlu0 %v4106_v21, %s4425_s2 }
 0x884   : > { %3120 = vrot.lane.b32.xlu0 %v4105_v31, %s4425_s2 }
 0x888   : > { %3112 = vrot.lane.b32.xlu0 %v4112_v5, %s4427_s24 }
 0x88c   : > { %3110 = vrot.lane.b32.xlu0 %v4111_v39, %s4427_s24 }
 0x890   : > { %3089 = vrot.lane.b32.xlu0 %v4109_v11, %s6658_s0 }
 0x894   : > { %3087 = vrot.lane.b32.xlu0 %v4108_v29, %s6658_s0 }
 0x898   : > { %3066 = vrot.lane.b32.xlu0 %v4106_v21, %s6659_s1 }
 0x89c   : > { %3064 = vrot.lane.b32.xlu0 %v4105_v31, %s6659_s1 }
 0x92d   : > { %v2966_v36 = vpop.f32.mrf.mxu1 }
 0x92e   : > { %v2977_v41 = vmul.f32 %v2976_v51, %v2966_v36 }
 0x92f   : > { %v2968_v52 = vpop.f32.mrf.mxu1 }
 0x930   : > { %v2978_v2 = vmul.f32 %v2976_v51, %v2968_v52  ;;  %v2981_v12 = vadd.f32 %v2977_v41, %v6049_v56 }
 0x931   : > { %v2970_v15 = vpop.f32.mrf.mxu1 }
 0x932   : > { %v2982_v61 = vadd.f32 %v2978_v2, %v6042_v1  ;;  %v2979_v18 = vmul.f32 %v2976_v51, %v2970_v15 }
 0x933   : > { %v2972_v63 = vpop.f32.mrf.mxu1 }
 0x934   : > { %v4163_v24 = vpack.c.bf16 %v2982_v61, %v2981_v12  ;;  %v2980_v57 = vmul.f32 %v2976_v51, %v2972_v63  ;;  %v2983_v32 = vadd.f32 %v2979_v18, %v6044_v30 }
 0x936   : > { %v2984_v21 = vadd.f32 %v2980_v57, %v6038_v42  ;;  %3292 = vrot.lane.b32.xlu1 %v4163_v24, %s4434_s30  ;;  %v3179_v42 = vpop.permute.xlu0 %3178 }
 0x938   : > { %v4164_v31 = vpack.c.bf16 %v2984_v21, %v2983_v32 }
 0x93a   : > { %3294 = vrot.lane.b32.xlu1 %v4164_v31, %s4434_s30  ;;  %v3177_v1 = vpop.permute.xlu0 %3176 }
 0x93b   : > { %v3182_v48 = vsel %vm1410_vm5, %v3177_v1, %v3179_v42 }
 0x93e   : > { %3180 = vrot.lane.b32.xlu1 %v6100_v8, %s4426_s23  ;;  %v3171_v30 = vpop.permute.xlu0 %3170 }
 0x942   : > { %3168 = vrot.lane.b32.xlu1 %v4118_v22, %s4430_s29  ;;  %v3146_v56 = vpop.permute.xlu0 %3145 }
 0x946   : > { %3166 = vrot.lane.b32.xlu1 %v4117_v35, %s4430_s29  ;;  %v3144_v44 = vpop.permute.xlu0 %3143 }
 0x947   : > { %v3149_v52 = vsel %vm1276_vm9, %v3144_v44, %v3146_v56 }
 0x94a   : > { %3147 = vrot.lane.b32.xlu1 %v4116_v16, %s4428_s25  ;;  %v3123_v22 = vpop.permute.xlu0 %3122 }
 0x94e   : > { %3124 = vrot.lane.b32.xlu1 %v6100_v8, %s4425_s2  ;;  %v3121_v28 = vpop.permute.xlu0 %3120 }
 0x94f   : > { %v3126_v21 = vsel %vm1183_vm3, %v3121_v28, %v3123_v22 }
 0x952   : > { %3114 = vrot.lane.b32.xlu1 %v4113_v43, %s4427_s24  ;;  %v3113_v14 = vpop.permute.xlu0 %3112 }
 0x956   : > { %3091 = vrot.lane.b32.xlu1 %v4110_v17, %s6658_s0  ;;  %v3111_v0 = vpop.permute.xlu0 %3110 }
 0x957   : > { %v3116_v28 = vsel %vm1142_vm8, %v3111_v0, %v3113_v14 }
 0x95a   : > { %3068 = vrot.lane.b32.xlu1 %v6100_v8, %s6659_s1  ;;  %v3090_v11 = vpop.permute.xlu0 %3089 }
 0x95e   : > { %v3088_v15 = vpop.permute.xlu0 %3087 }
 0x9a8   : > { %v3293_v35 = vpop.permute.xlu1 %3292 }
 0x9a9   : > { %v3296_v33 = vrot.slane %v3293_v35, 4 }
 0x9ab   : > { %v3298_v16 = vsel %vm3001_vm7, %v3296_v33, %v3293_v35  ;;  %3306 = vst.msk [vmem:[#allocation2 + $0x20] sm:$0xf] %vm628_vm15, %v3296_v33 }
 0x9ac   : > { %3305 = vst.msk [vmem:[#allocation2 + $0x18] sm:$0xff] %vm6088_vm13, %v3298_v16  ;;  %v3295_v55 = vpop.permute.xlu1 %3294 }
 0x9ad   : > { %v3297_v43 = vrot.slane %v3295_v55, 4 }
 0x9af   : > { %v3299_v8 = vsel %vm3001_vm7, %v3297_v43, %v3295_v55  ;;  %3308 = vst.msk [vmem:[#allocation2 + $0x2c] sm:$0xf] %vm628_vm15, %v3297_v43 }
 0x9b0   : > { %3307 = vst.msk [vmem:[#allocation2 + $0x24] sm:$0xff] %vm6088_vm13, %v3299_v8  ;;  %v3181_v17 = vpop.permute.xlu1 %3180 }
 0x9b1   : > { %v3183_v62 = vsel %vm1410_vm5, %v3179_v42, %v3181_v17 }
 0x9b2   : > { %3235 = vmatprep.subr.bf16.mxu1 %v3183_v62  ;;  %v6192_v25 = vld [vmem:[#allocation2 + $0x20] sm:$0xf] }
 0x9b3   : > { %3236 = vmatpush1.bf16.msra.mxu1 %v3182_v48  ;;  %v6200_v5 = vld [vmem:[#allocation2 + $0x18] sm:$0xff]  ;;  %v3332_v6 = vmul.bf16 %v6192_v25, %v6651_v40 }
 0x9b4   : > { %v3169_v38 = vpop.permute.xlu1 %3168  ;;  %v6225_v2 = vmul.bf16 %v6200_v5, %v6648_v9  ;;  %v6233_v61 = vmul.bf16 %v6653_v46, %v6200_v5  ;;  %v3323_v31 = vmul.bf16 %v6200_v5, %v6655_v60  ;;  %v3319_v43 = vmul.bf16 %v6200_v5, %v6656_v23 }
 0x9b5   : > { %v3173_v47 = vsel %vm1369_vm11, %v3169_v38, %v3171_v30 }
 0x9b6   : > { %3237 = vmatprep.subr.bf16.mxu1 %v3173_v47  ;;  %v6194_v45 = vld [vmem:[#allocation2 + $0x2c] sm:$0xf] }
 0x9b7   : > { %v6198_v59 = vcombine.low %v6192_v25, %v6194_v45  ;;  %v6202_v39 = vld [vmem:[#allocation2 + $0x24] sm:$0xff]  ;;  %v3330_v42 = vmul.bf16 %v6194_v45, %v6652_v19  ;;  %v3326_v35 = vmul.bf16 %v6194_v45, %v6647_v13  ;;  %v3322_v62 = vmul.bf16 %v6194_v45, %v6649_v58 }
 0x9b8   : > { %v3167_v54 = vpop.permute.xlu1 %3166  ;;  %v6206_v50 = vcombine.high %v6200_v5, %v6202_v39  ;;  %v6215_v36 = vmul.bf16 %v6202_v39, %v6648_v9  ;;  %v6229_v12 = vcombine.low %v6200_v5, %v6202_v39  ;;  %v6237_v18 = vmul.bf16 %v6653_v46, %v6202_v39 }
 0x9b9   : > { %v3172_v29 = vsel %vm1369_vm11, %v3167_v54, %v3169_v38  ;;  %3474 = vrot.lane.b32.xlu1 %v6198_v59, %s4426_s23  ;;  %v6243_v9 = vmul.bf16 %v6202_v39, %v6655_v60  ;;  %v3321_v16 = vmul.bf16 %v6202_v39, %v6656_v23  ;;  %v3320_v38 = vmul.bf16 %v6192_v25, %v6649_v58 }
 0x9ba   : > { %3238 = vmatpush1.bf16.msra.mxu1 %v3172_v29  ;;  %3472 = vrot.lane.b32.xlu0 %v6206_v50, %s4426_s23  ;;  %v4143_v24 = vcombine.high %v6225_v2, %v6215_v36  ;;  %v4129_v32 = vcombine.high %v6233_v61, %v6237_v18  ;;  %v4128_v46 = vcombine.low %v6233_v61, %v6237_v18 }
 0x9bb   : > { %v4140_v30 = vcombine.high %v3323_v31, %v6243_v9  ;;  %v4137_v0 = vcombine.high %v3319_v43, %v3321_v16  ;;  %v4138_v23 = vcombine.low %v3320_v38, %v3322_v62  ;;  %v3318_v47 = vmul.bf16 %v6194_v45, %v6650_v3 }
 0x9bc   : > { %v3148_v51 = vpop.permute.xlu1 %3147  ;;  %v3317_v54 = vmul.bf16 %v6202_v39, %v6657_v26  ;;  %v3316_v58 = vmul.bf16 %v6192_v25, %v6650_v3  ;;  %v3334_v7 = vmul.bf16 %v6194_v45, %v6651_v40  ;;  %v4244_v45 = vld [vmem:[%s6442_s7 + $0x4] ss:$8 sps:$4 sm:$0xff]  }
 0x9bd   : > { %3418 = vrot.lane.b32.xlu1 %v6198_v59, %s4425_s2  ;;  %v3150_v41 = vsel %vm1276_vm9, %v3146_v56, %v3148_v51  ;;  %v3067_v56 = vpop.permute.xlu0 %3066  ;;  %v4142_v51 = vcombine.low %v6225_v2, %v6215_v36  ;;  %v3212_v36 = vld [vmem:[%s6443_s8 + $0x8] sm:$0xff]  ;;  %4125 = vmatprep.mubr.msk.bf16.mxu1 %vm751_vm1, %v4244_v45  ;;  %v3586_v2 = vld [vmem:[%s6447_s12] sm:$0xff] }
 0x9be   : > { %3239 = vmatprep.subr.bf16.mxu1 %v3150_v41  ;;  %3416 = vrot.lane.b32.xlu0 %v6206_v50, %s4425_s2  ;;  %v4135_v29 = vcombine.low %v3316_v58, %v3318_v47  ;;  %v3506_v40 = vld [vmem:[%s6445_s10 + $0x8] sm:$0xff]  ;;  %v3333_v41 = vmul.bf16 %v6202_v39, %v6654_v49 }
 0x9bf   : > { %3240 = vmatpush1.bf16.msra.mxu1 %v3149_v52 }
 0x9c0   : > { %v3125_v63 = vpop.permute.xlu1 %3124 }
 0x9c1   : > { %3470 = vrot.lane.b32.xlu1 %v6229_v12, %s4426_s23  ;;  %v3127_v57 = vsel %vm1183_vm3, %v3123_v22, %v3125_v63  ;;  %v3328_v22 = vmul.bf16 %v6192_v25, %v6652_v19  ;;  %v3324_v19 = vmul.bf16 %v6192_v25, %v6647_v13  ;;  %v3065_v8 = vpop.permute.xlu0 %3064  ;;  %v3587_v25 = vld [vmem:[%s6447_s12 + $0x8] sm:$0xff] }
 0x9c2   : > { %3241 = vmatprep.subr.bf16.mxu1 %v3127_v57  ;;  %3462 = vrot.lane.b32.xlu0 %v4143_v24, %s4430_s29 }
 0x9c3   : > { %3242 = vmatpush1.bf16.msra.mxu1 %v3126_v21  ;;  %v4144_v60 = vcombine.low %v3328_v22, %v3330_v42  ;;  %v4141_v17 = vcombine.low %v3324_v19, %v3326_v35 }
 0x9c4   : > { %v3115_v1 = vpop.permute.xlu1 %3114 }
 0x9c5   : > { %3414 = vrot.lane.b32.xlu1 %v6229_v12, %s4425_s2  ;;  %v3117_v44 = vsel %vm1142_vm8, %v3113_v14, %v3115_v1  ;;  %v3093_v14 = vsel %vm1049_vm10, %v3088_v15, %v3090_v11  ;;  %s6660_s2 = smov 94  }
 0x9c6   : > { %3243 = vmatprep.subr.bf16.mxu1 %v3117_v44  ;;  %3439 = vrot.lane.b32.xlu0 %v4140_v30, %s4428_s25 }
 0x9c7   : > { %3244 = vmatpush1.bf16.msra.mxu1 %v3116_v28 }
 0x9c8   : > { %v3092_v33 = vpop.permute.xlu1 %3091 }
 0x9c9   : > { %3464 = vrot.lane.b32.xlu1 %v4144_v60, %s4430_s29  ;;  %v3094_v55 = vsel %vm1049_vm10, %v3090_v11, %v3092_v33  ;;  %v3315_v11 = vmul.bf16 %v6200_v5, %v6657_v26  ;;  %v4139_v26 = vcombine.low %v3323_v31, %v6243_v9 }
 0x9ca   : > { %3245 = vmatprep.subr.bf16.mxu1 %v3094_v55  ;;  %3203 = vrot.lane.b32.xlu0 %v6137_v20, %s6660_s2  ;;  %v3070_v20 = vsel %vm956_vm0, %v3065_v8, %v3067_v56 }
 0x9cb   : > { %3246 = vmatpush1.bf16.msra.mxu1 %v3093_v14  ;;  %v4133_v3 = vcombine.low %v3315_v11, %v3317_v54 }
 0x9cc   : > { %v3069_v48 = vpop.permute.xlu1 %3068 }
 0x9cd   : > { %3441 = vrot.lane.b32.xlu1 %v4141_v17, %s4428_s25  ;;  %v3071_v13 = vsel %vm956_vm0, %v3067_v56, %v3069_v48 }
 0x9ce   : > { %3406 = vrot.lane.b32.xlu0 %v4137_v0, %s4427_s24  ;;  %3247 = vmatprep.subr.bf16.mxu1 %v3071_v13 }
 0x9cf   : > { %3248 = vmatpush1.bf16.msra.mxu1 %v3070_v20 }
 0x9d0   : > { %3249 = vmatprep.subr.bf16.mxu1 %v4104_v34  ;;  %v4134_v34 = vcombine.high %v3315_v11, %v3317_v54 }
 0x9d1   : > { %3408 = vrot.lane.b32.xlu1 %v4138_v23, %s4427_s24 }
 0x9d2   : > { %3362 = vrot.lane.b32.xlu0 %v6198_v59, %s6659_s1  ;;  %v4136_v59 = vcombine.low %v3319_v43, %v3321_v16 }
 0x9d3   : > { %3250 = vmatpush1.bf16.msra.mxu1 %v4103_v37  ;;  %v4147_v37 = vcombine.low %v3332_v6, %v3334_v7 }
 0x9d5   : > { %3385 = vrot.lane.b32.xlu1 %v4135_v29, %s6658_s0 }
 0x9d6   : > { %3383 = vrot.lane.b32.xlu0 %v4134_v34, %s6658_s0 }
 0x9d9   : > { %3460 = vrot.lane.b32.xlu1 %v4142_v51, %s4430_s29 }
 0x9da   : > { %3381 = vrot.lane.b32.xlu0 %v4133_v3, %s6658_s0  ;;  %v4246_v3 = vld [vmem:[%s6442_s7] ss:$8 sps:$4 sm:$0xff]  }
 0x9dd   : > { %3437 = vrot.lane.b32.xlu1 %v4139_v26, %s4428_s25 }
 0x9de   : > { %3358 = vrot.lane.b32.xlu0 %v6229_v12, %s6659_s1 }
 0x9e1   : > { %3201 = vrot.lane.b32.xlu1 %v4121_v10, %s6660_s2  ;;  %v4249_v10 = vld [vmem:[%s6444_s9 + $0x4] ss:$8 sps:$4 sm:$0xff]  }
 0x9e2   : > { %3497 = vrot.lane.b32.xlu0 %v4147_v37, %s6660_s2  ;;  %4150 = vmatprep.mubr.msk.bf16.mxu0 %vm751_vm1, %v4249_v10  ;;  %v6661_v37 = vmov 0.0  }
 0x9e5   : > { %3404 = vrot.lane.b32.xlu1 %v4136_v59, %s4427_s24  ;;  %s4158_s24 = sshll.u32 %s6663_s28, 4 }
 0x9e6   : > { %3220 = vperm.xlu0 %4211, %v3212_v36   ;;  %v4247_v36 = vld [vmem:[%s6444_s9] ss:$8 sps:$4 sm:$0xff]   ;;  %s621_s29 = scalar_lea.vmem %s6452_s17, %s4158_s24  ;;  %s626_s22 = scalar_lea.vmem %s6453_s18, %s4158_s24 }
 0x9e7   : > { %s616_s26 = scalar_lea.vmem %s6451_s16, %s4158_s24 }
 0x9e9   : > { %3360 = vrot.lane.b32.xlu1 %v6206_v50, %s6659_s1  ;;  %v3331_v50 = vmul.bf16 %v6200_v5, %v6654_v49  ;;  %v3505_v49 = vld [vmem:[%s6445_s10] sm:$0xff]  ;;  %s4157_s1 = sshll.u32 %s6663_s28, 5 }
 0x9ea   : > { %3514 = vperm.xlu0 %4211, %v3506_v40   ;;  %s611_s25 = scalar_lea.vmem %s6450_s15, %s4157_s1 }
 0x9eb   : > { %v4146_v52 = vcombine.high %v3331_v50, %v3333_v41  ;;  %v4145_v39 = vcombine.low %v3331_v50, %v3333_v41 }
 0x9ed   : > { %3199 = vrot.lane.b32.xlu1 %v4120_v27, %s6660_s2  ;;  %v3683_v27 = vld [vmem:[%s6449_s14] sm:$0xff] }
 0x9ee   : > { %3595 = vperm.xlu0 %4211, %v3587_v25  }
 0x9f1   : > { %3495 = vrot.lane.b32.xlu1 %v4146_v52, %s6660_s2 }
 0x9f2   : > { %3590 = vperm.xlu0 %4211, %v3586_v2  }
 0x9f5   : > { %3493 = vrot.lane.b32.xlu1 %v4145_v39, %s6660_s2 }
 0x9f9   : > { %3215 = vperm.xlu1 %4210, %v3211_v53  }
 0x9fd   : > { %3509 = vperm.xlu1 %4210, %v3505_v49  }
 0xa01   : > { %3692 = vperm.xlu1 %4210, %v3684_v4  }
 0xa05   : > { %3687 = vperm.xlu1 %4210, %v3683_v27  }
 0xa2b   : > { %v3475_v5 = vpop.permute.xlu1 %3474 }
 0xa2c   : > { %v3473_v15 = vpop.permute.xlu0 %3472 }
 0xa2d   : > { %v3477_v12 = vsel %vm1410_vm5, %v3473_v15, %v3475_v5 }
 0xa2e   : > { %3529 = vmatprep.subr.bf16.mxu0 %v3477_v12 }
 0xa2f   : > { %v3419_v63 = vpop.permute.xlu1 %3418 }
 0xa30   : > { %v3417_v24 = vpop.permute.xlu0 %3416 }
 0xa31   : > { %v3421_v8 = vsel %vm1183_vm3, %v3417_v24, %v3419_v63 }
 0xa33   : > { %v3471_v9 = vpop.permute.xlu1 %3470 }
 0xa34   : > { %v3476_v57 = vsel %vm1410_vm5, %v3471_v9, %v3473_v15  ;;  %v3463_v21 = vpop.permute.xlu0 %3462 }
 0xa35   : > { %3530 = vmatpush1.bf16.msra.mxu0 %v3476_v57  ;;  %v3584_v57 = vld [vmem:[%s6446_s11] sm:$0xff] }
 0xa37   : > { %v3415_v31 = vpop.permute.xlu1 %3414 }
 0xa38   : > { %v3440_v42 = vpop.permute.xlu0 %3439  ;;  %v3420_v62 = vsel %vm1183_vm3, %v3415_v31, %v3417_v24 }
 0xa3b   : > { %v3465_v1 = vpop.permute.xlu1 %3464 }
 0xa3c   : > { %v3467_v30 = vsel %vm1369_vm11, %v3463_v21, %v3465_v1  ;;  %v3204_v56 = vpop.permute.xlu0 %3203 }
 0xa3d   : > { %3531 = vmatprep.subr.bf16.mxu0 %v3467_v30 }
 0xa3f   : > { %v3442_v44 = vpop.permute.xlu1 %3441 }
 0xa40   : > { %v3407_v28 = vpop.permute.xlu0 %3406  ;;  %v3444_v55 = vsel %vm1276_vm9, %v3440_v42, %v3442_v44 }
 0xa43   : > { %v3409_v22 = vpop.permute.xlu1 %3408 }
 0xa44   : > { %v3363_v35 = vpop.permute.xlu0 %3362  ;;  %v3411_v0 = vsel %vm1142_vm8, %v3407_v28, %v3409_v22  ;;  %v3585_v22 = vld [vmem:[%s6446_s11 + $0x8] sm:$0xff] }
 0xa47   : > { %v3386_v60 = vpop.permute.xlu1 %3385 }
 0xa48   : > { %v3384_v43 = vpop.permute.xlu0 %3383 }
 0xa49   : > { %v3388_v23 = vsel %vm1049_vm10, %v3384_v43, %v3386_v60 }
 0xa4b   : > { %v3461_v33 = vpop.permute.xlu1 %3460 }
 0xa4c   : > { %v3466_v16 = vsel %vm1369_vm11, %v3461_v33, %v3463_v21  ;;  %v3382_v13 = vpop.permute.xlu0 %3381  ;;  %v3681_v33 = vld [vmem:[%s6448_s13] sm:$0xff] }
 0xa4d   : > { %3532 = vmatpush1.bf16.msra.mxu0 %v3466_v16  ;;  %v3387_v54 = vsel %vm1049_vm10, %v3382_v13, %v3384_v43  ;;  %v3682_v16 = vld [vmem:[%s6448_s13 + $0x8] sm:$0xff] }
 0xa4e   : > { %3533 = vmatprep.subr.bf16.mxu0 %v3444_v55 }
 0xa4f   : > { %v3438_v19 = vpop.permute.xlu1 %3437 }
 0xa50   : > { %v3443_v14 = vsel %vm1276_vm9, %v3438_v19, %v3440_v42  ;;  %v3359_v11 = vpop.permute.xlu0 %3358 }
 0xa51   : > { %3534 = vmatpush1.bf16.msra.mxu0 %v3443_v14 }
 0xa52   : > { %3535 = vmatprep.subr.bf16.mxu0 %v3421_v8 }
 0xa53   : > { %v3202_v17 = vpop.permute.xlu1 %3201 }
 0xa54   : > { %v3206_v48 = vsel %vm1503_vm12, %v3202_v17, %v3204_v56  ;;  %v3498_v26 = vpop.permute.xlu0 %3497 }
 0xa55   : > { %3265 = vmatprep.subr.bf16.mxu1 %v3206_v48  ;;  %3536 = vmatpush1.bf16.msra.mxu0 %v3420_v62 }
 0xa56   : > { %3537 = vmatprep.subr.bf16.mxu0 %v3411_v0 }
 0xa57   : > { %v3405_v38 = vpop.permute.xlu1 %3404 }
 0xa58   : > { %v3410_v20 = vsel %vm1142_vm8, %v3405_v38, %v3407_v28 }
 0xa59   : > { %3538 = vmatpush1.bf16.msra.mxu0 %v3410_v20 }
 0xa5a   : > { %3539 = vmatprep.subr.bf16.mxu0 %v3388_v23 }
 0xa5b   : > { %v3361_v47 = vpop.permute.xlu1 %3360 }
 0xa5c   : > { %v3365_v58 = vsel %vm956_vm0, %v3361_v47, %v3363_v35  ;;  %v3364_v34 = vsel %vm956_vm0, %v3359_v11, %v3361_v47 }
 0xa5d   : > { %3540 = vmatpush1.bf16.msra.mxu0 %v3387_v54 }
 0xa5e   : > { %3541 = vmatprep.subr.bf16.mxu0 %v3365_v58 }
 0xa5f   : > { %v3200_v29 = vpop.permute.xlu1 %3199 }
 0xa60   : > { %v3205_v51 = vsel %vm1503_vm12, %v3200_v29, %v3202_v17 }
 0xa61   : > { %3542 = vmatpush1.bf16.msra.mxu0 %v3364_v34  ;;  %3266 = vmatpush2.bf16.msra.mxu1 %v3205_v51  ;;  %v3221_v41 = vpop.permute.xlu0 %3220 }
 0xa62   : > { %3543 = vmatprep.subr.bf16.mxu0 %v4129_v32 }
 0xa63   : > { %v3496_v7 = vpop.permute.xlu1 %3495 }
 0xa64   : > { %3268 = vmatmul.mubr.bf16.vlgmr.msra.gmra.mxu1 %v4246_v3  ;;  %v3500_v6 = vsel %vm1503_vm12, %v3496_v7, %v3498_v26 }
 0xa65   : > { %3544 = vmatpush1.bf16.msra.mxu0 %v4128_v46  ;;  %3668 = vmatprep.mubr.f32.mxu1 %v6661_v37  ;;  %v3515_v24 = vpop.permute.xlu0 %3514 }
 0xa66   : > { %3559 = vmatprep.subr.bf16.mxu0 %v3500_v6 }
 0xa67   : > { %v3494_v45 = vpop.permute.xlu1 %3493 }
 0xa68   : > { %v3499_v59 = vsel %vm1503_vm12, %v3494_v45, %v3496_v7 }
 0xa69   : > { %3560 = vmatpush2.bf16.msra.mxu0 %v3499_v59  ;;  %v3596_v55 = vpop.permute.xlu0 %3595 }
 0xa6c   : > { %3562 = vmatmul.mubr.bf16.vlgmr.msra.gmra.mxu0 %v4247_v36 }
 0xa6d   : > { %v3591_v19 = vpop.permute.xlu0 %3590 }
 0xa74   : > { %v3216_v40 = vpop.permute.xlu1 %3215 }
 0xa78   : > { %v3510_v2 = vpop.permute.xlu1 %3509 }
 0xa7c   : > { %v3693_v8 = vpop.permute.xlu1 %3692 }
 0xa80   : > { %v3688_v13 = vpop.permute.xlu1 %3687 }
 0xb24   : > { %v3269_v32 = vpop.f32.mrf.mxu1 }
 0xb25   : > { %v3270_v46 = vadd.f32 %v3269_v32, %v3216_v40 }
 0xb26   : > { %v3271_v10 = vpop.f32.mrf.mxu1 }
 0xb27   : > { %v3272_v50 = vadd.f32 %v3271_v10, %v3216_v40  ;;  %v3278_v5 = vmax.f32 %v3270_v46, 0.0 }
 0xb28   : > { %v3273_v25 = vpop.f32.mrf.mxu1 }
 0xb29   : > { %v3274_v61 = vadd.f32 %v3273_v25, %v3221_v41  ;;  %v3279_v15 = vmax.f32 %v3272_v50, 0.0 }
 0xb2a   : > { %v3275_v18 = vpop.f32.mrf.mxu1 }
 0xb2b   : > { %v3276_v52 = vadd.f32 %v3275_v18, %v3221_v41  ;;  %v3280_v4 = vmax.f32 %v3274_v61, 0.0 }
 0xb2c   : > { %v3563_v39 = vpop.f32.mrf.mxu0 }
 0xb2d   : > { %v3281_v53 = vmax.f32 %v3276_v52, 0.0  ;;  %v3564_v49 = vadd.f32 %v3563_v39, %v3510_v2 }
 0xb2e   : > { %v3565_v27 = vpop.f32.mrf.mxu0 }
 0xb2f   : > { %v3572_v12 = vmax.f32 %v3564_v49, 0.0  ;;  %v3566_v63 = vadd.f32 %v3565_v27, %v3510_v2  ;;  %3632 = vmatprep.subr.mxu1 %v3281_v53 }
 0xb30   : > { %v3567_v9 = vpop.f32.mrf.mxu0  ;;  %3633 = vmatpush1.msra.mxu1 %v3280_v4 }
 0xb31   : > { %v3576_v21 = vadd.f32 %v3572_v12, %v3278_v5  ;;  %v3573_v31 = vmax.f32 %v3566_v63, 0.0  ;;  %v3568_v42 = vadd.f32 %v3567_v9, %v3515_v24  ;;  %3634 = vmatprep.subr.mxu1 %v3279_v15 }
 0xb32   : > { %v3569_v1 = vpop.f32.mrf.mxu0  ;;  %3635 = vmatpush1.msra.mxu1 %v3278_v5 }
 0xb33   : > { %3580 = vst [vmem:[%s611_s25] sm:$0xff] %v3576_v21  ;;  %v3577_v30 = vadd.f32 %v3573_v31, %v3279_v15  ;;  %v3574_v56 = vmax.f32 %v3568_v42, 0.0  ;;  %v3570_v44 = vadd.f32 %v3569_v1, %v3515_v24  ;;  %4151 = vmatmul.mubr.msk.f32.vlgmr.msra.gmra.mxu1 %vm751_vm1, %v3584_v57 }
 0xb34   : > { %3674 = vmatprep.mubr.f32.mxu1 %v6661_v37 }
 0xb35   : > { %3581 = vst [vmem:[%s611_s25 + $0x8] sm:$0xff] %v3577_v30  ;;  %v3578_v28 = vadd.f32 %v3574_v56, %v3280_v4  ;;  %v3575_v60 = vmax.f32 %v3570_v44, 0.0 }
 0xb37   : > { %3582 = vst [vmem:[%s611_s25 + $0x10] sm:$0xff] %v3578_v28  ;;  %v3579_v35 = vadd.f32 %v3575_v60, %v3281_v53  ;;  %4152 = vmatmul.mubr.msk.f32.gmra.mxu1 %vm751_vm1, %v3585_v22  ;;  %3729 = vmatprep.subr.mxu1 %v3575_v60 }
 0xb38   : > { %3730 = vmatpush1.msra.mxu1 %v3574_v56  ;;  %3765 = vmatprep.mubr.f32.mxu1 %v6661_v37 }
 0xb39   : > { %3583 = vst [vmem:[%s611_s25 + $0x18] sm:$0xff] %v3579_v35  ;;  %3731 = vmatprep.subr.mxu1 %v3573_v31 }
 0xb3a   : > { %3732 = vmatpush1.msra.mxu1 %v3572_v12 }
 0xb3b   : > { %4153 = vmatmul.mubr.msk.f32.vlgmr.msra.gmra.mxu1 %vm751_vm1, %v3681_v33 }
 0xb3c   : > { %3771 = vmatprep.mubr.f32.mxu1 %v6661_v37 }
 0xb3f   : > { %4154 = vmatmul.mubr.msk.f32.gmra.mxu1 %vm751_vm1, %v3682_v16 }
 0xbf3   : > { %v3670_v14 = vpop.f32.mrf.mxu1 }
 0xbf4   : > { %v3671_v43 = vadd.f32 %v3670_v14, %v3591_v19 }
 0xbf5   : > { %v3672_v17 = vpop.f32.mrf.mxu1 }
 0xbf6   : > { %3778 = vst [vmem:[%s621_s29] sm:$0xff] %v3671_v43  ;;  %v3673_v62 = vadd.f32 %v3672_v17, %v3591_v19 }
 0xbf7   : > { %v3676_v48 = vpop.f32.mrf.mxu1 }
 0xbf8   : > { %3779 = vst [vmem:[%s621_s29 + $0x8] sm:$0xff] %v3673_v62  ;;  %v3677_v58 = vadd.f32 %v3676_v48, %v3596_v55 }
 0xbf9   : > { %v3678_v0 = vpop.f32.mrf.mxu1 }
 0xbfa   : > { %v3679_v34 = vadd.f32 %v3678_v0, %v3596_v55 }
 0xbfb   : > { %v3767_v38 = vpop.f32.mrf.mxu1 }
 0xbfc   : > { %v3768_v20 = vadd.f32 %v3767_v38, %v3688_v13 }
 0xbfd   : > { %v3769_v23 = vpop.f32.mrf.mxu1 }
 0xbfe   : > { %3780 = vst [vmem:[%s626_s22] sm:$0xff] %v3768_v20  ;;  %v3770_v47 = vadd.f32 %v3769_v23, %v3688_v13 }
 0xbff   : > { %v3773_v54 = vpop.f32.mrf.mxu1 }
 0xc00   : > { %3781 = vst [vmem:[%s626_s22 + $0x8] sm:$0xff] %v3770_v47  ;;  %v3774_v11 = vadd.f32 %v3773_v54, %v3693_v8 }
 0xc01   : > { %v3775_v29 = vpop.f32.mrf.mxu1 }
 0xc02   : > { %v3782_v51 = vadd.f32 %v3774_v11, %v3677_v58  ;;  %v3776_v3 = vadd.f32 %v3775_v29, %v3693_v8 }
 0xc04   : > { %3784 = vst [vmem:[%s616_s26] sm:$0xff] %v3782_v51  ;;  %v3783_v26 = vadd.f32 %v3776_v3, %v3679_v34 }
 0xc06   : > { %3785 = vst [vmem:[%s616_s26 + $0x8] sm:$0xff] %v3783_v26 }
 0xc07 PF: > { %s30_s27 = sadd.s32 1, %s4415_s27  }
 0xc08   : > { %p27_p1 = scmp.ge.s32.totalorder %s30_s27, 4  }
 0xc0a   :  { %29 = sbr.rel (!%p27_p1) target bundleno = 5 (0x5), region = 152 }
 0xc0f   :  { %3855 = vsyncpa [#allocation4], 1 }
 0xc10   :  { %3857 = vsyncpa [#allocation4 + $0x1], 1 }

</bundles_post_ra>
